<compile_context>
chip_gen: v7x
topology: tpu7x:2x2x1
jax: 0.10.0
libtpu: 0.0.40
codegen_flags: <defaults>
</compile_context>

<pallas_src>
import jax
import jax.numpy as jnp
from jax import lax
from jax.experimental import pallas as pl
from jax.experimental.pallas import tpu as pltpu

N_EMBD = 384          # from the module's globals
N_HEAD = 6
HEAD_SIZE = N_EMBD // N_HEAD   # 64
HIDDEN = 4 * N_EMBD            # 1536
LN_EPS = 1e-5


def _layernorm(z, gamma, beta):
    # One-pass statistics: var = E[z^2] - E[z]^2 (removes the mu -> var dependency
    # and one full-width subtract feeding the second lane reduction).
    mu = jnp.mean(z, axis=-1, keepdims=True)
    ms = jnp.mean(z * z, axis=-1, keepdims=True)
    var = jnp.maximum(ms - mu * mu, 0.0)
    return (z - mu) * lax.rsqrt(var + LN_EPS) * gamma + beta


def block_kernel(bias_ref, x_ref,
                 ln1g_ref, ln1b_ref,
                 wqkv_ref, wo_ref, bo_ref,
                 ln2g_ref, ln2b_ref,
                 w1_ref, b1_ref, w2_ref, b2_ref,
                 o_ref):
    BB, T, C = x_ref.shape
    x = x_ref[...].reshape(BB * T, C).astype(jnp.float32)          # (BB*T, C)

    # ---- LayerNorm 1 (f32 on the VPU) ----
    h = _layernorm(x, ln1g_ref[0], ln1b_ref[0])

    # ---- Fused QKV projection: one wide bf16 MXU pass (K=384, N=1152).
    #      The 1/sqrt(head_size) softmax scale is already folded into the Q columns. ----
    qkv = jnp.dot(h.astype(jnp.bfloat16), wqkv_ref[...],
                  preferred_element_type=jnp.float32)              # (BB*T, 3C) f32

    # Single relayout to per-head layout; q/k/v are then free major-dim slices.
    qkv = qkv.astype(jnp.bfloat16).reshape(BB, T, 3 * N_HEAD, HEAD_SIZE)
    qkv = jnp.transpose(qkv, (0, 2, 1, 3))                         # (BB, 3H, T, hs)
    G = BB * N_HEAD
    q = qkv[:, :N_HEAD].reshape(G, T, HEAD_SIZE)                   # (G, T, hs) bf16
    k = qkv[:, N_HEAD:2 * N_HEAD].reshape(G, T, HEAD_SIZE)
    v = qkv[:, 2 * N_HEAD:].reshape(G, T, HEAD_SIZE)

    # ---- Causal attention batched over the merged (batch, head) axis ----
    s = jnp.einsum('gtd,gsd->gts', q, k,
                   preferred_element_type=jnp.float32)             # (G, T, T) f32
    s = s + bias_ref[...]                                          # additive causal bias

    m = jnp.max(s, axis=-1, keepdims=True)
    e = jnp.exp(s - m)
    p = e * pl.reciprocal(jnp.sum(e, axis=-1, keepdims=True), approx=True)
    # TODO(synk): attention-weight / projection dropout omitted (inference mode).

    ctx = jnp.einsum('gts,gsd->gtd', p.astype(jnp.bfloat16), v,
                     preferred_element_type=jnp.float32)           # (G, T, hs) f32

    # Merge heads back into lanes (one relayout), then ONE full-depth K=384 MXU pass.
    ctx = jnp.transpose(
        ctx.astype(jnp.bfloat16).reshape(BB, N_HEAD, T, HEAD_SIZE),
        (0, 2, 1, 3)).reshape(BB * T, C)                           # (BB*T, C) bf16
    attn = jnp.dot(ctx, wo_ref[...],
                   preferred_element_type=jnp.float32) + bo_ref[0]

    x1 = x + attn                                                  # residual 1

    # ---- LayerNorm 2 + feedforward (bf16 MXU operands, f32 elementwise) ----
    h2 = _layernorm(x1, ln2g_ref[0], ln2b_ref[0])
    ff = jnp.dot(h2.astype(jnp.bfloat16), w1_ref[...],
                 preferred_element_type=jnp.float32) + b1_ref[0]
    ff = jnp.maximum(ff, 0.0)                                      # ReLU
    ff = jnp.dot(ff.astype(jnp.bfloat16), w2_ref[...],
                 preferred_element_type=jnp.float32) + b2_ref[0]

    o_ref[...] = (x1 + ff).reshape(BB, T, C).astype(o_ref.dtype)   # residual 2


def _pick_block_batch(B, T):
    """Largest divisor of B keeping BB*T <= 256 fused rows, while leaving >= 2 grid
    steps (megacore work on v7x) whenever B allows it."""
    best = 1
    for d in range(1, B + 1):
        if B % d:
            continue
        if d * T <= 256 and (B // d >= 2 or B == 1):
            best = d
    return best


def block_forward(x, params):
    B, T, C = x.shape
    assert C == N_EMBD
    BB = _pick_block_batch(B, T)

    # Fold the softmax scale into the Q columns of the fused QKV weight
    # (HEAD_SIZE**-0.5 == 0.125, a power of two -> exact in bf16).
    wqkv = params["wqkv"].at[:, :N_EMBD].multiply(HEAD_SIZE ** -0.5)

    # Causal additive bias, built once host-side; constant index_map -> DMA'd once per core.
    bias = jnp.where(jnp.tril(jnp.ones((T, T), dtype=bool)),
                     jnp.float32(0.0), jnp.float32(-1e30))

    full = lambda shape: pl.BlockSpec(shape, lambda b: tuple(0 for _ in shape))
    in_specs = [
        full((T, T)),                                   # causal bias (f32)
        pl.BlockSpec((BB, T, C), lambda b: (b, 0, 0)),  # x
        full((1, C)), full((1, C)),                     # ln1 gamma/beta (f32)
        full((C, 3 * C)),                               # fused Wqkv (bf16, q-scaled)
        full((C, C)),                                   # Wo (bf16)
        full((1, C)),                                   # bo (f32)
        full((1, C)), full((1, C)),                     # ln2 gamma/beta (f32)
        full((C, HIDDEN)), full((1, HIDDEN)),           # w1 (bf16), b1 (f32)
        full((HIDDEN, C)), full((1, C)),                # w2 (bf16), b2 (f32)
    ]

    return pl.pallas_call(
        block_kernel,
        out_shape=jax.ShapeDtypeStruct((B, T, C), x.dtype),
        grid_spec=pltpu.PrefetchScalarGridSpec(
            num_scalar_prefetch=0,
            grid=(B // BB,),
            in_specs=in_specs,
            out_specs=pl.BlockSpec((BB, T, C), lambda b: (b, 0, 0)),
        ),
        compiler_params=pltpu.CompilerParams(
            dimension_semantics=("parallel",),
            # 32 MiB: comfortably covers the worst-case (T=256) working set and is
            # valid / headroom-friendly on every generation (v7x: 64 MiB physical).
            vmem_limit_bytes=32 * 1024 * 1024,
        ),
    )(bias, x,
      params["ln1_g"], params["ln1_b"],
      wqkv, params["wo"], params["bo"],
      params["ln2_g"], params["ln2_b"],
      params["w1"], params["b1"], params["w2"], params["b2"])


def init_params(key):
    ks = jax.random.split(key, 5)
    scale = 0.02
    f32, bf16 = jnp.float32, jnp.bfloat16
    return {
        "ln1_g": jnp.ones((1, N_EMBD), f32),
        "ln1_b": jnp.zeros((1, N_EMBD), f32),
        # fused QKV weight: columns = [q heads | k heads | v heads], each head 64 cols.
        "wqkv": (scale * jax.random.normal(ks[0], (N_EMBD, 3 * N_EMBD), f32)).astype(bf16),
        "wo": (scale * jax.random.normal(ks[1], (N_EMBD, N_EMBD), f32)).astype(bf16),
        "bo": scale * jax.random.normal(ks[2], (1, N_EMBD), f32),
        "ln2_g": jnp.ones((1, N_EMBD), f32),
        "ln2_b": jnp.zeros((1, N_EMBD), f32),
        "w1": (scale * jax.random.normal(ks[3], (N_EMBD, HIDDEN), f32)).astype(bf16),
        "b1": jnp.zeros((1, HIDDEN), f32),
        "w2": (scale * jax.random.normal(ks[4], (HIDDEN, N_EMBD), f32)).astype(bf16),
        "b2": jnp.zeros((1, N_EMBD), f32),
    }


def block_forward_ref(x, p):
    """Pure-JAX f32 reference (weights upcast from bf16) for correctness checking."""
    f32 = jnp.float32

    def ln(z, g, b):
        mu = jnp.mean(z, axis=-1, keepdims=True)
        var = jnp.mean((z - mu) ** 2, axis=-1, keepdims=True)
        return (z - mu) / jnp.sqrt(var + LN_EPS) * g + b

    B, T, C = x.shape
    h = ln(x, p["ln1_g"][0], p["ln1_b"][0])
    qkv = h @ p["wqkv"].astype(f32)
    q, k, v = qkv[..., :C], qkv[..., C:2 * C], qkv[..., 2 * C:]
    q = q.reshape(B, T, N_HEAD, HEAD_SIZE).transpose(0, 2, 1, 3)
    k = k.reshape(B, T, N_HEAD, HEAD_SIZE).transpose(0, 2, 1, 3)
    v = v.reshape(B, T, N_HEAD, HEAD_SIZE).transpose(0, 2, 1, 3)
    wei = jnp.einsum("bhqd,bhkd->bhqk", q, k) * HEAD_SIZE ** (-0.5)
    mask = jnp.tril(jnp.ones((T, T), bool))
    wei = jnp.where(mask, wei, -jnp.inf)
    wei = jax.nn.softmax(wei, axis=-1)
    attn = jnp.einsum("bhqk,bhkd->bhqd", wei, v).transpose(0, 2, 1, 3).reshape(B, T, C)
    x1 = x + attn @ p["wo"].astype(f32) + p["bo"][0]
    h2 = ln(x1, p["ln2_g"][0], p["ln2_b"][0])
    ff = jnp.maximum(h2 @ p["w1"].astype(f32) + p["b1"][0], 0.0) @ p["w2"].astype(f32) + p["b2"][0]
    return x1 + ff


if __name__ == "__main__":
    key = jax.random.PRNGKey(0)
    kx, kp = jax.random.split(key)

    B, T = 2, 8                                    # small sequence (<= block_size=256)
    x = jax.random.normal(kx, (B, T, N_EMBD), jnp.float32)
    params = init_params(kp)

    out = jax.block_until_ready(block_forward(x, params))
    ref = block_forward_ref(x, params)

    assert out.shape == (B, T, N_EMBD)
    # bf16 matmul operands + approx reciprocal => slightly looser tolerance than pure f32.
    assert jnp.allclose(out, ref, atol=2e-2, rtol=2e-2), "mismatch vs JAX reference"

    print("KERNEL_OK")
</pallas_src>

<mosaic_0001>
module attributes {stable_mosaic.version = 11 : i64} {
  func.func @block_kernel(%arg0: i32, %arg1: memref<8x8xf32, #tpu.memory_space<vmem>>, %arg2: memref<1x8x384xf32, #tpu.memory_space<vmem>>, %arg3: memref<1x384xf32, #tpu.memory_space<vmem>>, %arg4: memref<1x384xf32, #tpu.memory_space<vmem>>, %arg5: memref<384x1152xbf16, #tpu.memory_space<vmem>>, %arg6: memref<384x384xbf16, #tpu.memory_space<vmem>>, %arg7: memref<1x384xf32, #tpu.memory_space<vmem>>, %arg8: memref<1x384xf32, #tpu.memory_space<vmem>>, %arg9: memref<1x384xf32, #tpu.memory_space<vmem>>, %arg10: memref<384x1536xbf16, #tpu.memory_space<vmem>>, %arg11: memref<1x1536xf32, #tpu.memory_space<vmem>>, %arg12: memref<1536x384xbf16, #tpu.memory_space<vmem>>, %arg13: memref<1x384xf32, #tpu.memory_space<vmem>>, %arg14: memref<1x8x384xf32, #tpu.memory_space<vmem>>) attributes {dimension_semantics = [#tpu.dimension_semantics<parallel>], iteration_bounds = array<i64: 2>, scalar_prefetch = 0 : i64, scratch_operands = 0 : i64, tpu.core_type = #tpu.core_type<tc>, window_params = [{pipeline_mode = #tpu.pipeline_mode<synchronous>, transform_indices = @transform_0, window_bounds = array<i64: 8, 8>}, {transform_indices = @transform_1, window_bounds = array<i64: 1, 8, 384>}, {pipeline_mode = #tpu.pipeline_mode<synchronous>, transform_indices = @transform_2, window_bounds = array<i64: 1, 384>}, {pipeline_mode = #tpu.pipeline_mode<synchronous>, transform_indices = @transform_3, window_bounds = array<i64: 1, 384>}, {pipeline_mode = #tpu.pipeline_mode<synchronous>, transform_indices = @transform_4, window_bounds = array<i64: 384, 1152>}, {pipeline_mode = #tpu.pipeline_mode<synchronous>, transform_indices = @transform_5, window_bounds = array<i64: 384, 384>}, {pipeline_mode = #tpu.pipeline_mode<synchronous>, transform_indices = @transform_6, window_bounds = array<i64: 1, 384>}, {pipeline_mode = #tpu.pipeline_mode<synchronous>, transform_indices = @transform_7, window_bounds = array<i64: 1, 384>}, {pipeline_mode = #tpu.pipeline_mode<synchronous>, transform_indices = @transform_8, window_bounds = array<i64: 1, 384>}, {pipeline_mode = #tpu.pipeline_mode<synchronous>, transform_indices = @transform_9, window_bounds = array<i64: 384, 1536>}, {pipeline_mode = #tpu.pipeline_mode<synchronous>, transform_indices = @transform_10, window_bounds = array<i64: 1, 1536>}, {pipeline_mode = #tpu.pipeline_mode<synchronous>, transform_indices = @transform_11, window_bounds = array<i64: 1536, 384>}, {pipeline_mode = #tpu.pipeline_mode<synchronous>, transform_indices = @transform_12, window_bounds = array<i64: 1, 384>}, {transform_indices = @transform_13, window_bounds = array<i64: 1, 8, 384>}]} {
    %c0 = arith.constant 0 : index
    %c0_0 = arith.constant 0 : index
    %c0_1 = arith.constant 0 : index
    %0 = vector.load %arg2[%c0, %c0_0, %c0_1] : memref<1x8x384xf32, #tpu.memory_space<vmem>>, vector<1x8x384xf32>
    %1 = vector.shape_cast %0 : vector<1x8x384xf32> to vector<8x384xf32>
    %c0_2 = arith.constant 0 : index
    %c0_3 = arith.constant 0 : index
    %2 = vector.load %arg3[%c0_2, %c0_3] : memref<1x384xf32, #tpu.memory_space<vmem>>, vector<1x384xf32>
    %3 = vector.shape_cast %2 : vector<1x384xf32> to vector<384xf32>
    %c0_4 = arith.constant 0 : index
    %c0_5 = arith.constant 0 : index
    %4 = vector.load %arg4[%c0_4, %c0_5] : memref<1x384xf32, #tpu.memory_space<vmem>>, vector<1x384xf32>
    %5 = vector.shape_cast %4 : vector<1x384xf32> to vector<384xf32>
    %cst = arith.constant dense<0.000000e+00> : vector<8xf32>
    %6 = vector.multi_reduction <add>, %1, %cst [1] : vector<8x384xf32> to vector<8xf32>
    %7 = vector.shape_cast %6 : vector<8xf32> to vector<8x1xf32>
    %cst_6 = arith.constant 3.840000e+02 : f32
    %8 = vector.broadcast %cst_6 : f32 to vector<8x1xf32>
    %9 = arith.divf %7, %8 : vector<8x1xf32>
    %10 = arith.mulf %1, %1 : vector<8x384xf32>
    %cst_7 = arith.constant dense<0.000000e+00> : vector<8xf32>
    %11 = vector.multi_reduction <add>, %10, %cst_7 [1] : vector<8x384xf32> to vector<8xf32>
    %12 = vector.shape_cast %11 : vector<8xf32> to vector<8x1xf32>
    %cst_8 = arith.constant 3.840000e+02 : f32
    %13 = vector.broadcast %cst_8 : f32 to vector<8x1xf32>
    %14 = arith.divf %12, %13 : vector<8x1xf32>
    %15 = arith.mulf %9, %9 : vector<8x1xf32>
    %16 = arith.subf %14, %15 : vector<8x1xf32>
    %cst_9 = arith.constant 0.000000e+00 : f32
    %17 = vector.broadcast %cst_9 : f32 to vector<8x1xf32>
    %18 = arith.maximumf %16, %17 : vector<8x1xf32>
    %19 = vector.broadcast %9 : vector<8x1xf32> to vector<8x384xf32>
    %20 = arith.subf %1, %19 : vector<8x384xf32>
    %cst_10 = arith.constant 9.99999974E-6 : f32
    %21 = vector.broadcast %cst_10 : f32 to vector<8x1xf32>
    %22 = arith.addf %18, %21 : vector<8x1xf32>
    %23 = math.rsqrt %22 : vector<8x1xf32>
    %24 = vector.broadcast %23 : vector<8x1xf32> to vector<8x384xf32>
    %25 = arith.mulf %20, %24 : vector<8x384xf32>
    %26 = vector.shape_cast %3 : vector<384xf32> to vector<1x384xf32>
    %27 = vector.broadcast %26 : vector<1x384xf32> to vector<8x384xf32>
    %28 = arith.mulf %25, %27 : vector<8x384xf32>
    %29 = vector.shape_cast %5 : vector<384xf32> to vector<1x384xf32>
    %30 = vector.broadcast %29 : vector<1x384xf32> to vector<8x384xf32>
    %31 = arith.addf %28, %30 : vector<8x384xf32>
    %32 = arith.truncf %31 : vector<8x384xf32> to vector<8x384xbf16>
    %c0_11 = arith.constant 0 : index
    %c0_12 = arith.constant 0 : index
    %33 = vector.load %arg5[%c0_11, %c0_12] : memref<384x1152xbf16, #tpu.memory_space<vmem>>, vector<384x1152xbf16>
    %cst_13 = arith.constant dense<0.000000e+00> : vector<8x1152xf32>
    %34 = tpu.matmul %32, %33, %cst_13 {dimension_numbers = #tpu.dot_dimension_numbers<[1], [0], [0], [1], [0, 0, 1, 1], [], []>} : vector<8x384xbf16>, vector<384x1152xbf16>, vector<8x1152xf32> -> vector<8x1152xf32>
    %35 = arith.truncf %34 : vector<8x1152xf32> to vector<8x1152xbf16>
    %36 = vector.shape_cast %35 : vector<8x1152xbf16> to vector<1x8x18x64xbf16>
    %37 = tpu.transpose %36, [0, 2, 1, 3] : vector<1x8x18x64xbf16> -> vector<1x18x8x64xbf16>
    %38 = vector.extract_strided_slice %37 {offsets = [0, 0, 0, 0], sizes = [1, 6, 8, 64], strides = [1, 1, 1, 1]} : vector<1x18x8x64xbf16> to vector<1x6x8x64xbf16>
    %39 = vector.shape_cast %38 : vector<1x6x8x64xbf16> to vector<6x8x64xbf16>
    %40 = vector.extract_strided_slice %37 {offsets = [0, 6, 0, 0], sizes = [1, 6, 8, 64], strides = [1, 1, 1, 1]} : vector<1x18x8x64xbf16> to vector<1x6x8x64xbf16>
    %41 = vector.shape_cast %40 : vector<1x6x8x64xbf16> to vector<6x8x64xbf16>
    %42 = vector.extract_strided_slice %37 {offsets = [0, 12, 0, 0], sizes = [1, 6, 8, 64], strides = [1, 1, 1, 1]} : vector<1x18x8x64xbf16> to vector<1x6x8x64xbf16>
    %43 = vector.shape_cast %42 : vector<1x6x8x64xbf16> to vector<6x8x64xbf16>
    "tpu.trace_start"() <{level = 10 : i32, message = "gtd,gsd->gts"}> : () -> ()
    %cst_14 = arith.constant dense<0.000000e+00> : vector<6x8x8xf32>
    %44 = tpu.matmul %39, %41, %cst_14 {dimension_numbers = #tpu.dot_dimension_numbers<[2], [2], [1], [1], [0, 0, 0, 1, 1, 1], [0], [0]>} : vector<6x8x64xbf16>, vector<6x8x64xbf16>, vector<6x8x8xf32> -> vector<6x8x8xf32>
    "tpu.trace_stop"() : () -> ()
    %c0_15 = arith.constant 0 : index
    %c0_16 = arith.constant 0 : index
    %45 = vector.load %arg1[%c0_15, %c0_16] : memref<8x8xf32, #tpu.memory_space<vmem>>, vector<8x8xf32>
    %46 = vector.shape_cast %45 : vector<8x8xf32> to vector<1x8x8xf32>
    %47 = vector.broadcast %46 : vector<1x8x8xf32> to vector<6x8x8xf32>
    %48 = arith.addf %44, %47 : vector<6x8x8xf32>
    %cst_17 = arith.constant dense<0xFF800000> : vector<6x8xf32>
    %49 = vector.multi_reduction <maximumf>, %48, %cst_17 [2] : vector<6x8x8xf32> to vector<6x8xf32>
    %50 = vector.shape_cast %49 : vector<6x8xf32> to vector<6x8x1xf32>
    %51 = vector.broadcast %50 : vector<6x8x1xf32> to vector<6x8x8xf32>
    %52 = arith.subf %48, %51 : vector<6x8x8xf32>
    %53 = math.exp %52 : vector<6x8x8xf32>
    %cst_18 = arith.constant dense<0.000000e+00> : vector<6x8xf32>
    %54 = vector.multi_reduction <add>, %53, %cst_18 [2] : vector<6x8x8xf32> to vector<6x8xf32>
    %55 = vector.shape_cast %54 : vector<6x8xf32> to vector<6x8x1xf32>
    %56 = tpu.reciprocal %55 {approx = true} : vector<6x8x1xf32> -> vector<6x8x1xf32>
    %57 = vector.broadcast %56 : vector<6x8x1xf32> to vector<6x8x8xf32>
    %58 = arith.mulf %53, %57 : vector<6x8x8xf32>
    %59 = arith.truncf %58 : vector<6x8x8xf32> to vector<6x8x8xbf16>
    "tpu.trace_start"() <{level = 10 : i32, message = "gts,gsd->gtd"}> : () -> ()
    %cst_19 = arith.constant dense<0.000000e+00> : vector<6x8x64xf32>
    %60 = tpu.matmul %59, %43, %cst_19 {dimension_numbers = #tpu.dot_dimension_numbers<[2], [1], [1], [2], [0, 0, 0, 1, 1, 2], [0], [0]>} : vector<6x8x8xbf16>, vector<6x8x64xbf16>, vector<6x8x64xf32> -> vector<6x8x64xf32>
    "tpu.trace_stop"() : () -> ()
    %61 = arith.truncf %60 : vector<6x8x64xf32> to vector<6x8x64xbf16>
    %62 = vector.shape_cast %61 : vector<6x8x64xbf16> to vector<1x6x8x64xbf16>
    %63 = tpu.transpose %62, [0, 2, 1, 3] : vector<1x6x8x64xbf16> -> vector<1x8x6x64xbf16>
    %64 = vector.shape_cast %63 : vector<1x8x6x64xbf16> to vector<8x384xbf16>
    %c0_20 = arith.constant 0 : index
    %c0_21 = arith.constant 0 : index
    %65 = vector.load %arg6[%c0_20, %c0_21] : memref<384x384xbf16, #tpu.memory_space<vmem>>, vector<384x384xbf16>
    %cst_22 = arith.constant dense<0.000000e+00> : vector<8x384xf32>
    %66 = tpu.matmul %64, %65, %cst_22 {dimension_numbers = #tpu.dot_dimension_numbers<[1], [0], [0], [1], [0, 0, 1, 1], [], []>} : vector<8x384xbf16>, vector<384x384xbf16>, vector<8x384xf32> -> vector<8x384xf32>
    %c0_23 = arith.constant 0 : index
    %c0_24 = arith.constant 0 : index
    %67 = vector.load %arg7[%c0_23, %c0_24] : memref<1x384xf32, #tpu.memory_space<vmem>>, vector<1x384xf32>
    %68 = vector.shape_cast %67 : vector<1x384xf32> to vector<384xf32>
    %69 = vector.shape_cast %68 : vector<384xf32> to vector<1x384xf32>
    %70 = vector.broadcast %69 : vector<1x384xf32> to vector<8x384xf32>
    %71 = arith.addf %66, %70 : vector<8x384xf32>
    %72 = arith.addf %1, %71 : vector<8x384xf32>
    %c0_25 = arith.constant 0 : index
    %c0_26 = arith.constant 0 : index
    %73 = vector.load %arg8[%c0_25, %c0_26] : memref<1x384xf32, #tpu.memory_space<vmem>>, vector<1x384xf32>
    %74 = vector.shape_cast %73 : vector<1x384xf32> to vector<384xf32>
    %c0_27 = arith.constant 0 : index
    %c0_28 = arith.constant 0 : index
    %75 = vector.load %arg9[%c0_27, %c0_28] : memref<1x384xf32, #tpu.memory_space<vmem>>, vector<1x384xf32>
    %76 = vector.shape_cast %75 : vector<1x384xf32> to vector<384xf32>
    %cst_29 = arith.constant dense<0.000000e+00> : vector<8xf32>
    %77 = vector.multi_reduction <add>, %72, %cst_29 [1] : vector<8x384xf32> to vector<8xf32>
    %78 = vector.shape_cast %77 : vector<8xf32> to vector<8x1xf32>
    %cst_30 = arith.constant 3.840000e+02 : f32
    %79 = vector.broadcast %cst_30 : f32 to vector<8x1xf32>
    %80 = arith.divf %78, %79 : vector<8x1xf32>
    %81 = arith.mulf %72, %72 : vector<8x384xf32>
    %cst_31 = arith.constant dense<0.000000e+00> : vector<8xf32>
    %82 = vector.multi_reduction <add>, %81, %cst_31 [1] : vector<8x384xf32> to vector<8xf32>
    %83 = vector.shape_cast %82 : vector<8xf32> to vector<8x1xf32>
    %cst_32 = arith.constant 3.840000e+02 : f32
    %84 = vector.broadcast %cst_32 : f32 to vector<8x1xf32>
    %85 = arith.divf %83, %84 : vector<8x1xf32>
    %86 = arith.mulf %80, %80 : vector<8x1xf32>
    %87 = arith.subf %85, %86 : vector<8x1xf32>
    %cst_33 = arith.constant 0.000000e+00 : f32
    %88 = vector.broadcast %cst_33 : f32 to vector<8x1xf32>
    %89 = arith.maximumf %87, %88 : vector<8x1xf32>
    %90 = vector.broadcast %80 : vector<8x1xf32> to vector<8x384xf32>
    %91 = arith.subf %72, %90 : vector<8x384xf32>
    %cst_34 = arith.constant 9.99999974E-6 : f32
    %92 = vector.broadcast %cst_34 : f32 to vector<8x1xf32>
    %93 = arith.addf %89, %92 : vector<8x1xf32>
    %94 = math.rsqrt %93 : vector<8x1xf32>
    %95 = vector.broadcast %94 : vector<8x1xf32> to vector<8x384xf32>
    %96 = arith.mulf %91, %95 : vector<8x384xf32>
    %97 = vector.shape_cast %74 : vector<384xf32> to vector<1x384xf32>
    %98 = vector.broadcast %97 : vector<1x384xf32> to vector<8x384xf32>
    %99 = arith.mulf %96, %98 : vector<8x384xf32>
    %100 = vector.shape_cast %76 : vector<384xf32> to vector<1x384xf32>
    %101 = vector.broadcast %100 : vector<1x384xf32> to vector<8x384xf32>
    %102 = arith.addf %99, %101 : vector<8x384xf32>
    %103 = arith.truncf %102 : vector<8x384xf32> to vector<8x384xbf16>
    %c0_35 = arith.constant 0 : index
    %c0_36 = arith.constant 0 : index
    %104 = vector.load %arg10[%c0_35, %c0_36] : memref<384x1536xbf16, #tpu.memory_space<vmem>>, vector<384x1536xbf16>
    %cst_37 = arith.constant dense<0.000000e+00> : vector<8x1536xf32>
    %105 = tpu.matmul %103, %104, %cst_37 {dimension_numbers = #tpu.dot_dimension_numbers<[1], [0], [0], [1], [0, 0, 1, 1], [], []>} : vector<8x384xbf16>, vector<384x1536xbf16>, vector<8x1536xf32> -> vector<8x1536xf32>
    %c0_38 = arith.constant 0 : index
    %c0_39 = arith.constant 0 : index
    %106 = vector.load %arg11[%c0_38, %c0_39] : memref<1x1536xf32, #tpu.memory_space<vmem>>, vector<1x1536xf32>
    %107 = vector.shape_cast %106 : vector<1x1536xf32> to vector<1536xf32>
    %108 = vector.shape_cast %107 : vector<1536xf32> to vector<1x1536xf32>
    %109 = vector.broadcast %108 : vector<1x1536xf32> to vector<8x1536xf32>
    %110 = arith.addf %105, %109 : vector<8x1536xf32>
    %cst_40 = arith.constant 0.000000e+00 : f32
    %111 = vector.broadcast %cst_40 : f32 to vector<8x1536xf32>
    %112 = arith.maximumf %110, %111 : vector<8x1536xf32>
    %113 = arith.truncf %112 : vector<8x1536xf32> to vector<8x1536xbf16>
    %c0_41 = arith.constant 0 : index
    %c0_42 = arith.constant 0 : index
    %114 = vector.load %arg12[%c0_41, %c0_42] : memref<1536x384xbf16, #tpu.memory_space<vmem>>, vector<1536x384xbf16>
    %cst_43 = arith.constant dense<0.000000e+00> : vector<8x384xf32>
    %115 = tpu.matmul %113, %114, %cst_43 {dimension_numbers = #tpu.dot_dimension_numbers<[1], [0], [0], [1], [0, 0, 1, 1], [], []>} : vector<8x1536xbf16>, vector<1536x384xbf16>, vector<8x384xf32> -> vector<8x384xf32>
    %c0_44 = arith.constant 0 : index
    %c0_45 = arith.constant 0 : index
    %116 = vector.load %arg13[%c0_44, %c0_45] : memref<1x384xf32, #tpu.memory_space<vmem>>, vector<1x384xf32>
    %117 = vector.shape_cast %116 : vector<1x384xf32> to vector<384xf32>
    %118 = vector.shape_cast %117 : vector<384xf32> to vector<1x384xf32>
    %119 = vector.broadcast %118 : vector<1x384xf32> to vector<8x384xf32>
    %120 = arith.addf %115, %119 : vector<8x384xf32>
    %121 = arith.addf %72, %120 : vector<8x384xf32>
    %122 = vector.shape_cast %121 : vector<8x384xf32> to vector<1x8x384xf32>
    %c0_46 = arith.constant 0 : index
    %c0_47 = arith.constant 0 : index
    %c0_48 = arith.constant 0 : index
    %123 = vector.load %arg14[%c0_46, %c0_47, %c0_48] : memref<1x8x384xf32, #tpu.memory_space<vmem>>, vector<1x8x384xf32>
    tpu.vector_store %arg14[%c0_46, %c0_47, %c0_48], %122 {strides = array<i32>} : memref<1x8x384xf32, #tpu.memory_space<vmem>>, vector<1x8x384xf32>,
    return
  }
  func.func @transform_0(%arg0: i32) -> (i32, i32) {
    %c0_i32 = arith.constant 0 : i32
    %c0_i32_0 = arith.constant 0 : i32
    %c0_i32_1 = arith.constant 0 : i32
    return %c0_i32, %c0_i32_0 : i32, i32
  }
  func.func @transform_1(%arg0: i32) -> (i32, i32, i32) {
    %c0_i32 = arith.constant 0 : i32
    %c0_i32_0 = arith.constant 0 : i32
    %c0_i32_1 = arith.constant 0 : i32
    return %arg0, %c0_i32, %c0_i32_0 : i32, i32, i32
  }
  func.func @transform_2(%arg0: i32) -> (i32, i32) {
    %c0_i32 = arith.constant 0 : i32
    %c0_i32_0 = arith.constant 0 : i32
    %c0_i32_1 = arith.constant 0 : i32
    return %c0_i32, %c0_i32_0 : i32, i32
  }
  func.func @transform_3(%arg0: i32) -> (i32, i32) {
    %c0_i32 = arith.constant 0 : i32
    %c0_i32_0 = arith.constant 0 : i32
    %c0_i32_1 = arith.constant 0 : i32
    return %c0_i32, %c0_i32_0 : i32, i32
  }
  func.func @transform_4(%arg0: i32) -> (i32, i32) {
    %c0_i32 = arith.constant 0 : i32
    %c0_i32_0 = arith.constant 0 : i32
    %c0_i32_1 = arith.constant 0 : i32
    return %c0_i32, %c0_i32_0 : i32, i32
  }
  func.func @transform_5(%arg0: i32) -> (i32, i32) {
    %c0_i32 = arith.constant 0 : i32
    %c0_i32_0 = arith.constant 0 : i32
    %c0_i32_1 = arith.constant 0 : i32
    return %c0_i32, %c0_i32_0 : i32, i32
  }
  func.func @transform_6(%arg0: i32) -> (i32, i32) {
    %c0_i32 = arith.constant 0 : i32
    %c0_i32_0 = arith.constant 0 : i32
    %c0_i32_1 = arith.constant 0 : i32
    return %c0_i32, %c0_i32_0 : i32, i32
  }
  func.func @transform_7(%arg0: i32) -> (i32, i32) {
    %c0_i32 = arith.constant 0 : i32
    %c0_i32_0 = arith.constant 0 : i32
    %c0_i32_1 = arith.constant 0 : i32
    return %c0_i32, %c0_i32_0 : i32, i32
  }
  func.func @transform_8(%arg0: i32) -> (i32, i32) {
    %c0_i32 = arith.constant 0 : i32
    %c0_i32_0 = arith.constant 0 : i32
    %c0_i32_1 = arith.constant 0 : i32
    return %c0_i32, %c0_i32_0 : i32, i32
  }
  func.func @transform_9(%arg0: i32) -> (i32, i32) {
    %c0_i32 = arith.constant 0 : i32
    %c0_i32_0 = arith.constant 0 : i32
    %c0_i32_1 = arith.constant 0 : i32
    return %c0_i32, %c0_i32_0 : i32, i32
  }
  func.func @transform_10(%arg0: i32) -> (i32, i32) {
    %c0_i32 = arith.constant 0 : i32
    %c0_i32_0 = arith.constant 0 : i32
    %c0_i32_1 = arith.constant 0 : i32
    return %c0_i32, %c0_i32_0 : i32, i32
  }
  func.func @transform_11(%arg0: i32) -> (i32, i32) {
    %c0_i32 = arith.constant 0 : i32
    %c0_i32_0 = arith.constant 0 : i32
    %c0_i32_1 = arith.constant 0 : i32
    return %c0_i32, %c0_i32_0 : i32, i32
  }
  func.func @transform_12(%arg0: i32) -> (i32, i32) {
    %c0_i32 = arith.constant 0 : i32
    %c0_i32_0 = arith.constant 0 : i32
    %c0_i32_1 = arith.constant 0 : i32
    return %c0_i32, %c0_i32_0 : i32, i32
  }
  func.func @transform_13(%arg0: i32) -> (i32, i32, i32) {
    %c0_i32 = arith.constant 0 : i32
    %c0_i32_0 = arith.constant 0 : i32
    %c0_i32_1 = arith.constant 0 : i32
    return %arg0, %c0_i32, %c0_i32_0 : i32, i32, i32
  }
}

</mosaic_0001>

<bundles_post_ra>
// kernel: tpu_custom_call.1
= control target key start
LH: loop header
LB: loop body
LE: loop exit
PB: predicated region body
PF: predicated region fallthrough
CT: control target
= control target key end

     0   :  { %s13726_s0 = inlined_call_operand.hbm [shape: f32[8,8], index: 0, kind: input, shape index: {}]   ;;  %s13727_s1 = inlined_call_operand.hbm [shape: f32[2,8,384], index: 1, kind: input, shape index: {}]   ;;  %s13728_s2 = inlined_call_operand.hbm [shape: f32[1,384], index: 2, kind: input, shape index: {}]   ;;  %s13729_s3 = inlined_call_operand.hbm [shape: f32[1,384], index: 3, kind: input, shape index: {}]   ;;  %s13730_s4 = inlined_call_operand.hbm [shape: bf16[384,1152], index: 4, kind: input, shape index: {}]   ;;  %s13731_s5 = inlined_call_operand.hbm [shape: bf16[384,384], index: 5, kind: input, shape index: {}]   ;;  %s13732_s6 = inlined_call_operand.hbm [shape: f32[1,384], index: 6, kind: input, shape index: {}]   ;;  %s13733_s7 = inlined_call_operand.hbm [shape: f32[1,384], index: 7, kind: input, shape index: {}]   ;;  %s13734_s8 = inlined_call_operand.hbm [shape: f32[1,384], index: 8, kind: input, shape index: {}]   ;;  %s13735_s9 = inlined_call_operand.hbm [shape: bf16[384,1536], index: 9, kind: input, shape index: {}]   ;;  %s13736_s10 = inlined_call_operand.hbm [shape: f32[1,1536], index: 10, kind: input, shape index: {}]   ;;  %s13737_s11 = inlined_call_operand.hbm [shape: bf16[1536,384], index: 11, kind: input, shape index: {}]   ;;  %s13738_s12 = inlined_call_operand.hbm [shape: f32[1,384], index: 12, kind: input, shape index: {}]   ;;  %s13739_s13 = inlined_call_operand.hbm [shape: f32[2,8,384], index: 13, kind: output, shape index: {}]  }
   0x1   :  { %13751 = sst [smem:[#allocation36_spill]] %s13726_s0 }
   0x2   :  { %13752 = sst [smem:[#allocation37_spill]] %s13727_s1 }
   0x3   :  { %13753 = sst [smem:[#allocation38_spill]] %s13728_s2 }
   0x4   :  { %13754 = sst [smem:[#allocation39_spill]] %s13729_s3 }
   0x5   :  { %13755 = sst [smem:[#allocation40_spill]] %s13739_s13 }
   0x6   :  { %18 = vsyncpa [#allocation3], 0 }
   0x7   :  { %19 = vsyncpa [#allocation6], 0 }
   0x8   :  { %21 = vsyncpa [#allocation6 + $0x1], 0 }
   0x9   :  { %22 = vsyncpa [#allocation9], 0 }
   0xa   :  { %23 = vsyncpa [#allocation12], 0 }
   0xb   :  { %24 = vsyncpa [#allocation15], 0 }
   0xc   :  { %25 = vsyncpa [#allocation18], 0 }
   0xd   :  { %26 = vsyncpa [#allocation21], 0 }
   0xe   :  { %27 = vsyncpa [#allocation4], 0 }
   0xf   :  { %29 = vsyncpa [#allocation4 + $0x1], 0  ;;  %s12764_s25 = smov 0   ;;  %s12766_s26 = smov 0  }
  0x10   :  { %s12768_s27 = smov 0   ;;  %s12770_s28 = smov 0  }
  0x11 LB: > { %13756 = sst [smem:[#allocation33_spill]] %s12654_s25  ;;  %s12668_s29 = smov [#allocation7]   ;;  %s12666_s28 = sphi %s12770_s28, %s13800_s28   ;;  %s12662_s27 = sphi %s12768_s27, %s13799_s27   ;;  %s12658_s26 = sphi %s12766_s26, %s13798_s26   ;;  %s12654_s25 = sphi %s12764_s25, %s13797_s25  }
  0x12   : > { %s368_s30 = sshll.u32 %s12668_s29, 4  ;;  %s12785_s14 = sadd.s32 4294967295, %s12666_s28   ;;  %s12790_s30 = int_to_ptr.vmem [resolvable:$true] %s368_s30 }
  0x13   : > { %13757 = sst [smem:[#allocation34_spill]] %s12785_s14  ;;  %p9472_p0 = scmp.ge.s32.totalorder %s12666_s28, 1 }
  0x14   : > { %p13746_p1 = scmp.eq.s32.totalorder %s12785_s14, 0  ;;  %p344_p2 = scmp.lt.s32.totalorder %s12666_s28, 3 }
  0x15   : > { %s12669_s16 = smov [#allocation8]   ;;  %s12670_s18 = smov [#allocation11]  }
  0x16   : > { %p12792_p3 = pnand %p9472_p0, %p344_p2  ;;  %s379_s17 = sshll.u32 %s12669_s16, 4  ;;  %s12799_s17 = int_to_ptr.vmem [resolvable:$true] %s379_s17 }
  0x17   : > { %s402_s19 = sshll.u32 %s12670_s18, 4  ;;  %s13761_s2 = sld [smem:[#allocation38_spill]]  ;;  %s12807_s19 = int_to_ptr.vmem [resolvable:$true] %s402_s19 }
  0x18   : > { %s13758_s15 = scalar_select %p12792_p3, 1, 0 }
  0x19   : > { %p10823_p5 = pneg %p12792_p3 }
  0x1a   : > { %13759 = sst [smem:[#allocation35_spill]] %s13758_s15 }
  0x1b   : > { %p12803_p6 = pnand %p10823_p5, %p13746_p1 }
  0x1d   : > { %s12206_s23 = scalar_lea.hbm %s13761_s2, 48  ;;  %p12817_p8 = pneg %p12803_p6 }
  0x1e   : > { %p12207_p7 = scmp.ne.s32.totalorder %s13761_s2, %s12206_s23  ;;  %p12213_p11 = scmp.lt.u32.totalorder %s12206_s23, %s13761_s2 }
  0x20   : > { %p12209_p9 = pnand %p12817_p8, %p12207_p7 }
  0x22   : > { %p12210_p10 = pneg %p12209_p9 }
  0x24   : > { %p12215_p12 = pnand %p12213_p11, %p12210_p10 }
  0x26   : > { %12218 = shalt.err (!%p12215_p12)
}
  0x27   : > { %s12219_s21 = scalar_lea.vmem %s12790_s30, 48  ;;  %s12226_s22 = scalar_lea.vmem %s12790_s30, 64 }
  0x28   : > { %p12220_p13 = scmp.ne.s32.totalorder %s12790_s30, %s12219_s21  ;;  %p12227_p5 = scmp.lt.s32.totalorder %s12790_s30, %s12790_s30 }
  0x29   : > { %p12228_p7 = scmp.lt.s32.totalorder %s12226_s22, %s12219_s21 }
  0x2a   : > { %p12222_p0 = pnand %p12220_p13, %p12817_p8 }
  0x2b   : > { %p12229_p9 = por %p12228_p7, %p12227_p5 }
  0x2c   : > { %p12223_p2 = pneg %p12222_p0 }
  0x2e   : > { %p12230_p4 = pnand %p12229_p9, %p12223_p2 }
  0x30   : > { %12233 = shalt.err (!%p12230_p4)
}
  0x31   : > { %10829 = dma.hbm_to_vmem [thread:$0]  (!%p12803_p6), %s13761_s2, 48, %s12790_s30, [#allocation6]  }
  0x32   : > { %s13763_s3 = sld [smem:[#allocation39_spill]] }
  0x38   : > { %s12234_s18 = scalar_lea.hbm %s13763_s3, 48 }
  0x39   : > { %p12235_p10 = scmp.ne.s32.totalorder %s13763_s3, %s12234_s18  ;;  %p12241_p4 = scmp.lt.u32.totalorder %s12234_s18, %s13763_s3 }
  0x3b   : > { %p12237_p11 = pnand %p12235_p10, %p12817_p8 }
  0x3d   : > { %p12238_p12 = pneg %p12237_p11 }
  0x3f   : > { %p12243_p13 = pnand %p12241_p4, %p12238_p12 }
  0x41   : > { %12246 = shalt.err (!%p12243_p13)
}
  0x42   : > { %s12247_s30 = scalar_lea.vmem %s12799_s17, 48  ;;  %s12254_s1 = scalar_lea.vmem %s12799_s17, 64 }
  0x43   : > { %p12248_p0 = scmp.ne.s32.totalorder %s12799_s17, %s12247_s30  ;;  %p12255_p7 = scmp.lt.s32.totalorder %s12799_s17, %s12799_s17 }
  0x44   : > { %p12256_p9 = scmp.lt.s32.totalorder %s12254_s1, %s12247_s30 }
  0x45   : > { %p12250_p2 = pnand %p12248_p0, %p12817_p8 }
  0x46   : > { %p12257_p10 = por %p12256_p9, %p12255_p7 }
  0x47   : > { %p12251_p5 = pneg %p12250_p2 }
  0x49   : > { %p12258_p11 = pnand %p12257_p10, %p12251_p5 }
  0x4b   : > { %12261 = shalt.err (!%p12258_p11)
}
  0x4c   : > { %10832 = dma.hbm_to_vmem [thread:$0]  (!%p12803_p6), %s13763_s3, 48, %s12799_s17, [#allocation9]  }
  0x4d   : > { %s12262_s29 = scalar_lea.hbm %s13731_s5, 9216 }
  0x4e   : > { %p12263_p12 = scmp.ne.s32.totalorder %s13731_s5, %s12262_s29  ;;  %p12269_p0 = scmp.lt.u32.totalorder %s12262_s29, %s13731_s5 }
  0x50   : > { %p12265_p4 = pnand %p12263_p12, %p12817_p8 }
  0x52   : > { %p12266_p13 = pneg %p12265_p4 }
  0x54   : > { %p12271_p2 = pnand %p12269_p0, %p12266_p13 }
  0x56   : > { %12274 = shalt.err (!%p12271_p2)
}
  0x57   : > { %s12275_s17 = scalar_lea.vmem %s12807_s19, 9216  ;;  %p12283_p10 = scmp.lt.s32.totalorder %s12807_s19, %s12807_s19 }
  0x58   : > { %p12276_p5 = scmp.ne.s32.totalorder %s12807_s19, %s12275_s17  ;;  %p12284_p11 = scmp.lt.s32.totalorder %s12275_s17, %s12275_s17 }
  0x5a   : > { %p12278_p7 = pnand %p12276_p5, %p12817_p8  ;;  %p12285_p12 = por %p12284_p11, %p12283_p10 }
  0x5c   : > { %p12279_p9 = pneg %p12278_p7 }
  0x5e   : > { %p12286_p4 = pnand %p12285_p12, %p12279_p9 }
  0x60   : > { %12289 = shalt.err (!%p12286_p4)
}
  0x61   : > { %s13748_s1 = smov 192   ;;  %s13749_s15 = smov 12  }
  0x62   : > { %10838 = dma.hbm_to_vmem [thread:$0]  (!%p12803_p6), %s13731_s5, 9216, %s12807_s19, [#allocation12], %s13748_s1, %s13748_s1, %s13749_s15  }
  0x63   : > { %s12673_s24 = smov [#allocation14]   ;;  %s12674_s18 = smov [#allocation17]  }
  0x64   : > { %s427_s29 = sshll.u32 %s12673_s24, 4  ;;  %s448_s21 = sshll.u32 %s12674_s18, 4  ;;  %s428_s29 = int_to_ptr.vmem [resolvable:$true] %s427_s29  ;;  %s449_s21 = int_to_ptr.vmem [resolvable:$true] %s448_s21 }
  0x65   : > { %s12290_s17 = scalar_lea.hbm %s13733_s7, 48 }
  0x66   : > { %p12291_p13 = scmp.ne.s32.totalorder %s13733_s7, %s12290_s17  ;;  %p12297_p5 = scmp.lt.u32.totalorder %s12290_s17, %s13733_s7 }
  0x68   : > { %p12293_p0 = pnand %p12291_p13, %p12817_p8 }
  0x6a   : > { %p12294_p2 = pneg %p12293_p0 }
  0x6c   : > { %p12299_p7 = pnand %p12297_p5, %p12294_p2 }
  0x6e   : > { %12302 = shalt.err (!%p12299_p7)
}
  0x6f   : > { %s12303_s19 = scalar_lea.vmem %s428_s29, 48  ;;  %s12310_s13 = scalar_lea.vmem %s428_s29, 64 }
  0x70   : > { %p12304_p9 = scmp.ne.s32.totalorder %s428_s29, %s12303_s19  ;;  %p12311_p12 = scmp.lt.s32.totalorder %s428_s29, %s428_s29 }
  0x71   : > { %p12312_p4 = scmp.lt.s32.totalorder %s12310_s13, %s12303_s19 }
  0x72   : > { %p12306_p10 = pnand %p12304_p9, %p12817_p8 }
  0x73   : > { %p12313_p1 = por %p12312_p4, %p12311_p12 }
  0x74   : > { %p12307_p11 = pneg %p12306_p10 }
  0x76   : > { %p12314_p3 = pnand %p12313_p1, %p12307_p11 }
  0x78   : > { %12317 = shalt.err (!%p12314_p3)
}
  0x79   : > { %10844 = dma.hbm_to_vmem [thread:$0]  (!%p12803_p6), %s13733_s7, 48, %s428_s29, [#allocation15]  }
  0x7a   : > { %s12318_s23 = scalar_lea.hbm %s13735_s9, 36864 }
  0x7b   : > { %p12319_p13 = scmp.ne.s32.totalorder %s13735_s9, %s12318_s23  ;;  %p12325_p3 = scmp.lt.u32.totalorder %s12318_s23, %s13735_s9 }
  0x7d   : > { %p12321_p0 = pnand %p12319_p13, %p12817_p8 }
  0x7f   : > { %p12322_p1 = pneg %p12321_p0 }
  0x81   : > { %p12327_p2 = pnand %p12325_p3, %p12322_p1 }
  0x83   : > { %12330 = shalt.err (!%p12327_p2)
}
  0x84   : > { %s12331_s17 = scalar_lea.vmem %s449_s21, 36864  ;;  %p12339_p10 = scmp.lt.s32.totalorder %s449_s21, %s449_s21 }
  0x85   : > { %p12332_p5 = scmp.ne.s32.totalorder %s449_s21, %s12331_s17  ;;  %p12340_p11 = scmp.lt.s32.totalorder %s12331_s17, %s12331_s17 }
  0x87   : > { %p12334_p7 = pnand %p12332_p5, %p12817_p8  ;;  %p12341_p12 = por %p12340_p11, %p12339_p10 }
  0x89   : > { %p12335_p9 = pneg %p12334_p7 }
  0x8b   : > { %p12342_p4 = pnand %p12341_p12, %p12335_p9 }
  0x8d   : > { %12345 = shalt.err (!%p12342_p4)
}
  0x8e   : > { %s12675_s29 = smov 768   ;;  %s12676_s19 = smov 48  }
  0x8f   : > { %10850 = dma.hbm_to_vmem [thread:$0]  (!%p12803_p6), %s13735_s9, 36864, %s449_s21, [#allocation18], %s12675_s29, %s12675_s29, %s12676_s19  }
  0x90   : > { %s12677_s3 = smov [#allocation20]   ;;  %s12678_s14 = smov [#allocation2]  }
  0x91   : > { %s472_s25 = sshll.u32 %s12677_s3, 4  ;;  %s357_s23 = sshll.u32 %s12678_s14, 4  ;;  %s473_s25 = int_to_ptr.vmem [resolvable:$true] %s472_s25  ;;  %s358_s23 = int_to_ptr.vmem [resolvable:$true] %s357_s23 }
  0x92   : > { %s12346_s22 = scalar_lea.hbm %s13737_s11, 36864 }
  0x93   : > { %p12347_p13 = scmp.ne.s32.totalorder %s13737_s11, %s12346_s22  ;;  %p12353_p3 = scmp.lt.u32.totalorder %s12346_s22, %s13737_s11 }
  0x95   : > { %p12349_p0 = pnand %p12347_p13, %p12817_p8 }
  0x97   : > { %p12350_p1 = pneg %p12349_p0 }
  0x99   : > { %p12355_p2 = pnand %p12353_p3, %p12350_p1 }
  0x9b   : > { %12358 = shalt.err (!%p12355_p2)
}
  0x9c   : > { %s12359_s21 = scalar_lea.vmem %s473_s25, 36864  ;;  %p12367_p10 = scmp.lt.s32.totalorder %s473_s25, %s473_s25 }
  0x9d   : > { %p12360_p5 = scmp.ne.s32.totalorder %s473_s25, %s12359_s21  ;;  %p12368_p11 = scmp.lt.s32.totalorder %s12359_s21, %s12359_s21 }
  0x9f   : > { %p12362_p7 = pnand %p12360_p5, %p12817_p8  ;;  %p12369_p12 = por %p12368_p11, %p12367_p10 }
  0xa1   : > { %p12363_p9 = pneg %p12362_p7 }
  0xa3   : > { %p12370_p4 = pnand %p12369_p12, %p12363_p9 }
  0xa5   : > { %12373 = shalt.err (!%p12370_p4)
}
  0xa6   : > { %s13764_s29 = smov 12   ;;  %s13765_s19 = smov 192  }
  0xa7   : > { %10856 = dma.hbm_to_vmem [thread:$0]  (!%p12803_p6), %s13737_s11, 36864, %s473_s25, [#allocation21], %s13765_s19, %s13765_s19, %s13764_s29  }
  0xa8   : > { %s13766_s0 = sld [smem:[#allocation36_spill]] }
  0xae   : > { %s12374_s3 = scalar_lea.hbm %s13766_s0, 128 }
  0xaf   : > { %p12375_p13 = scmp.ne.s32.totalorder %s13766_s0, %s12374_s3  ;;  %p12381_p3 = scmp.lt.u32.totalorder %s12374_s3, %s13766_s0 }
  0xb1   : > { %p12377_p0 = pnand %p12375_p13, %p12817_p8 }
  0xb3   : > { %p12378_p1 = pneg %p12377_p0 }
  0xb5   : > { %p12383_p2 = pnand %p12381_p3, %p12378_p1 }
  0xb7   : > { %12386 = shalt.err (!%p12383_p2)
}
  0xb8   : > { %s12387_s30 = scalar_lea.vmem %s358_s23, 128  ;;  %p12395_p10 = scmp.lt.s32.totalorder %s358_s23, %s358_s23 }
  0xb9   : > { %p12388_p5 = scmp.ne.s32.totalorder %s358_s23, %s12387_s30  ;;  %p12396_p11 = scmp.lt.s32.totalorder %s12387_s30, %s12387_s30 }
  0xbb   : > { %p12390_p7 = pnand %p12388_p5, %p12817_p8  ;;  %p12397_p12 = por %p12396_p11, %p12395_p10 }
  0xbd   : > { %p12391_p9 = pneg %p12390_p7 }
  0xbf   : > { %p12398_p4 = pnand %p12397_p12, %p12391_p9 }
  0xc1   : > { %12401 = shalt.err (!%p12398_p4)
}
  0xc2   : > { %10826 = dma.hbm_to_vmem [thread:$0]  (!%p12803_p6), %s13766_s0, 128, %s358_s23, [#allocation3]  }
  0xc3   : > { %s12679_s21 = smov [#allocation10]   ;;  %s12402_s15 = scalar_lea.hbm %s13730_s4, 27648 }
  0xc4   : > { %s389_s29 = sshll.u32 %s12679_s21, 4  ;;  %p12403_p13 = scmp.ne.s32.totalorder %s13730_s4, %s12402_s15  ;;  %s390_s29 = int_to_ptr.vmem [resolvable:$true] %s389_s29 }
  0xc5   : > { %p12409_p3 = scmp.lt.u32.totalorder %s12402_s15, %s13730_s4 }
  0xc6   : > { %p12405_p0 = pnand %p12403_p13, %p12817_p8 }
  0xc8   : > { %p12406_p1 = pneg %p12405_p0 }
  0xca   : > { %p12411_p2 = pnand %p12409_p3, %p12406_p1 }
  0xcc   : > { %12414 = shalt.err (!%p12411_p2)
}
  0xcd   : > { %s12415_s23 = scalar_lea.vmem %s390_s29, 27648  ;;  %p12423_p10 = scmp.lt.s32.totalorder %s390_s29, %s390_s29 }
  0xce   : > { %p12416_p5 = scmp.ne.s32.totalorder %s390_s29, %s12415_s23  ;;  %p12424_p11 = scmp.lt.s32.totalorder %s12415_s23, %s12415_s23 }
  0xd0   : > { %p12418_p7 = pnand %p12416_p5, %p12817_p8  ;;  %p12425_p12 = por %p12424_p11, %p12423_p10 }
  0xd2   : > { %p12419_p9 = pneg %p12418_p7 }
  0xd4   : > { %p12426_p4 = pnand %p12425_p12, %p12419_p9 }
  0xd6   : > { %12429 = shalt.err (!%p12426_p4)
}
  0xd7   : > { %s12680_s24 = smov 576   ;;  %s12681_s18 = smov 36  }
  0xd8   : > { %10835 = dma.hbm_to_vmem [thread:$0]  (!%p12803_p6), %s13730_s4, 27648, %s390_s29, [#allocation9], %s12680_s24, %s12680_s24, %s12681_s18  }
  0xd9   : > { %s12682_s25 = smov [#allocation13]   ;;  %s12683_s21 = smov [#allocation16]  }
  0xda   : > { %s416_s17 = sshll.u32 %s12682_s25, 4  ;;  %s438_s19 = sshll.u32 %s12683_s21, 4  ;;  %s417_s17 = int_to_ptr.vmem [resolvable:$true] %s416_s17  ;;  %s12982_s19 = int_to_ptr.vmem [resolvable:$true] %s438_s19 }
  0xdb   : > { %s12430_s13 = scalar_lea.hbm %s13732_s6, 48 }
  0xdc   : > { %p12431_p13 = scmp.ne.s32.totalorder %s13732_s6, %s12430_s13  ;;  %p12437_p3 = scmp.lt.u32.totalorder %s12430_s13, %s13732_s6 }
  0xde   : > { %p12433_p0 = pnand %p12431_p13, %p12817_p8 }
  0xe0   : > { %p12434_p1 = pneg %p12433_p0 }
  0xe2   : > { %p12439_p2 = pnand %p12437_p3, %p12434_p1 }
  0xe4   : > { %12442 = shalt.err (!%p12439_p2)
}
  0xe5   : > { %s12443_s23 = scalar_lea.vmem %s417_s17, 48  ;;  %s12450_s24 = scalar_lea.vmem %s417_s17, 64 }
  0xe6   : > { %p12444_p5 = scmp.ne.s32.totalorder %s417_s17, %s12443_s23  ;;  %p12451_p10 = scmp.lt.s32.totalorder %s417_s17, %s417_s17 }
  0xe7   : > { %p12452_p11 = scmp.lt.s32.totalorder %s12450_s24, %s12443_s23 }
  0xe8   : > { %p12446_p7 = pnand %p12444_p5, %p12817_p8 }
  0xe9   : > { %p12453_p12 = por %p12452_p11, %p12451_p10 }
  0xea   : > { %p12447_p9 = pneg %p12446_p7 }
  0xec   : > { %p12454_p4 = pnand %p12453_p12, %p12447_p9 }
  0xee   : > { %12457 = shalt.err (!%p12454_p4)
}
  0xef   : > { %10841 = dma.hbm_to_vmem [thread:$0]  (!%p12803_p6), %s13732_s6, 48, %s417_s17, [#allocation12]  }
  0xf0   : > { %s12458_s21 = scalar_lea.hbm %s13734_s8, 48 }
  0xf1   : > { %p12459_p13 = scmp.ne.s32.totalorder %s13734_s8, %s12458_s21  ;;  %p12465_p3 = scmp.lt.u32.totalorder %s12458_s21, %s13734_s8 }
  0xf3   : > { %p12461_p0 = pnand %p12459_p13, %p12817_p8 }
  0xf5   : > { %p12462_p1 = pneg %p12461_p0 }
  0xf7   : > { %p12467_p2 = pnand %p12465_p3, %p12462_p1 }
  0xf9   : > { %12470 = shalt.err (!%p12467_p2)
}
  0xfa   : > { %s12471_s17 = scalar_lea.vmem %s12982_s19, 48  ;;  %s12478_s3 = scalar_lea.vmem %s12982_s19, 64 }
  0xfb   : > { %p12472_p5 = scmp.ne.s32.totalorder %s12982_s19, %s12471_s17  ;;  %p12479_p10 = scmp.lt.s32.totalorder %s12982_s19, %s12982_s19 }
  0xfc   : > { %p12480_p11 = scmp.lt.s32.totalorder %s12478_s3, %s12471_s17 }
  0xfd   : > { %p12474_p7 = pnand %p12472_p5, %p12817_p8 }
  0xfe   : > { %p12481_p12 = por %p12480_p11, %p12479_p10 }
  0xff   : > { %p12475_p9 = pneg %p12474_p7 }
 0x101   : > { %p12482_p4 = pnand %p12481_p12, %p12475_p9 }
 0x103   : > { %12485 = shalt.err (!%p12482_p4)
}
 0x104   : > { %10847 = dma.hbm_to_vmem [thread:$0]  (!%p12803_p6), %s13734_s8, 48, %s12982_s19, [#allocation15]  }
 0x105   : > { %s12684_s23 = smov [#allocation19]   ;;  %s12685_s18 = smov [#allocation22]  }
 0x106   : > { %s462_s24 = sshll.u32 %s12684_s23, 4  ;;  %s486_s22 = sshll.u32 %s12685_s18, 4  ;;  %s463_s24 = int_to_ptr.vmem [resolvable:$true] %s462_s24  ;;  %s13026_s22 = int_to_ptr.vmem [resolvable:$true] %s486_s22 }
 0x107   : > { %s12486_s21 = scalar_lea.hbm %s13736_s10, 192 }
 0x108   : > { %p12487_p13 = scmp.ne.s32.totalorder %s13736_s10, %s12486_s21  ;;  %p12493_p3 = scmp.lt.u32.totalorder %s12486_s21, %s13736_s10 }
 0x10a   : > { %p12489_p0 = pnand %p12487_p13, %p12817_p8 }
 0x10c   : > { %p12490_p1 = pneg %p12489_p0 }
 0x10e   : > { %p12495_p2 = pnand %p12493_p3, %p12490_p1 }
 0x110   : > { %12498 = shalt.err (!%p12495_p2)
}
 0x111   : > { %s12499_s2 = scalar_lea.vmem %s463_s24, 192  ;;  %p12507_p10 = scmp.lt.s32.totalorder %s463_s24, %s463_s24 }
 0x112   : > { %p12500_p5 = scmp.ne.s32.totalorder %s463_s24, %s12499_s2  ;;  %p12508_p11 = scmp.lt.s32.totalorder %s12499_s2, %s12499_s2 }
 0x114   : > { %p12502_p7 = pnand %p12500_p5, %p12817_p8  ;;  %p12509_p12 = por %p12508_p11, %p12507_p10 }
 0x116   : > { %p12503_p9 = pneg %p12502_p7 }
 0x118   : > { %p12510_p4 = pnand %p12509_p12, %p12503_p9 }
 0x11a   : > { %12513 = shalt.err (!%p12510_p4)
}
 0x11b   : > { %10853 = dma.hbm_to_vmem [thread:$0]  (!%p12803_p6), %s13736_s10, 192, %s463_s24, [#allocation18]  }
 0x11c   : > { %s12514_s23 = scalar_lea.hbm %s13738_s12, 48 }
 0x11d   : > { %p12515_p13 = scmp.ne.s32.totalorder %s13738_s12, %s12514_s23  ;;  %p12521_p3 = scmp.lt.u32.totalorder %s12514_s23, %s13738_s12 }
 0x11f   : > { %p12517_p0 = pnand %p12515_p13, %p12817_p8 }
 0x121   : > { %p12518_p1 = pneg %p12517_p0 }
 0x123   : > { %p12523_p2 = pnand %p12521_p3, %p12518_p1 }
 0x125   : > { %12526 = shalt.err (!%p12523_p2)
}
 0x126   : > { %s12527_s24 = scalar_lea.vmem %s13026_s22, 48  ;;  %s12534_s1 = scalar_lea.vmem %s13026_s22, 64 }
 0x127   : > { %p12528_p5 = scmp.ne.s32.totalorder %s13026_s22, %s12527_s24  ;;  %p12535_p10 = scmp.lt.s32.totalorder %s13026_s22, %s13026_s22 }
 0x128   : > { %p12536_p11 = scmp.lt.s32.totalorder %s12534_s1, %s12527_s24 }
 0x129   : > { %p12530_p7 = pnand %p12528_p5, %p12817_p8 }
 0x12a   : > { %p12537_p12 = por %p12536_p11, %p12535_p10 }
 0x12b   : > { %p12531_p9 = pneg %p12530_p7 }
 0x12d   : > { %p12538_p4 = pnand %p12537_p12, %p12531_p9 }
 0x12f   : > { %12541 = shalt.err (!%p12538_p4)
}
 0x130   : > { %s13767_s16 = sld [smem:[#allocation33_spill]]  ;;  %s13768_s19 = sld [smem:[#allocation34_spill]] }
 0x131   : > { %10859 = dma.hbm_to_vmem [thread:$0]  (!%p12803_p6), %s13738_s12, 48, %s13026_s22, [#allocation21]  }
 0x132   : > { %s9471_s20 = sadd.s32 4294967294, %s12666_s28   ;;  %s13072_s2 = sadd.s32 1, %s12666_s28  }
 0x133   : > { %s60_s17 = ssub.s32 %s12666_s28, %s13072_s2  ;;  %s63_s3 = sadd.s32 1, %s12662_s27 }
 0x134   : > { %p61_p8 = scmp.eq.s32.totalorder %s60_s17, 0  ;;  %p70_p13 = scmp.ne.s32.totalorder %s12662_s27, %s12658_s26 }
 0x135   : > { %p71_p0 = scmp.eq.s32.totalorder %s12666_s28, 0  ;;  %p337_p7 = scmp.eq.s32.totalorder %s9471_s20, 1 }
 0x136   : > { %p76_p1 = scmp.ne.s32.totalorder %s12658_s26, %s13767_s16  ;;  %p13769_p2 = scmp.eq.s32.totalorder %s13768_s19, 0 }
 0x137   : > { %s13083_s14 = scalar_select %p61_p8, %s12662_s27, %s63_s3  }
 0x138   : > { %p72_p3 = por %p71_p0, %p70_p13  ;;  %p13087_p5 = por %p13769_p2, %p76_p1 }
 0x139   : > { %p331_p6 = scmp.eq.s32.totalorder %s13768_s19, 1  ;;  %p10880_p9 = scmp.lt.s32.totalorder %s12666_s28, 2 }
 0x13a   : > { %s497_s22 = sand.u32 1, %s12666_s28   ;;  %p13098_p11 = por %p337_p7, %p76_p1 }
 0x13b   : > { %p13094_p10 = por %p331_p6, %p70_p13  ;;  %s499_s30 = sand.u32 1, %s12662_s27  }
 0x13c   : > { %s13772_s18 = scalar_select %p13098_p11, 1, 0 }
 0x13d   : > { %s13771_s23 = scalar_select %p13094_p10, 1, 0 }
 0x13e   : > { %s10767_s25 = smul.u32 24, %s499_s30  ;;  %p13103_p12 = pnand %p10880_p9, %p72_p3 }
 0x13f   : > { %s10768_s24 = smul.u32 384, %s12666_s28  ;;  %s13774_s13 = sld [smem:[#allocation37_spill]] }
 0x140   : > { %s501_s19 = scalar_lea.vmem [#allocation5], %s10767_s25  ;;  %s498_s17 = scalar_lea.sflag [#allocation6], %s497_s22 }
 0x141   : > { %s509_s20 = sshll.u32 %s501_s19, 4  ;;  %p12544_p8 = pneg %p13103_p12  ;;  %s13113_s20 = int_to_ptr.vmem [resolvable:$true] %s509_s20 }
 0x145   : > { %s13111_s16 = scalar_lea.hbm %s13774_s13, %s10768_s24  ;;  %s12547_s1 = scalar_lea.hbm %s13774_s13, 768 }
 0x146   : > { %s12542_s3 = scalar_lea.hbm %s13111_s16, 384  ;;  %p12548_p1 = scmp.lt.u32.totalorder %s13111_s16, %s13774_s13 }
 0x147   : > { %p12543_p4 = scmp.ne.s32.totalorder %s13111_s16, %s12542_s3  ;;  %p12549_p3 = scmp.lt.u32.totalorder %s12547_s1, %s12542_s3 }
 0x148   : > { %p12551_p6 = scmp.lt.u32.totalorder %s12542_s3, %s13111_s16 }
 0x149   : > { %p12545_p13 = pnand %p12544_p8, %p12543_p4  ;;  %p12550_p2 = por %p12549_p3, %p12548_p1 }
 0x14b   : > { %p12546_p0 = pneg %p12545_p13  ;;  %p12552_p7 = por %p12551_p6, %p12550_p2 }
 0x14d   : > { %p12553_p9 = pnand %p12552_p7, %p12546_p0 }
 0x14f   : > { %12556 = shalt.err (!%p12553_p9)
}
 0x150   : > { %s12557_s22 = scalar_lea.vmem %s13113_s20, 384  ;;  %s12686_s25 = smov [#allocation5]  }
 0x151   : > { %p12558_p4 = scmp.ne.s32.totalorder %s13113_s20, %s12557_s22  ;;  %s12562_s19 = sshll.u32 %s12686_s25, 4  ;;  %s12563_s19 = int_to_ptr.vmem [resolvable:$false] %s12562_s19 }
 0x152   : > { %s12564_s0 = scalar_lea.vmem %s12563_s19, 768  ;;  %p12565_p10 = scmp.lt.s32.totalorder %s13113_s20, %s12563_s19 }
 0x153   : > { %p12560_p13 = pnand %p12558_p4, %p12544_p8  ;;  %p12566_p1 = scmp.lt.s32.totalorder %s12564_s0, %s12557_s22 }
 0x155   : > { %p12561_p11 = pneg %p12560_p13  ;;  %p12567_p3 = por %p12566_p1, %p12565_p10 }
 0x157   : > { %p12568_p2 = pnand %p12567_p3, %p12561_p11 }
 0x159   : > { %12571 = shalt.err (!%p12568_p2)
}
 0x15a   : > { %10863 = dma.hbm_to_vmem [thread:$0]  (!%p13103_p12), %s13111_s16, 384, %s13113_s20, %s498_s17  }
 0x15b   : > { %s13775_s3 = sld [smem:[#allocation35_spill]] }
 0x161   : > { %p13776_p0 = scmp.ne.s32.totalorder %s13775_s3, 0 }
 0x162   : > { %s13777_s30 = sld [smem:[#allocation34_spill]] (!%p13776_p0) }
 0x163   : > { %518 = sbr.rel (%p13776_p0) target bundleno = 3194 (0xc7a), region = 72 }
 0x168   : > { %p13778_p8 = scmp.eq.s32.totalorder (!%p13776_p0), %s13777_s30, 0 }
 0x16a   : > { %12617 = dma.done.wait (%p13778_p8), [#allocation3], 128   ;;  %p13779_p6 = pmov %p13778_p8 }
 0x16b   : > { %s524_s24 = sand.u32 1, %s13777_s30   ;;  %s526_s1 = sand.u32 1, %s12658_s26  }
 0x16c   : > { %12619 = vsyncadd (%p13779_p6), [#allocation3], 4294967168  ;;  %s13150_s21 = smul.u32 24, %s526_s1  ;;  %s525_s16 = scalar_lea.sflag [#allocation6], %s524_s24 }
 0x16e   : > { %s13153_s20 = scalar_lea.vmem [#allocation5], %s13150_s21 }
 0x16f   : > { %12621 = dma.done.wait (%p13087_p5), %s525_s16, 384  }
 0x170   : > { %12623 = vsyncadd (%p13087_p5), %s525_s16, 4294966912  ;;  %p13780_p10 = pmov %p13779_p6 }
 0x171   : > { %p13781_p11 = pmov %p13779_p6 }
 0x172   : > { %12625 = dma.done.wait (%p13780_p10), [#allocation6], 48  }
 0x173   : > { %12627 = vsyncadd (%p13781_p11), [#allocation6], 4294967248  ;;  %p13782_p12 = pmov %p13779_p6 }
 0x174   : > { %p13783_p7 = pmov %p13779_p6 }
 0x175   : > { %12629 = dma.done.wait (%p13782_p12), [#allocation9], 27696  }
 0x176   : > { %12631 = vsyncadd (%p13783_p7), [#allocation9], 4294939600  ;;  %p13784_p9 = pmov %p13779_p6 }
 0x177   : > { %p13785_p4 = pmov %p13779_p6 }
 0x178   : > { %12633 = dma.done.wait (%p13784_p9), [#allocation12], 9264  }
 0x179   : > { %12635 = vsyncadd (%p13785_p4), [#allocation12], 4294958032  ;;  %p13786_p5 = pmov %p13785_p4 }
 0x17a   : > { %p13787_p13 = pmov %p13785_p4 }
 0x17b   : > { %12637 = dma.done.wait (%p13786_p5), [#allocation15], 96  }
 0x17c   : > { %12639 = vsyncadd (%p13787_p13), [#allocation15], 4294967200  ;;  %p13788_p1 = pmov %p13785_p4 }
 0x17e   : > { %12641 = dma.done.wait (%p13788_p1), [#allocation18], 37056   ;;  %p13789_p3 = pmov %p13788_p1 }
 0x17f   : > { %p13790_p2 = pmov %p13788_p1 }
 0x180   : > { %12643 = vsyncadd (%p13789_p3), [#allocation18], 4294930240 }
 0x181   : > { %12645 = dma.done.wait (%p13790_p2), [#allocation21], 36912   ;;  %p13791_p0 = pmov %p13788_p1 }
 0x182   : > { %v13184_v0 = vld [vmem:[%s13153_s20] sm:$0xff]  ;;  %v13187_v1 = vld [vmem:[%s13153_s20 + $0x8] sm:$0xff]  ;;  %v618_v2 = vld [vmem:[%s13153_s20 + $0x10] sm:$0xff]  ;;  %vm12689_vm0 = vmmov 0   ;;  %s12691_s29 = smov 64   ;;  %vm2971_vm1 = vcmask 523264  }
 0x183   : > { %12647 = vsyncadd (%p13791_p0), [#allocation21], 4294930384  ;;  %v621_v3 = vadd.f32 %v13187_v1, %v13184_v0  ;;  %v627_v4 = vmul.f32 %v13184_v0, %v13184_v0  ;;  %v628_v5 = vmul.f32 %v13187_v1, %v13187_v1  ;;  %v629_v6 = vmul.f32 %v618_v2, %v618_v2  ;;  %v10950_v7 = vld [vmem:[#allocation10 + $0x4] ss:$36 sps:$4 sm:$0xff]   ;;  %v10952_v8 = vld [vmem:[#allocation10 + $0xc] ss:$36 sps:$4 sm:$0xff]  }
 0x184   : > { %2031 = vmatprep.subr.bf16.mxu0 %v10950_v7  ;;  %v10954_v11 = vld [vmem:[#allocation10] ss:$36 sps:$4 sm:$0xff]   ;;  %v10955_v12 = vld [vmem:[#allocation10 + $0x8] ss:$36 sps:$4 sm:$0xff]   ;;  %2113 = vmatprep.subr.bf16.mxu1 %v10952_v8  ;;  %v10958_v15 = vld [vmem:[#allocation10 + $0x54] ss:$36 sps:$4 sm:$0xff]  }
 0x185   : > { %v622_v9 = vadd.f32 %v621_v3, %v618_v2  ;;  %v630_v10 = vadd.f32 %v628_v5, %v627_v4  ;;  %v10956_v13 = vld [vmem:[#allocation10 + $0x4c] ss:$36 sps:$4 sm:$0xff]   ;;  %2032 = vmatpush1.bf16.msra.mxu0 %v10954_v11  ;;  %2114 = vmatpush1.bf16.msra.mxu1 %v10955_v12  ;;  %v10962_v18 = vld [vmem:[#allocation10 + $0x94] ss:$36 sps:$4 sm:$0xff]   ;;  %v10964_v19 = vld [vmem:[#allocation10 + $0x9c] ss:$36 sps:$4 sm:$0xff]  }
 0x186   : > { %v10960_v16 = vld [vmem:[#allocation10 + $0x48] ss:$36 sps:$4 sm:$0xff]   ;;  %2033 = vmatprep.subr.bf16.mxu0 %v10956_v13  ;;  %v10961_v17 = vld [vmem:[#allocation10 + $0x50] ss:$36 sps:$4 sm:$0xff]   ;;  %2115 = vmatprep.subr.bf16.mxu1 %v10958_v15  ;;  %v10967_v21 = vld [vmem:[#allocation10 + $0x98] ss:$36 sps:$4 sm:$0xff]  }
 0x187   : > { %623 = vadd.xlane.f32.xlu0 %v622_v9  ;;  %v631_v14 = vadd.f32 %v630_v10, %v629_v6  ;;  %v10966_v20 = vld [vmem:[#allocation10 + $0x90] ss:$36 sps:$4 sm:$0xff]   ;;  %v10968_v22 = vld [vmem:[#allocation10 + $0xdc] ss:$36 sps:$4 sm:$0xff]   ;;  %v10970_v23 = vld [vmem:[#allocation10 + $0xe4] ss:$36 sps:$4 sm:$0xff]  }
 0x188   : > { %v10972_v24 = vld [vmem:[#allocation10 + $0xd8] ss:$36 sps:$4 sm:$0xff]   ;;  %v10973_v25 = vld [vmem:[#allocation10 + $0xe0] ss:$36 sps:$4 sm:$0xff]   ;;  %v10976_v27 = vld [vmem:[#allocation10 + $0x12c] ss:$36 sps:$4 sm:$0xff]  }
 0x189   : > { %2034 = vmatpush1.bf16.msra.mxu0 %v10960_v16  ;;  %2116 = vmatpush1.bf16.msra.mxu1 %v10961_v17  ;;  %v10974_v26 = vld [vmem:[#allocation10 + $0x124] ss:$36 sps:$4 sm:$0xff]   ;;  %v10980_v30 = vld [vmem:[#allocation10 + $0x16c] ss:$36 sps:$4 sm:$0xff]   ;;  %v10982_v31 = vld [vmem:[#allocation10 + $0x174] ss:$36 sps:$4 sm:$0xff]  }
 0x18a   : > { %2035 = vmatprep.subr.bf16.mxu0 %v10962_v18  ;;  %2117 = vmatprep.subr.bf16.mxu1 %v10964_v19  ;;  %v10978_v28 = vld [vmem:[#allocation10 + $0x120] ss:$36 sps:$4 sm:$0xff]   ;;  %v10979_v29 = vld [vmem:[#allocation10 + $0x128] ss:$36 sps:$4 sm:$0xff]   ;;  %v10985_v33 = vld [vmem:[#allocation10 + $0x170] ss:$36 sps:$4 sm:$0xff]  }
 0x18b   : > { %632 = vadd.xlane.f32.xlu0 %v631_v14  ;;  %v10984_v32 = vld [vmem:[#allocation10 + $0x168] ss:$36 sps:$4 sm:$0xff]   ;;  %v10986_v34 = vld [vmem:[#allocation10 + $0x1b4] ss:$36 sps:$4 sm:$0xff]   ;;  %v10988_v35 = vld [vmem:[#allocation10 + $0x1bc] ss:$36 sps:$4 sm:$0xff]  }
 0x18c   : > { %v10990_v36 = vld [vmem:[#allocation10 + $0x1b0] ss:$36 sps:$4 sm:$0xff]   ;;  %v10991_v37 = vld [vmem:[#allocation10 + $0x1b8] ss:$36 sps:$4 sm:$0xff]   ;;  %v10994_v39 = vld [vmem:[#allocation10 + $0x204] ss:$36 sps:$4 sm:$0xff]  }
 0x18d   : > { %2036 = vmatpush1.bf16.msra.mxu0 %v10966_v20  ;;  %2118 = vmatpush1.bf16.msra.mxu1 %v10967_v21  ;;  %v10992_v38 = vld [vmem:[#allocation10 + $0x1fc] ss:$36 sps:$4 sm:$0xff]   ;;  %v10998_v42 = vld [vmem:[#allocation10 + $0x244] ss:$36 sps:$4 sm:$0xff]   ;;  %v11000_v43 = vld [vmem:[#allocation10 + $0x24c] ss:$36 sps:$4 sm:$0xff]   ;;  %v647_v20 = vlaneseq }
 0x18e   : > { %2037 = vmatprep.subr.bf16.mxu0 %v10968_v22  ;;  %2119 = vmatprep.subr.bf16.mxu1 %v10970_v23  ;;  %v10996_v40 = vld [vmem:[#allocation10 + $0x1f8] ss:$36 sps:$4 sm:$0xff]   ;;  %v10997_v41 = vld [vmem:[#allocation10 + $0x200] ss:$36 sps:$4 sm:$0xff]   ;;  %v11003_v45 = vld [vmem:[#allocation10 + $0x248] ss:$36 sps:$4 sm:$0xff]  }
 0x18f   : > { %v11002_v44 = vld [vmem:[#allocation10 + $0x240] ss:$36 sps:$4 sm:$0xff]   ;;  %v11004_v46 = vld [vmem:[#allocation10 + $0x28c] ss:$36 sps:$4 sm:$0xff]   ;;  %v11006_v47 = vld [vmem:[#allocation10 + $0x294] ss:$36 sps:$4 sm:$0xff]  }
 0x190   : > { %v11008_v48 = vld [vmem:[#allocation10 + $0x288] ss:$36 sps:$4 sm:$0xff]   ;;  %v11009_v49 = vld [vmem:[#allocation10 + $0x290] ss:$36 sps:$4 sm:$0xff]   ;;  %v11012_v51 = vld [vmem:[#allocation10 + $0x2dc] ss:$36 sps:$4 sm:$0xff]  }
 0x191   : > { %2038 = vmatpush1.bf16.msra.mxu0 %v10972_v24  ;;  %2120 = vmatpush1.bf16.msra.mxu1 %v10973_v25  ;;  %v11010_v50 = vld [vmem:[#allocation10 + $0x2d4] ss:$36 sps:$4 sm:$0xff]   ;;  %v11016_v54 = vld [vmem:[#allocation10 + $0x31c] ss:$36 sps:$4 sm:$0xff]   ;;  %v11018_v55 = vld [vmem:[#allocation10 + $0x324] ss:$36 sps:$4 sm:$0xff]  }
 0x192   : > { %2039 = vmatprep.subr.bf16.mxu0 %v10974_v26  ;;  %2121 = vmatprep.subr.bf16.mxu1 %v10976_v27  ;;  %v11014_v52 = vld [vmem:[#allocation10 + $0x2d0] ss:$36 sps:$4 sm:$0xff]   ;;  %v11015_v53 = vld [vmem:[#allocation10 + $0x2d8] ss:$36 sps:$4 sm:$0xff]   ;;  %v11021_v57 = vld [vmem:[#allocation10 + $0x320] ss:$36 sps:$4 sm:$0xff]  }
 0x193   : > { %v11020_v56 = vld [vmem:[#allocation10 + $0x318] ss:$36 sps:$4 sm:$0xff]   ;;  %v11022_v58 = vld [vmem:[#allocation10 + $0x364] ss:$36 sps:$4 sm:$0xff]   ;;  %v11024_v59 = vld [vmem:[#allocation10 + $0x36c] ss:$36 sps:$4 sm:$0xff]  }
 0x194   : > { %v11026_v60 = vld [vmem:[#allocation10 + $0x360] ss:$36 sps:$4 sm:$0xff]   ;;  %v11027_v61 = vld [vmem:[#allocation10 + $0x368] ss:$36 sps:$4 sm:$0xff]   ;;  %v11030_v63 = vld [vmem:[#allocation10 + $0x3b4] ss:$36 sps:$4 sm:$0xff]  }
 0x195   : > { %2040 = vmatpush1.bf16.msra.mxu0 %v10978_v28  ;;  %2122 = vmatpush1.bf16.msra.mxu1 %v10979_v29  ;;  %v11028_v62 = vld [vmem:[#allocation10 + $0x3ac] ss:$36 sps:$4 sm:$0xff]   ;;  %v11034_v4 = vld [vmem:[#allocation10 + $0x3f4] ss:$36 sps:$4 sm:$0xff]   ;;  %v11036_v5 = vld [vmem:[#allocation10 + $0x3fc] ss:$36 sps:$4 sm:$0xff]  }
 0x196   : > { %2041 = vmatprep.subr.bf16.mxu0 %v10980_v30  ;;  %2123 = vmatprep.subr.bf16.mxu1 %v10982_v31  ;;  %v11032_v2 = vld [vmem:[#allocation10 + $0x3a8] ss:$36 sps:$4 sm:$0xff]   ;;  %v11033_v3 = vld [vmem:[#allocation10 + $0x3b0] ss:$36 sps:$4 sm:$0xff]   ;;  %v11039_v7 = vld [vmem:[#allocation10 + $0x3f8] ss:$36 sps:$4 sm:$0xff]  }
 0x197   : > { %v11038_v6 = vld [vmem:[#allocation10 + $0x3f0] ss:$36 sps:$4 sm:$0xff]   ;;  %v11040_v8 = vld [vmem:[#allocation10 + $0x43c] ss:$36 sps:$4 sm:$0xff]   ;;  %v11042_v9 = vld [vmem:[#allocation10 + $0x444] ss:$36 sps:$4 sm:$0xff]  }
 0x198   : > { %v11044_v10 = vld [vmem:[#allocation10 + $0x438] ss:$36 sps:$4 sm:$0xff]   ;;  %v11045_v11 = vld [vmem:[#allocation10 + $0x440] ss:$36 sps:$4 sm:$0xff]   ;;  %v11051_v13 = vld [vmem:[#allocation10 + $0x48c] ss:$36 sps:$4 sm:$0xff]  }
 0x199   : > { %2042 = vmatpush1.bf16.msra.mxu0 %v10984_v32  ;;  %2124 = vmatpush1.bf16.msra.mxu1 %v10985_v33  ;;  %v11048_v12 = vld [vmem:[#allocation10 + $0x484] ss:$36 sps:$4 sm:$0xff]   ;;  %v13200_v23 = vshrl.u32 %v647_v20, 7  ;;  %v13208_v26 = vld [vmem:[#allocation7] sm:$0x7]  ;;  %vm3324_vm2 = vcmask 1043456  }
 0x19a   : > { %2043 = vmatprep.subr.bf16.mxu0 %v10986_v34  ;;  %2125 = vmatprep.subr.bf16.mxu1 %v10988_v35  ;;  %v13210_v27 = vld [vmem:[#allocation8] sm:$0x7]  ;;  %v11094_v20 = vld [vmem:[#allocation10 + $0x10] ss:$36 sps:$4 sm:$0xff]   ;;  %vm3248_vm3 = vcmask 64512   ;;  %s13668_s17 = scalar_lea.vmem [#allocation23], %s13150_s21 }
 0x19b   : > { %v13203_v24 = vsub.s32 1, %v13200_v23  ;;  %v13206_v25 = vsub.s32 0, %v13200_v23  ;;  %s10770_s15 = smul.u32 384, %s13777_s30  ;;  %s9285_s22 = sshll.u32 %s13668_s17, 4  ;;  %s13682_s22 = int_to_ptr.vmem [resolvable:$true] %s9285_s22 }
 0x19c   : > { %s13792_s0 = sld [smem:[#allocation40_spill]]  ;;  %s9271_s24 = scalar_lea.sflag [#allocation4], %s526_s1 }
 0x19d   : > { %2044 = vmatpush1.bf16.msra.mxu0 %v10990_v36  ;;  %2126 = vmatpush1.bf16.msra.mxu1 %v10991_v37  ;;  %v654_v30 = vrot.slane %v13208_v26, %v13203_v24  ;;  %v650_v31 = vrot.slane %v13208_v26, %v13206_v25  ;;  %v673_v34 = vrot.slane %v13210_v27, %v13203_v24  ;;  %s12572_s21 = scalar_lea.vmem %s13682_s22, 384  ;;  %p13793_p6 = scmp.ne.s32.totalorder %s13771_s23, 0 }
 0x19e   : > { %2045 = vmatprep.subr.bf16.mxu0 %v10992_v38  ;;  %2127 = vmatprep.subr.bf16.mxu1 %v10994_v39  ;;  %v11046_v38 = vld [vmem:[#allocation10 + $0x480] ss:$36 sps:$4 sm:$0xff]   ;;  %v11049_v39 = vld [vmem:[#allocation10 + $0x488] ss:$36 sps:$4 sm:$0xff]   ;;  %p12573_p8 = scmp.ne.s32.totalorder %s13682_s22, %s12572_s21  ;;  %s12693_s30 = smov [#allocation23]  }
 0x19f   : > { %s12576_s16 = sshll.u32 %s12693_s30, 4  ;;  %s12577_s16 = int_to_ptr.vmem [resolvable:$false] %s12576_s16 }
 0x1a0   : > { %p12574_p10 = pnand %p12573_p8, %p13793_p6  ;;  %p12579_p12 = scmp.lt.s32.totalorder %s13682_s22, %s12577_s16 }
 0x1a1   : > { %2046 = vmatpush1.bf16.msra.mxu0 %v10996_v40  ;;  %2128 = vmatpush1.bf16.msra.mxu1 %v10997_v41  ;;  %v11054_v41 = vld [vmem:[#allocation10 + $0x4cc] ss:$36 sps:$4 sm:$0xff]  }
 0x1a2   : > { %2047 = vmatprep.subr.bf16.mxu0 %v10998_v42  ;;  %2129 = vmatprep.subr.bf16.mxu1 %v11000_v43  ;;  %v11057_v42 = vld [vmem:[#allocation10 + $0x4d4] ss:$36 sps:$4 sm:$0xff]   ;;  %s13680_s3 = scalar_lea.hbm %s13792_s0, %s10770_s15  ;;  %p12575_p11 = pneg %p12574_p10 }
 0x1a5   : > { %2048 = vmatpush1.bf16.msra.mxu0 %v11002_v44  ;;  %2130 = vmatpush1.bf16.msra.mxu1 %v11003_v45  ;;  %v11052_v45 = vld [vmem:[#allocation10 + $0x4c8] ss:$36 sps:$4 sm:$0xff]  }
 0x1a6   : > { %2049 = vmatprep.subr.bf16.mxu0 %v11004_v46  ;;  %2131 = vmatprep.subr.bf16.mxu1 %v11006_v47  ;;  %v11055_v46 = vld [vmem:[#allocation10 + $0x4d0] ss:$36 sps:$4 sm:$0xff]  }
 0x1a7   : > { %v11060_v47 = vld [vmem:[#allocation10 + $0x514] ss:$36 sps:$4 sm:$0xff]  }
 0x1a9   : > { %2050 = vmatpush1.bf16.msra.mxu0 %v11008_v48  ;;  %2132 = vmatpush1.bf16.msra.mxu1 %v11009_v49  ;;  %v11063_v48 = vld [vmem:[#allocation10 + $0x51c] ss:$36 sps:$4 sm:$0xff]   ;;  %v11058_v49 = vld [vmem:[#allocation10 + $0x510] ss:$36 sps:$4 sm:$0xff]  }
 0x1aa   : > { %2051 = vmatprep.subr.bf16.mxu0 %v11010_v50  ;;  %2133 = vmatprep.subr.bf16.mxu1 %v11012_v51  ;;  %v11061_v50 = vld [vmem:[#allocation10 + $0x518] ss:$36 sps:$4 sm:$0xff]   ;;  %v12687_v51 = vmov 0  }
 0x1ad   : > { %2052 = vmatpush1.bf16.msra.mxu0 %v11014_v52  ;;  %2134 = vmatpush1.bf16.msra.mxu1 %v11015_v53  ;;  %v11066_v52 = vld [vmem:[#allocation10 + $0x55c] ss:$36 sps:$4 sm:$0xff]   ;;  %v11069_v53 = vld [vmem:[#allocation10 + $0x564] ss:$36 sps:$4 sm:$0xff]  }
 0x1ae   : > { %2053 = vmatprep.subr.bf16.mxu0 %v11016_v54  ;;  %2135 = vmatprep.subr.bf16.mxu1 %v11018_v55  ;;  %v11064_v54 = vld [vmem:[#allocation10 + $0x558] ss:$36 sps:$4 sm:$0xff]   ;;  %v11067_v55 = vld [vmem:[#allocation10 + $0x560] ss:$36 sps:$4 sm:$0xff]  }
 0x1b1   : > { %2054 = vmatpush1.bf16.msra.mxu0 %v11020_v56  ;;  %2136 = vmatpush1.bf16.msra.mxu1 %v11021_v57  ;;  %v11072_v56 = vld [vmem:[#allocation10 + $0x5a4] ss:$36 sps:$4 sm:$0xff]   ;;  %v11075_v57 = vld [vmem:[#allocation10 + $0x5ac] ss:$36 sps:$4 sm:$0xff]  }
 0x1b2   : > { %2055 = vmatprep.subr.bf16.mxu0 %v11022_v58  ;;  %2137 = vmatprep.subr.bf16.mxu1 %v11024_v59  ;;  %v11070_v58 = vld [vmem:[#allocation10 + $0x5a0] ss:$36 sps:$4 sm:$0xff]   ;;  %v11073_v59 = vld [vmem:[#allocation10 + $0x5a8] ss:$36 sps:$4 sm:$0xff]  }
 0x1b5   : > { %2056 = vmatpush1.bf16.msra.mxu0 %v11026_v60  ;;  %2138 = vmatpush1.bf16.msra.mxu1 %v11027_v61  ;;  %v11078_v60 = vld [vmem:[#allocation10 + $0x5ec] ss:$36 sps:$4 sm:$0xff]   ;;  %v11081_v61 = vld [vmem:[#allocation10 + $0x5f4] ss:$36 sps:$4 sm:$0xff]  }
 0x1b6   : > { %2057 = vmatprep.subr.bf16.mxu0 %v11028_v62  ;;  %2139 = vmatprep.subr.bf16.mxu1 %v11030_v63  ;;  %v13239_v62 = vsub.s32 2, %v13200_v23  ;;  %v11076_v63 = vld [vmem:[#allocation10 + $0x5e8] ss:$36 sps:$4 sm:$0xff]  }
 0x1b9   : > { %2058 = vmatpush1.bf16.msra.mxu0 %v11032_v2  ;;  %2140 = vmatpush1.bf16.msra.mxu1 %v11033_v3  ;;  %v11079_v2 = vld [vmem:[#allocation10 + $0x5f0] ss:$36 sps:$4 sm:$0xff]  }
 0x1ba   : > { %2059 = vmatprep.subr.bf16.mxu0 %v11034_v4  ;;  %2141 = vmatprep.subr.bf16.mxu1 %v11036_v5  ;;  %v12202_v3 = vld [vmem:[%s13153_s20 + $0x10] sm:$0xff] }
 0x1bb   : > { %v11084_v5 = vld [vmem:[#allocation10 + $0x634] ss:$36 sps:$4 sm:$0xff]  }
 0x1bd   : > { %2060 = vmatpush1.bf16.msra.mxu0 %v11038_v6  ;;  %2142 = vmatpush1.bf16.msra.mxu1 %v11039_v7  ;;  %v11087_v6 = vld [vmem:[#allocation10 + $0x63c] ss:$36 sps:$4 sm:$0xff]  }
 0x1be   : > { %2061 = vmatprep.subr.bf16.mxu0 %v11040_v8  ;;  %2143 = vmatprep.subr.bf16.mxu1 %v11042_v9  ;;  %v658_v8 = vrot.slane %v13208_v26, %v13239_v62  ;;  %v11082_v9 = vld [vmem:[#allocation10 + $0x630] ss:$36 sps:$4 sm:$0xff]   ;;  %v11105_v26 = vld [vmem:[#allocation10 + $0x64] ss:$36 sps:$4 sm:$0xff]  }
 0x1c1   : > { %2062 = vmatpush1.bf16.msra.mxu0 %v11044_v10  ;;  %2144 = vmatpush1.bf16.msra.mxu1 %v11045_v11  ;;  %v11085_v10 = vld [vmem:[#allocation10 + $0x638] ss:$36 sps:$4 sm:$0xff]  }
 0x1c2   : > { %2072 = vmatprep.subr.bf16.mxu0 %v11048_v12  ;;  %2154 = vmatprep.subr.bf16.mxu1 %v11051_v13  ;;  %v11090_v11 = vld [vmem:[#allocation10 + $0x67c] ss:$36 sps:$4 sm:$0xff]   ;;  %v11093_v12 = vld [vmem:[#allocation10 + $0x684] ss:$36 sps:$4 sm:$0xff]  }
 0x214   : > { %v624_v14 = vpop.xlane.xlu0 %623 }
 0x215   : > { %v13196_v15 = vmul.f32 0.0026041667, %v624_v14  ;;  %v677_v14 = vrot.slane %v13210_v27, %v13239_v62 }
 0x217   : > { %v635_v17 = vmul.f32 %v13196_v15, %v13196_v15  ;;  %v638_v28 = vsub.f32 %v13184_v0, %v13196_v15  ;;  %v639_v29 = vsub.f32 %v13187_v1, %v13196_v15  ;;  %v669_v0 = vrot.slane %v13210_v27, %v13206_v25  ;;  %v11100_v27 = vld [vmem:[#allocation10 + $0x58] ss:$36 sps:$4 sm:$0xff]  }
 0x218   : > { %v633_v16 = vpop.xlane.xlu0 %632  ;;  %v640_v4 = vsub.f32 %v12202_v3, %v13196_v15  ;;  %v11088_v15 = vld [vmem:[#allocation10 + $0x678] ss:$36 sps:$4 sm:$0xff]   ;;  %v11159_v3 = vld [vmem:[#allocation10 + $0x2ec] ss:$36 sps:$4 sm:$0xff]  }
 0x219   : > { %v634_v18 = vmul.f32 0.0026041667, %v633_v16  ;;  %v11091_v16 = vld [vmem:[#allocation10 + $0x680] ss:$36 sps:$4 sm:$0xff]  }
 0x21b   : > { %v636_v19 = vsub.f32 %v634_v18, %v635_v17  ;;  %v11096_v17 = vld [vmem:[#allocation10 + $0x14] ss:$36 sps:$4 sm:$0xff]  }
 0x21d   : > { %v637_v21 = vmax.f32 %v636_v19, 0.0  ;;  %v11099_v19 = vld [vmem:[#allocation10 + $0x1c] ss:$36 sps:$4 sm:$0xff]  }
 0x21f   : > { %v641_v22 = vadd.f32 1e-05, %v637_v21  ;;  %v11097_v21 = vld [vmem:[#allocation10 + $0x18] ss:$36 sps:$4 sm:$0xff]  }
 0x221   : > { %12174 = vrsqrt.f32 %v641_v22  ;;  %v11102_v22 = vld [vmem:[#allocation10 + $0x5c] ss:$36 sps:$4 sm:$0xff]  }
 0x22b   : > { %v13220_v32 = vpop.eup %12174 }
 0x22c   : > { %v644_v33 = vmul.f32 %v13220_v32, %v639_v29  ;;  %v643_v35 = vmul.f32 %v13220_v32, %v638_v28  ;;  %v645_v7 = vmul.f32 %v13220_v32, %v640_v4  ;;  %v11103_v29 = vld [vmem:[#allocation10 + $0x60] ss:$36 sps:$4 sm:$0xff]  }
 0x22d   : > { %v11106_v32 = vld [vmem:[#allocation10 + $0xa0] ss:$36 sps:$4 sm:$0xff]  }
 0x22e   : > { %v663_v36 = vmul.f32 %v654_v30, %v644_v33  ;;  %v662_v1 = vmul.f32 %v650_v31, %v643_v35  ;;  %v664_v13 = vmul.f32 %v658_v8, %v645_v7  ;;  %v11108_v30 = vld [vmem:[#allocation10 + $0xa4] ss:$36 sps:$4 sm:$0xff]   ;;  %v11111_v31 = vld [vmem:[#allocation10 + $0xac] ss:$36 sps:$4 sm:$0xff]   ;;  %v11117_v35 = vld [vmem:[#allocation10 + $0xf4] ss:$36 sps:$4 sm:$0xff]  }
 0x22f   : > { %v11109_v33 = vld [vmem:[#allocation10 + $0xa8] ss:$36 sps:$4 sm:$0xff]   ;;  %v11154_v4 = vld [vmem:[#allocation10 + $0x2e0] ss:$36 sps:$4 sm:$0xff]   ;;  %v11165_v7 = vld [vmem:[#allocation10 + $0x334] ss:$36 sps:$4 sm:$0xff]  }
 0x230   : > { %v682_v37 = vadd.f32 %v673_v34, %v663_v36  ;;  %v681_v40 = vadd.f32 %v669_v0, %v662_v1  ;;  %v683_v18 = vadd.f32 %v677_v14, %v664_v13  ;;  %v11114_v34 = vld [vmem:[#allocation10 + $0xec] ss:$36 sps:$4 sm:$0xff]   ;;  %v11120_v1 = vld [vmem:[#allocation10 + $0x134] ss:$36 sps:$4 sm:$0xff]   ;;  %v11174_v14 = vld [vmem:[#allocation10 + $0x3bc] ss:$36 sps:$4 sm:$0xff]  }
 0x231   : > { %v11112_v0 = vld [vmem:[#allocation10 + $0xe8] ss:$36 sps:$4 sm:$0xff]   ;;  %v11115_v36 = vld [vmem:[#allocation10 + $0xf0] ss:$36 sps:$4 sm:$0xff]   ;;  %v11169_v13 = vld [vmem:[#allocation10 + $0x378] ss:$36 sps:$4 sm:$0xff]  }
 0x232   : > { %v13228_v43 = vpack.c.bf16 %v682_v37, %v682_v37  ;;  %v13230_v44 = vpack.c.bf16 %v681_v40, %v681_v40  ;;  %v13248_v28 = vpack.c.bf16 %v683_v18, %v683_v18  ;;  %v11123_v37 = vld [vmem:[#allocation10 + $0x13c] ss:$36 sps:$4 sm:$0xff]   ;;  %v11160_v8 = vld [vmem:[#allocation10 + $0x328] ss:$36 sps:$4 sm:$0xff]  }
 0x233   : > { %v11126_v40 = vld [vmem:[#allocation10 + $0x17c] ss:$36 sps:$4 sm:$0xff]   ;;  %v11180_v18 = vld [vmem:[#allocation10 + $0x404] ss:$36 sps:$4 sm:$0xff]  }
 0x234   : > { %2063 = vmatprep.mubr.bf16.mxu0 %v13228_v43  ;;  %2145 = vmatprep.mubr.bf16.mxu1 %v13228_v43 }
 0x235   : > { %2064 = vmatmul.mubr.bf16.vlgmr.msra.gmra.mrb[0].mxu0 %v13230_v44  ;;  %2146 = vmatmul.mubr.bf16.vlgmr.msra.gmra.mrb[0].mxu1 %v13230_v44 }
 0x236   : > { %2073 = vmatpush1.bf16.msra.mxu0 %v11046_v38  ;;  %2155 = vmatpush1.bf16.msra.mxu1 %v11049_v39  ;;  %v11118_v38 = vld [vmem:[#allocation10 + $0x130] ss:$36 sps:$4 sm:$0xff]   ;;  %v11121_v39 = vld [vmem:[#allocation10 + $0x138] ss:$36 sps:$4 sm:$0xff]  }
 0x237   : > { %2074 = vmatprep.subr.bf16.mxu0 %v11054_v41  ;;  %2156 = vmatprep.subr.bf16.mxu1 %v11057_v42  ;;  %v11129_v41 = vld [vmem:[#allocation10 + $0x184] ss:$36 sps:$4 sm:$0xff]   ;;  %v11124_v42 = vld [vmem:[#allocation10 + $0x178] ss:$36 sps:$4 sm:$0xff]  }
 0x238   : > { %2104 = vmatprep.mubr.bf16.mxu0 %v12687_v51  ;;  %2186 = vmatprep.mubr.bf16.mxu1 %v12687_v51 }
 0x23a   : > { %2075 = vmatpush1.bf16.msra.mxu0 %v11052_v45  ;;  %2157 = vmatpush1.bf16.msra.mxu1 %v11055_v46  ;;  %v11127_v45 = vld [vmem:[#allocation10 + $0x180] ss:$36 sps:$4 sm:$0xff]  }
 0x23b   : > { %2076 = vmatprep.subr.bf16.mxu0 %v11060_v47  ;;  %2158 = vmatprep.subr.bf16.mxu1 %v11063_v48  ;;  %v11132_v46 = vld [vmem:[#allocation10 + $0x1c4] ss:$36 sps:$4 sm:$0xff]   ;;  %v11135_v47 = vld [vmem:[#allocation10 + $0x1cc] ss:$36 sps:$4 sm:$0xff]  }
 0x23c   : > { %v11130_v48 = vld [vmem:[#allocation10 + $0x1c0] ss:$36 sps:$4 sm:$0xff]  }
 0x23e   : > { %2077 = vmatpush1.bf16.msra.mxu0 %v11058_v49  ;;  %2159 = vmatpush1.bf16.msra.mxu1 %v11061_v50  ;;  %v11133_v49 = vld [vmem:[#allocation10 + $0x1c8] ss:$36 sps:$4 sm:$0xff]  }
 0x23f   : > { %2078 = vmatprep.subr.bf16.mxu0 %v11066_v52  ;;  %2160 = vmatprep.subr.bf16.mxu1 %v11069_v53  ;;  %v11138_v50 = vld [vmem:[#allocation10 + $0x20c] ss:$36 sps:$4 sm:$0xff]   ;;  %v11141_v52 = vld [vmem:[#allocation10 + $0x214] ss:$36 sps:$4 sm:$0xff]  }
 0x240   : > { %v11136_v53 = vld [vmem:[#allocation10 + $0x208] ss:$36 sps:$4 sm:$0xff]  }
 0x242   : > { %2079 = vmatpush1.bf16.msra.mxu0 %v11064_v54  ;;  %2161 = vmatpush1.bf16.msra.mxu1 %v11067_v55  ;;  %v11139_v54 = vld [vmem:[#allocation10 + $0x210] ss:$36 sps:$4 sm:$0xff]  }
 0x243   : > { %2080 = vmatprep.subr.bf16.mxu0 %v11072_v56  ;;  %2162 = vmatprep.subr.bf16.mxu1 %v11075_v57  ;;  %v11144_v55 = vld [vmem:[#allocation10 + $0x254] ss:$36 sps:$4 sm:$0xff]   ;;  %v11147_v56 = vld [vmem:[#allocation10 + $0x25c] ss:$36 sps:$4 sm:$0xff]  }
 0x244   : > { %v11142_v57 = vld [vmem:[#allocation10 + $0x250] ss:$36 sps:$4 sm:$0xff]  }
 0x246   : > { %2081 = vmatpush1.bf16.msra.mxu0 %v11070_v58  ;;  %2163 = vmatpush1.bf16.msra.mxu1 %v11073_v59  ;;  %v11145_v58 = vld [vmem:[#allocation10 + $0x258] ss:$36 sps:$4 sm:$0xff]  }
 0x247   : > { %2082 = vmatprep.subr.bf16.mxu0 %v11078_v60  ;;  %2164 = vmatprep.subr.bf16.mxu1 %v11081_v61  ;;  %v11150_v59 = vld [vmem:[#allocation10 + $0x29c] ss:$36 sps:$4 sm:$0xff]   ;;  %v11153_v60 = vld [vmem:[#allocation10 + $0x2a4] ss:$36 sps:$4 sm:$0xff]  }
 0x248   : > { %v11148_v61 = vld [vmem:[#allocation10 + $0x298] ss:$36 sps:$4 sm:$0xff]  }
 0x24a   : > { %2083 = vmatpush1.bf16.msra.mxu0 %v11076_v63  ;;  %2165 = vmatpush1.bf16.msra.mxu1 %v11079_v2  ;;  %v11151_v63 = vld [vmem:[#allocation10 + $0x2a0] ss:$36 sps:$4 sm:$0xff]  }
 0x24b   : > { %2084 = vmatprep.subr.bf16.mxu0 %v11084_v5  ;;  %2166 = vmatprep.subr.bf16.mxu1 %v11087_v6  ;;  %v11156_v2 = vld [vmem:[#allocation10 + $0x2e4] ss:$36 sps:$4 sm:$0xff]   ;;  %v11162_v6 = vld [vmem:[#allocation10 + $0x32c] ss:$36 sps:$4 sm:$0xff]  }
 0x24c   : > { %v11157_v5 = vld [vmem:[#allocation10 + $0x2e8] ss:$36 sps:$4 sm:$0xff]  }
 0x24e   : > { %2085 = vmatpush1.bf16.msra.mxu0 %v11082_v9  ;;  %2167 = vmatpush1.bf16.msra.mxu1 %v11085_v10  ;;  %v11163_v9 = vld [vmem:[#allocation10 + $0x330] ss:$36 sps:$4 sm:$0xff]  }
 0x24f   : > { %2086 = vmatprep.subr.bf16.mxu0 %v11090_v11  ;;  %2168 = vmatprep.subr.bf16.mxu1 %v11093_v12  ;;  %v11168_v10 = vld [vmem:[#allocation10 + $0x374] ss:$36 sps:$4 sm:$0xff]   ;;  %v11171_v11 = vld [vmem:[#allocation10 + $0x37c] ss:$36 sps:$4 sm:$0xff]  }
 0x250   : > { %v11166_v12 = vld [vmem:[#allocation10 + $0x370] ss:$36 sps:$4 sm:$0xff]  }
 0x252   : > { %2087 = vmatpush1.bf16.msra.mxu0 %v11088_v15  ;;  %2169 = vmatpush1.bf16.msra.mxu1 %v11091_v16  ;;  %v11177_v15 = vld [vmem:[#allocation10 + $0x3c4] ss:$36 sps:$4 sm:$0xff]   ;;  %v11172_v16 = vld [vmem:[#allocation10 + $0x3b8] ss:$36 sps:$4 sm:$0xff]  }
 0x253   : > { %2195 = vmatprep.subr.bf16.mxu0 %v11096_v17  ;;  %2277 = vmatprep.subr.bf16.mxu1 %v11099_v19  ;;  %v11175_v17 = vld [vmem:[#allocation10 + $0x3c0] ss:$36 sps:$4 sm:$0xff]   ;;  %v11183_v19 = vld [vmem:[#allocation10 + $0x40c] ss:$36 sps:$4 sm:$0xff]  }
 0x255   : > { %2105 = vmatmul.mubr.bf16.vlgmr.msra.gmra.mrb[0].mxu0 %v13248_v28  ;;  %2187 = vmatmul.mubr.bf16.vlgmr.msra.gmra.mrb[0].mxu1 %v13248_v28 }
 0x256   : > { %2196 = vmatpush1.bf16.msra.mxu0 %v11094_v20  ;;  %2227 = vmatprep.mubr.bf16.mxu0 %v13228_v43  ;;  %v11178_v20 = vld [vmem:[#allocation10 + $0x400] ss:$36 sps:$4 sm:$0xff]  }
 0x257   : > { %2278 = vmatpush1.bf16.msra.mxu1 %v11097_v21  ;;  %2309 = vmatprep.mubr.bf16.mxu1 %v13228_v43  ;;  %v11181_v21 = vld [vmem:[#allocation10 + $0x408] ss:$36 sps:$4 sm:$0xff]  }
 0x258   : > { %2197 = vmatprep.subr.bf16.mxu0 %v11102_v22  ;;  %2279 = vmatprep.subr.bf16.mxu1 %v11105_v26  ;;  %v11186_v22 = vld [vmem:[#allocation10 + $0x44c] ss:$36 sps:$4 sm:$0xff]   ;;  %v11189_v26 = vld [vmem:[#allocation10 + $0x454] ss:$36 sps:$4 sm:$0xff]  }
 0x25a   : > { %2198 = vmatpush1.bf16.msra.mxu0 %v11100_v27  ;;  %v11184_v27 = vld [vmem:[#allocation10 + $0x448] ss:$36 sps:$4 sm:$0xff]  }
 0x25b   : > { %2280 = vmatpush1.bf16.msra.mxu1 %v11103_v29  ;;  %2199 = vmatprep.subr.bf16.mxu0 %v11108_v30  ;;  %v11187_v29 = vld [vmem:[#allocation10 + $0x450] ss:$36 sps:$4 sm:$0xff]  }
 0x25c   : > { %2281 = vmatprep.subr.bf16.mxu1 %v11111_v31  ;;  %v11192_v30 = vld [vmem:[#allocation10 + $0x494] ss:$36 sps:$4 sm:$0xff]   ;;  %v11195_v31 = vld [vmem:[#allocation10 + $0x49c] ss:$36 sps:$4 sm:$0xff]  }
 0x25e   : > { %2200 = vmatpush1.bf16.msra.mxu0 %v11106_v32  ;;  %v11190_v32 = vld [vmem:[#allocation10 + $0x490] ss:$36 sps:$4 sm:$0xff]  }
 0x25f   : > { %2282 = vmatpush1.bf16.msra.mxu1 %v11109_v33  ;;  %2201 = vmatprep.subr.bf16.mxu0 %v11114_v34  ;;  %v11193_v33 = vld [vmem:[#allocation10 + $0x498] ss:$36 sps:$4 sm:$0xff]  }
 0x260   : > { %2283 = vmatprep.subr.bf16.mxu1 %v11117_v35  ;;  %v11198_v34 = vld [vmem:[#allocation10 + $0x4dc] ss:$36 sps:$4 sm:$0xff]   ;;  %v11201_v35 = vld [vmem:[#allocation10 + $0x4e4] ss:$36 sps:$4 sm:$0xff]  }
 0x262   : > { %2202 = vmatpush1.bf16.msra.mxu0 %v11112_v0  ;;  %v11196_v0 = vld [vmem:[#allocation10 + $0x4d8] ss:$36 sps:$4 sm:$0xff]  }
 0x263   : > { %2284 = vmatpush1.bf16.msra.mxu1 %v11115_v36  ;;  %2203 = vmatprep.subr.bf16.mxu0 %v11120_v1  ;;  %v11199_v36 = vld [vmem:[#allocation10 + $0x4e0] ss:$36 sps:$4 sm:$0xff]  }
 0x264   : > { %2285 = vmatprep.subr.bf16.mxu1 %v11123_v37  ;;  %v11204_v1 = vld [vmem:[#allocation10 + $0x524] ss:$36 sps:$4 sm:$0xff]   ;;  %v11207_v37 = vld [vmem:[#allocation10 + $0x52c] ss:$36 sps:$4 sm:$0xff]  }
 0x266   : > { %2204 = vmatpush1.bf16.msra.mxu0 %v11118_v38  ;;  %v11202_v38 = vld [vmem:[#allocation10 + $0x520] ss:$36 sps:$4 sm:$0xff]  }
 0x267   : > { %2286 = vmatpush1.bf16.msra.mxu1 %v11121_v39  ;;  %2205 = vmatprep.subr.bf16.mxu0 %v11126_v40  ;;  %v11205_v39 = vld [vmem:[#allocation10 + $0x528] ss:$36 sps:$4 sm:$0xff]  }
 0x268   : > { %2287 = vmatprep.subr.bf16.mxu1 %v11129_v41  ;;  %v11210_v40 = vld [vmem:[#allocation10 + $0x56c] ss:$36 sps:$4 sm:$0xff]   ;;  %v11213_v41 = vld [vmem:[#allocation10 + $0x574] ss:$36 sps:$4 sm:$0xff]  }
 0x26a   : > { %2206 = vmatpush1.bf16.msra.mxu0 %v11124_v42  ;;  %v11208_v42 = vld [vmem:[#allocation10 + $0x568] ss:$36 sps:$4 sm:$0xff]  }
 0x26b   : > { %2288 = vmatpush1.bf16.msra.mxu1 %v11127_v45  ;;  %2207 = vmatprep.subr.bf16.mxu0 %v11132_v46  ;;  %v11211_v45 = vld [vmem:[#allocation10 + $0x570] ss:$36 sps:$4 sm:$0xff]  }
 0x26c   : > { %2289 = vmatprep.subr.bf16.mxu1 %v11135_v47  ;;  %v11216_v46 = vld [vmem:[#allocation10 + $0x5b4] ss:$36 sps:$4 sm:$0xff]   ;;  %v11219_v47 = vld [vmem:[#allocation10 + $0x5bc] ss:$36 sps:$4 sm:$0xff]  }
 0x26e   : > { %2208 = vmatpush1.bf16.msra.mxu0 %v11130_v48  ;;  %v11214_v48 = vld [vmem:[#allocation10 + $0x5b0] ss:$36 sps:$4 sm:$0xff]  }
 0x26f   : > { %2290 = vmatpush1.bf16.msra.mxu1 %v11133_v49  ;;  %2209 = vmatprep.subr.bf16.mxu0 %v11138_v50  ;;  %v11217_v49 = vld [vmem:[#allocation10 + $0x5b8] ss:$36 sps:$4 sm:$0xff]  }
 0x270   : > { %2291 = vmatprep.subr.bf16.mxu1 %v11141_v52  ;;  %v11222_v50 = vld [vmem:[#allocation10 + $0x5fc] ss:$36 sps:$4 sm:$0xff]   ;;  %v11225_v52 = vld [vmem:[#allocation10 + $0x604] ss:$36 sps:$4 sm:$0xff]  }
 0x272   : > { %2210 = vmatpush1.bf16.msra.mxu0 %v11136_v53  ;;  %v11220_v53 = vld [vmem:[#allocation10 + $0x5f8] ss:$36 sps:$4 sm:$0xff]  }
 0x273   : > { %2292 = vmatpush1.bf16.msra.mxu1 %v11139_v54  ;;  %2211 = vmatprep.subr.bf16.mxu0 %v11144_v55  ;;  %v11223_v54 = vld [vmem:[#allocation10 + $0x600] ss:$36 sps:$4 sm:$0xff]  }
 0x274   : > { %2293 = vmatprep.subr.bf16.mxu1 %v11147_v56  ;;  %v11228_v55 = vld [vmem:[#allocation10 + $0x644] ss:$36 sps:$4 sm:$0xff]   ;;  %v11231_v56 = vld [vmem:[#allocation10 + $0x64c] ss:$36 sps:$4 sm:$0xff]  }
 0x276   : > { %2212 = vmatpush1.bf16.msra.mxu0 %v11142_v57  ;;  %v11226_v57 = vld [vmem:[#allocation10 + $0x640] ss:$36 sps:$4 sm:$0xff]  }
 0x277   : > { %2294 = vmatpush1.bf16.msra.mxu1 %v11145_v58  ;;  %2213 = vmatprep.subr.bf16.mxu0 %v11150_v59  ;;  %v11229_v58 = vld [vmem:[#allocation10 + $0x648] ss:$36 sps:$4 sm:$0xff]  }
 0x278   : > { %2295 = vmatprep.subr.bf16.mxu1 %v11153_v60  ;;  %v11234_v59 = vld [vmem:[#allocation10 + $0x68c] ss:$36 sps:$4 sm:$0xff]   ;;  %v11237_v60 = vld [vmem:[#allocation10 + $0x694] ss:$36 sps:$4 sm:$0xff]  }
 0x27a   : > { %2214 = vmatpush1.bf16.msra.mxu0 %v11148_v61  ;;  %v11232_v61 = vld [vmem:[#allocation10 + $0x688] ss:$36 sps:$4 sm:$0xff]  }
 0x27b   : > { %2296 = vmatpush1.bf16.msra.mxu1 %v11151_v63  ;;  %2215 = vmatprep.subr.bf16.mxu0 %v11156_v2  ;;  %v11235_v63 = vld [vmem:[#allocation10 + $0x690] ss:$36 sps:$4 sm:$0xff]   ;;  %v11238_v2 = vld [vmem:[#allocation10 + $0x260] ss:$36 sps:$4 sm:$0xff]  }
 0x27c   : > { %2297 = vmatprep.subr.bf16.mxu1 %v11159_v3  ;;  %v11239_v3 = vld [vmem:[#allocation10 + $0x20] ss:$36 sps:$4 sm:$0xff]  }
 0x27e   : > { %2216 = vmatpush1.bf16.msra.mxu0 %v11154_v4  ;;  %v11240_v4 = vld [vmem:[#allocation10 + $0x4a0] ss:$36 sps:$4 sm:$0xff]  }
 0x27f   : > { %2298 = vmatpush1.bf16.msra.mxu1 %v11157_v5  ;;  %2217 = vmatprep.subr.bf16.mxu0 %v11162_v6  ;;  %v11241_v5 = vld [vmem:[#allocation10 + $0x2a8] ss:$36 sps:$4 sm:$0xff]   ;;  %v12688_v6 = vmov 0.0  }
 0x280   : > { %2299 = vmatprep.subr.bf16.mxu1 %v11165_v7  ;;  %v11242_v7 = vld [vmem:[#allocation10 + $0x68] ss:$36 sps:$4 sm:$0xff]  }
 0x282   : > { %2218 = vmatpush1.bf16.msra.mxu0 %v11160_v8  ;;  %v11243_v8 = vld [vmem:[#allocation10 + $0x4e8] ss:$36 sps:$4 sm:$0xff]  }
 0x283   : > { %2300 = vmatpush1.bf16.msra.mxu1 %v11163_v9  ;;  %2219 = vmatprep.subr.bf16.mxu0 %v11168_v10  ;;  %v11244_v9 = vld [vmem:[#allocation10 + $0x2f0] ss:$36 sps:$4 sm:$0xff]  }
 0x284   : > { %2301 = vmatprep.subr.bf16.mxu1 %v11171_v11  ;;  %v11245_v10 = vld [vmem:[#allocation10 + $0xb0] ss:$36 sps:$4 sm:$0xff]  }
 0x285   : > { %v11246_v11 = vld [vmem:[#allocation10 + $0x530] ss:$36 sps:$4 sm:$0xff]  }
 0x286   : > { %2220 = vmatpush1.bf16.msra.mxu0 %v11166_v12  ;;  %v11247_v12 = vld [vmem:[#allocation10 + $0x338] ss:$36 sps:$4 sm:$0xff]  }
 0x287   : > { %2302 = vmatpush1.bf16.msra.mxu1 %v11169_v13  ;;  %2221 = vmatprep.subr.bf16.mxu0 %v11174_v14  ;;  %v11248_v13 = vld [vmem:[#allocation10 + $0xf8] ss:$36 sps:$4 sm:$0xff]  }
 0x288   : > { %2303 = vmatprep.subr.bf16.mxu1 %v11177_v15  ;;  %v11249_v14 = vld [vmem:[#allocation10 + $0x578] ss:$36 sps:$4 sm:$0xff]   ;;  %v11250_v15 = vld [vmem:[#allocation10 + $0x380] ss:$36 sps:$4 sm:$0xff]  }
 0x28a   : > { %2222 = vmatpush1.bf16.msra.mxu0 %v11172_v16  ;;  %v11252_v16 = vld [vmem:[#allocation10 + $0x5c0] ss:$36 sps:$4 sm:$0xff]  }
 0x28b   : > { %2304 = vmatpush1.bf16.msra.mxu1 %v11175_v17  ;;  %2223 = vmatprep.subr.bf16.mxu0 %v11180_v18  ;;  %v11253_v17 = vld [vmem:[#allocation10 + $0x3c8] ss:$36 sps:$4 sm:$0xff]  }
 0x28c   : > { %2305 = vmatprep.subr.bf16.mxu1 %v11183_v19  ;;  %v11254_v18 = vld [vmem:[#allocation10 + $0x188] ss:$36 sps:$4 sm:$0xff]  }
 0x28d   : > { %v11255_v19 = vld [vmem:[#allocation10 + $0x608] ss:$36 sps:$4 sm:$0xff]  }
 0x28e   : > { %2224 = vmatpush1.bf16.msra.mxu0 %v11178_v20  ;;  %v11256_v20 = vld [vmem:[#allocation10 + $0x410] ss:$36 sps:$4 sm:$0xff]  }
 0x28f   : > { %2306 = vmatpush1.bf16.msra.mxu1 %v11181_v21  ;;  %2225 = vmatprep.subr.bf16.mxu0 %v11186_v22  ;;  %v11257_v21 = vld [vmem:[#allocation10 + $0x1d0] ss:$36 sps:$4 sm:$0xff]  }
 0x290   : > { %2307 = vmatprep.subr.bf16.mxu1 %v11189_v26  ;;  %v11258_v22 = vld [vmem:[#allocation10 + $0x650] ss:$36 sps:$4 sm:$0xff]   ;;  %v11259_v26 = vld [vmem:[#allocation10 + $0x458] ss:$36 sps:$4 sm:$0xff]  }
 0x292   : > { %2226 = vmatpush1.bf16.msra.mxu0 %v11184_v27  ;;  %v11260_v27 = vld [vmem:[#allocation10 + $0x218] ss:$36 sps:$4 sm:$0xff]  }
 0x293   : > { %2308 = vmatpush1.bf16.msra.mxu1 %v11187_v29  ;;  %2236 = vmatprep.subr.bf16.mxu0 %v11192_v30  ;;  %v11261_v29 = vld [vmem:[#allocation10 + $0x698] ss:$36 sps:$4 sm:$0xff]   ;;  %v12690_v30 = vmov 1983009808  }
 0x294   : > { %2318 = vmatprep.subr.bf16.mxu1 %v11195_v31  ;;  %v2485_v31 = vunpack.c.l.s4 %v12690_v30 }
 0x295   : > { %2228 = vmatmul.mubr.bf16.vlgmr.msra.gmra.mrb[4].mxu0 %v13230_v44 }
 0x296   : > { %2310 = vmatmul.mubr.bf16.vlgmr.msra.gmra.mrb[4].mxu1 %v13230_v44  ;;  %2237 = vmatpush1.bf16.msra.mxu0 %v11190_v32  ;;  %v2486_v32 = vunpack.c.0.s8 %v2485_v31 }
 0x297   : > { %2319 = vmatpush1.bf16.msra.mxu1 %v11193_v33  ;;  %2238 = vmatprep.subr.bf16.mxu0 %v11198_v34 }
 0x298   : > { %2320 = vmatprep.subr.bf16.mxu1 %v11201_v35  ;;  %2268 = vmatprep.mubr.bf16.mxu0 %v12687_v51  ;;  %v13280_v33 = vsub.s32 %v2486_v32, %v13200_v23 }
 0x299   : > { %2350 = vmatprep.mubr.bf16.mxu1 %v12687_v51 }
 0x29a   : > { %2239 = vmatpush1.bf16.msra.mxu0 %v11196_v0 }
 0x29b   : > { %2321 = vmatpush1.bf16.msra.mxu1 %v11199_v36  ;;  %2240 = vmatprep.subr.bf16.mxu0 %v11204_v1 }
 0x29c   : > { %2322 = vmatprep.subr.bf16.mxu1 %v11207_v37 }
 0x29e   : > { %2241 = vmatpush1.bf16.msra.mxu0 %v11202_v38 }
 0x29f   : > { %2323 = vmatpush1.bf16.msra.mxu1 %v11205_v39  ;;  %2242 = vmatprep.subr.bf16.mxu0 %v11210_v40 }
 0x2a0   : > { %2324 = vmatprep.subr.bf16.mxu1 %v11213_v41 }
 0x2a2   : > { %2243 = vmatpush1.bf16.msra.mxu0 %v11208_v42 }
 0x2a3   : > { %2325 = vmatpush1.bf16.msra.mxu1 %v11211_v45  ;;  %2244 = vmatprep.subr.bf16.mxu0 %v11216_v46 }
 0x2a4   : > { %2326 = vmatprep.subr.bf16.mxu1 %v11219_v47 }
 0x2a6   : > { %2245 = vmatpush1.bf16.msra.mxu0 %v11214_v48 }
 0x2a7   : > { %2327 = vmatpush1.bf16.msra.mxu1 %v11217_v49  ;;  %2246 = vmatprep.subr.bf16.mxu0 %v11222_v50  ;;  %v12692_v50 = vmov 1934713408  }
 0x2a8   : > { %2328 = vmatprep.subr.bf16.mxu1 %v11225_v52  ;;  %v2518_v52 = vunpack.c.l.s4 %v12692_v50 }
 0x2aa   : > { %2247 = vmatpush1.bf16.msra.mxu0 %v11220_v53  ;;  %v2519_v53 = vunpack.c.0.s8 %v2518_v52 }
 0x2ab   : > { %2329 = vmatpush1.bf16.msra.mxu1 %v11223_v54  ;;  %2248 = vmatprep.subr.bf16.mxu0 %v11228_v55 }
 0x2ac   : > { %2330 = vmatprep.subr.bf16.mxu1 %v11231_v56 }
 0x2ae   : > { %2249 = vmatpush1.bf16.msra.mxu0 %v11226_v57 }
 0x2af   : > { %2331 = vmatpush1.bf16.msra.mxu1 %v11229_v58  ;;  %2250 = vmatprep.subr.bf16.mxu0 %v11234_v59 }
 0x2b0   : > { %2332 = vmatprep.subr.bf16.mxu1 %v11237_v60 }
 0x2b2   : > { %2251 = vmatpush1.bf16.msra.mxu0 %v11232_v61 }
 0x2b3   : > { %2333 = vmatpush1.bf16.msra.mxu1 %v11235_v63  ;;  %10385 = vmatprep.subr.bf16.mxu0 %v11238_v2 }
 0x2b4   : > { %10603 = vmatprep.subr.bf16.mxu1 %v12688_v6 }
 0x2b5   : > { %2269 = vmatmul.mubr.bf16.vlgmr.msra.gmra.mrb[4].mxu0 %v13248_v28 }
 0x2b6   : > { %2351 = vmatmul.mubr.bf16.vlgmr.msra.gmra.mrb[4].mxu1 %v13248_v28  ;;  %10386 = vmatpush3.bf16.msra.mxu0 %v11239_v3  ;;  %v13290_v3 = vsub.s32 %v2519_v53, %v13200_v23 }
 0x2b7   : > { %2391 = vmatprep.mubr.bf16.mxu0 %v13228_v43  ;;  %10604 = vmatpush3.bf16.msra.mxu1 %v11240_v4  ;;  %v11251_v43 = vld [vmem:[#allocation10 + $0x140] ss:$36 sps:$4 sm:$0xff]  }
 0x2b8   : > { %10387 = vmatprep.subr.bf16.mxu0 %v11241_v5  ;;  %10605 = vmatprep.subr.bf16.mxu1 %v12688_v6 }
 0x2b9   : > { %10619 = vmatprep.mubr.msk.bf16.mxu1 %vm12689_vm0, %v12688_v6 }
 0x2ba   : > { %10388 = vmatpush3.bf16.msra.mxu0 %v11242_v7 }
 0x2bb   : > { %10606 = vmatpush3.bf16.msra.mxu1 %v11243_v8  ;;  %10389 = vmatprep.subr.bf16.mxu0 %v11244_v9 }
 0x2bc   : > { %10607 = vmatprep.subr.bf16.mxu1 %v12688_v6 }
 0x2be   : > { %10390 = vmatpush3.bf16.msra.mxu0 %v11245_v10 }
 0x2bf   : > { %10608 = vmatpush3.bf16.msra.mxu1 %v11246_v11  ;;  %10391 = vmatprep.subr.bf16.mxu0 %v11247_v12 }
 0x2c0   : > { %10609 = vmatprep.subr.bf16.mxu1 %v12688_v6 }
 0x2c2   : > { %10392 = vmatpush3.bf16.msra.mxu0 %v11248_v13 }
 0x2c3   : > { %10610 = vmatpush3.bf16.msra.mxu1 %v11249_v14  ;;  %10393 = vmatprep.subr.bf16.mxu0 %v11250_v15 }
 0x2c4   : > { %10611 = vmatprep.subr.bf16.mxu1 %v12688_v6 }
 0x2c6   : > { %10394 = vmatpush3.bf16.msra.mxu0 %v11251_v43 }
 0x2c7   : > { %10612 = vmatpush3.bf16.msra.mxu1 %v11252_v16  ;;  %10395 = vmatprep.subr.bf16.mxu0 %v11253_v17 }
 0x2c8   : > { %10613 = vmatprep.subr.bf16.mxu1 %v12688_v6 }
 0x2ca   : > { %10396 = vmatpush3.bf16.msra.mxu0 %v11254_v18 }
 0x2cb   : > { %10614 = vmatpush3.bf16.msra.mxu1 %v11255_v19  ;;  %10397 = vmatprep.subr.bf16.mxu0 %v11256_v20 }
 0x2cc   : > { %10615 = vmatprep.subr.bf16.mxu1 %v12688_v6 }
 0x2ce   : > { %10398 = vmatpush3.bf16.msra.mxu0 %v11257_v21 }
 0x2cf   : > { %10616 = vmatpush3.bf16.msra.mxu1 %v11258_v22  ;;  %10399 = vmatprep.subr.bf16.mxu0 %v11259_v26 }
 0x2d0   : > { %10617 = vmatprep.subr.bf16.mxu1 %v12688_v6 }
 0x2d2   : > { %10400 = vmatpush3.bf16.msra.mxu0 %v11260_v27 }
 0x2d3   : > { %10618 = vmatpush3.bf16.msra.mxu1 %v11261_v29  ;;  %10647 = vmatprep.subr.bf16.mxu0 %v12688_v6 }
 0x2d4   : > { %10623 = vmatprep.subr.bf16.mxu1 %v12688_v6 }
 0x2d5   : > { %2392 = vmatmul.mubr.bf16.vlgmr.msra.gmra.mrb[8].mxu0 %v13230_v44 }
 0x2d6   : > { %10620 = vmatmul.mubr.bf16.vlgmr.msra.gmra.mrb[8].mxu1 %v13248_v28  ;;  %10649 = vmatprep.mubr.msk.bf16.mxu0 %vm12689_vm0, %v12688_v6 }
 0x2d7   : > { %10625 = vmatprep.mubr.msk.bf16.mxu1 %vm12689_vm0, %v12688_v6 }
 0x328   : > { %v2106_v34 = vpop.f32.mrb[0].mxu0  ;;  %v2188_v35 = vpop.f32.mrb[0].mxu1 }
 0x329   : > { %v2441_v0 = vpack.c.bf16 %v2188_v35, %v2188_v35  ;;  %v9716_v36 = vpack.c.bf16 %v2188_v35, %v2106_v34  ;;  %v2108_v1 = vpop.f32.mrb[1].mxu0  ;;  %v2190_v44 = vpop.f32.mrb[1].mxu1  ;;  %v2439_v37 = vpack.c.bf16 %v2106_v34, %v2106_v34 }
 0x32a   : > { %v9717_v28 = vpack.c.bf16 %v2190_v44, %v2108_v1  ;;  %v2110_v38 = vpop.f32.mrb[2].mxu0  ;;  %v2192_v39 = vpop.f32.mrb[2].mxu1  ;;  %v2440_v46 = vpack.c.bf16 %v2108_v1, %v2108_v1  ;;  %v2442_v49 = vpack.c.bf16 %v2190_v44, %v2190_v44 }
 0x32b   : > { %v2490_v40 = vrot.slane %v9716_v36, %v13280_v33  ;;  %2457 = vrot.lane.b32.xlu0 %v2441_v0, %s12691_s29  ;;  %v2193_v41 = vpop.f32.mrb[3].mxu1  ;;  %2449 = vrot.lane.b32.xlu1 %v2439_v37, %s12691_s29  ;;  %v2111_v42 = vpop.f32.mrb[3].mxu0 }
 0x32c   : > { %v2498_v45 = vrot.slane %v9717_v28, %v13280_v33 }
 0x32e   : > { %v2515_v47 = vcombine.low %v2490_v40, %v2498_v45  ;;  %v2516_v48 = vcombine.high %v2490_v40, %v2498_v45 }
 0x32f   : > { %2453 = vrot.lane.b32.xlu1 %v2440_v46, %s12691_s29 }
 0x330   : > { %v2523_v11 = vrot.slane %v2515_v47, %v13290_v3  ;;  %v2530_v12 = vrot.slane %v2516_v48, %v13290_v3 }
 0x333   : > { %2461 = vrot.lane.b32.xlu1 %v2442_v49, %s12691_s29 }
 0x388   : > { %v2270_v54 = vpop.f32.mrb[4].mxu0 }
 0x389   : > { %v2443_v55 = vpack.c.bf16 %v2270_v54, %v2270_v54  ;;  %v2352_v56 = vpop.f32.mrb[4].mxu1  ;;  %v2272_v57 = vpop.f32.mrb[5].mxu0 }
 0x38a   : > { %v9718_v58 = vpack.c.bf16 %v2352_v56, %v2270_v54  ;;  %v2354_v59 = vpop.f32.mrb[5].mxu1  ;;  %v2274_v60 = vpop.f32.mrb[6].mxu0  ;;  %v2445_v7 = vpack.c.bf16 %v2352_v56, %v2352_v56  ;;  %v2444_v13 = vpack.c.bf16 %v2272_v57, %v2272_v57 }
 0x38b   : > { %v9719_v61 = vpack.c.bf16 %v2354_v59, %v2272_v57  ;;  %v2356_v63 = vpop.f32.mrb[6].mxu1  ;;  %2465 = vrot.lane.b32.xlu1 %v2443_v55, %s12691_s29  ;;  %v2275_v2 = vpop.f32.mrb[7].mxu0  ;;  %v2446_v19 = vpack.c.bf16 %v2354_v59, %v2354_v59 }
 0x38c   : > { %v2506_v4 = vrot.slane %v9718_v58, %v13280_v33  ;;  %v2357_v5 = vpop.f32.mrb[7].mxu1 }
 0x38d   : > { %v2514_v8 = vrot.slane %v9719_v61, %v13280_v33 }
 0x38f   : > { %v2531_v9 = vcombine.low %v2506_v4, %v2514_v8  ;;  %v2532_v10 = vcombine.high %v2506_v4, %v2514_v8  ;;  %2473 = vrot.lane.b32.xlu1 %v2445_v7, %s12691_s29 }
 0x391   : > { %v2539_v14 = vrot.slane %v2531_v9, %v13290_v3  ;;  %v2546_v15 = vrot.slane %v2532_v10, %v13290_v3 }
 0x393   : > { %v2547_v43 = vcombine.low %v2523_v11, %v2539_v14  ;;  %v2548_v16 = vcombine.high %v2523_v11, %v2539_v14  ;;  %v2549_v17 = vcombine.low %v2530_v12, %v2546_v15  ;;  %v2550_v18 = vcombine.high %v2530_v12, %v2546_v15  ;;  %2469 = vrot.lane.b32.xlu1 %v2444_v13, %s12691_s29 }
 0x395   : > { %v2672_v63 = vshrl.u32 %v2547_v43, 16  ;;  %v2680_v2 = vshrl.u32 %v2548_v16, 16  ;;  %v2688_v4 = vshrl.u32 %v2549_v17, 16  ;;  %v2696_v5 = vshrl.u32 %v2550_v18, 16 }
 0x397   : > { %2477 = vrot.lane.b32.xlu1 %v2446_v19, %s12691_s29 }
 0x39d   : > { %v2450_v35 = vpop.permute.xlu1 %2449  ;;  %v2458_v37 = vpop.permute.xlu0 %2457 }
 0x39e   : > { %v2551_v39 = vcombine.low %v2450_v35, %v2458_v37 }
 0x3a0   : > { %v2558_v45 = vrot.slane %v2551_v39, %v13280_v33 }
 0x3a1   : > { %v2454_v0 = vpop.permute.xlu1 %2453 }
 0x3a5   : > { %v2462_v36 = vpop.permute.xlu1 %2461 }
 0x3a6   : > { %v2559_v28 = vcombine.low %v2454_v0, %v2462_v36 }
 0x3a8   : > { %v10401_v20 = vpop.f32.mrb[8].mxu0  ;;  %v2566_v40 = vrot.slane %v2559_v28, %v13280_v33 }
 0x3a9   : > { %v2433_v21 = vpop.f32.mrb[8].mxu1  ;;  %v10402_v22 = vpop.f32.mrb[9].mxu0 }
 0x3aa   : > { %v10403_v26 = vadd.f32 %v10402_v22, %v10401_v20  ;;  %v10621_v27 = vpop.f32.mrb[9].mxu1  ;;  %v10404_v29 = vpop.f32.mrb[10].mxu0  ;;  %v2583_v47 = vcombine.low %v2558_v45, %v2566_v40  ;;  %v2584_v48 = vcombine.high %v2558_v45, %v2566_v40 }
 0x3ab   : > { %v2436_v30 = vpop.f32.mrb[10].mxu1  ;;  %v10405_v31 = vpop.f32.mrb[11].mxu0 }
 0x3ac   : > { %v13301_v32 = vadd.f32 %v10403_v26, %v2433_v21  ;;  %v10622_v34 = vpop.f32.mrb[11].mxu1  ;;  %v2591_v54 = vrot.slane %v2583_v47, %v13290_v3  ;;  %v2598_v55 = vrot.slane %v2584_v48, %v13290_v3 }
 0x3fd   : > { %v2466_v1 = vpop.permute.xlu1 %2465 }
 0x401   : > { %v2474_v44 = vpop.permute.xlu1 %2473 }
 0x402   : > { %v2567_v41 = vcombine.low %v2466_v1, %v2474_v44 }
 0x404   : > { %v2574_v49 = vrot.slane %v2567_v41, %v13280_v33 }
 0x405   : > { %v2470_v38 = vpop.permute.xlu1 %2469 }
 0x409   : > { %v2478_v42 = vpop.permute.xlu1 %2477 }
 0x40a   : > { %v2575_v46 = vcombine.low %v2470_v38, %v2478_v42 }
 0x40c   : > { %v2582_v50 = vrot.slane %v2575_v46, %v13280_v33 }
 0x40e   : > { %v2599_v52 = vcombine.low %v2574_v49, %v2582_v50  ;;  %v2600_v53 = vcombine.high %v2574_v49, %v2582_v50 }
 0x410   : > { %v2607_v56 = vrot.slane %v2599_v52, %v13290_v3  ;;  %v2614_v57 = vrot.slane %v2600_v53, %v13290_v3 }
 0x412   : > { %v2615_v58 = vcombine.low %v2591_v54, %v2607_v56  ;;  %v2616_v59 = vcombine.high %v2591_v54, %v2607_v56  ;;  %v2617_v60 = vcombine.low %v2598_v55, %v2614_v57  ;;  %v2618_v61 = vcombine.high %v2598_v55, %v2614_v57 }
 0x414   : > { %v2670_v7 = vpack.i.b16 %v2615_v58, %v2547_v43  ;;  %v2673_v8 = vshrl.u32 %v2615_v58, 16  ;;  %v2678_v9 = vpack.i.b16 %v2616_v59, %v2548_v16  ;;  %v2681_v10 = vshrl.u32 %v2616_v59, 16 }
 0x415   : > { %v2686_v11 = vpack.i.b16 %v2617_v60, %v2549_v17  ;;  %v2689_v12 = vshrl.u32 %v2617_v60, 16  ;;  %v2694_v13 = vpack.i.b16 %v2618_v61, %v2550_v18  ;;  %v2697_v14 = vshrl.u32 %v2618_v61, 16 }
 0x416   : > { %v2674_v15 = vpack.i.b16 %v2673_v8, %v2672_v63  ;;  %v2682_v19 = vpack.i.b16 %v2681_v10, %v2680_v2 }
 0x417   : > { %v2690_v20 = vpack.i.b16 %v2689_v12, %v2688_v4  ;;  %v2698_v21 = vpack.i.b16 %v2697_v14, %v2696_v5  ;;  %v2732_v22 = vcombine.low %v2670_v7, %v2686_v11  ;;  %v2733_v26 = vcombine.high %v2670_v7, %v2686_v11 }
 0x418   : > { %v2748_v27 = vcombine.low %v2678_v9, %v2694_v13  ;;  %v2749_v29 = vcombine.high %v2678_v9, %v2694_v13 }
 0x419   : > { %v2740_v30 = vrot.slane %v2732_v22, %v13280_v33  ;;  %v2747_v31 = vrot.slane %v2733_v26, %v13280_v33  ;;  %v2800_v43 = vcombine.low %v2674_v15, %v2690_v20  ;;  %v2801_v34 = vcombine.high %v2674_v15, %v2690_v20 }
 0x41a   : > { %v2756_v16 = vrot.slane %v2748_v27, %v13280_v33  ;;  %v2763_v17 = vrot.slane %v2749_v29, %v13280_v33  ;;  %v2816_v18 = vcombine.low %v2682_v19, %v2698_v21  ;;  %v2817_v35 = vcombine.high %v2682_v19, %v2698_v21 }
 0x41b   : > { %v2808_v0 = vrot.slane %v2800_v43, %v13280_v33  ;;  %v2815_v36 = vrot.slane %v2801_v34, %v13280_v33 }
 0x41c   : > { %v2764_v1 = vcombine.low %v2740_v30, %v2756_v16  ;;  %v2765_v44 = vcombine.high %v2740_v30, %v2756_v16  ;;  %v2824_v37 = vrot.slane %v2816_v18, %v13280_v33  ;;  %v2780_v28 = vcombine.low %v2747_v31, %v2763_v17 }
 0x41d   : > { %v2831_v38 = vrot.slane %v2817_v35, %v13280_v33  ;;  %v2781_v39 = vcombine.high %v2747_v31, %v2763_v17 }
 0x41e   : > { %v13320_v40 = vrot.slane %v2765_v44, %v13290_v3  ;;  %v2832_v41 = vcombine.low %v2808_v0, %v2824_v37  ;;  %v2833_v42 = vcombine.high %v2808_v0, %v2824_v37  ;;  %v13323_v45 = vrot.slane %v2780_v28, %v13290_v3 }
 0x41f   : > { %v2848_v46 = vcombine.low %v2815_v36, %v2831_v38  ;;  %v2772_v47 = vrot.slane %v2764_v1, %v13290_v3  ;;  %v2849_v48 = vcombine.high %v2815_v36, %v2831_v38  ;;  %v2795_v53 = vrot.slane %v2781_v39, %v13290_v3 }
 0x420   : > { %v2797_v49 = vcombine.high %v13320_v40, %v12687_v51  ;;  %v2847_v50 = vrot.slane %v2833_v42, %v13290_v3  ;;  %v2840_v52 = vrot.slane %v2832_v41, %v13290_v3  ;;  %v2798_v54 = vcombine.high %v13323_v45, %v12687_v51 }
 0x421   : > { %v2856_v55 = vrot.slane %v2848_v46, %v13290_v3  ;;  %v2863_v56 = vrot.slane %v2849_v48, %v13290_v3  ;;  %v2919_v57 = vshrl.u32 %v2772_v47, 16  ;;  %v2796_v61 = vcombine.high %v2772_v47, %v12687_v51 }
 0x422   : > { %v2865_v58 = vcombine.high %v2847_v50, %v12687_v51  ;;  %v2918_v59 = vpack.i.b16 %v2840_v52, %v2772_v47  ;;  %v2930_v60 = vpack.i.b16 %v2847_v50, %v13320_v40  ;;  %v2920_v4 = vshrl.u32 %v2840_v52, 16  ;;  %v2970_v47 = vld [vmem:[#allocation2] sm:$0xff] }
 0x423   : > { %v2866_v63 = vcombine.high %v2856_v55, %v12687_v51  ;;  %v2954_v2 = vpack.i.b16 %v2863_v56, %v2795_v53  ;;  %v2942_v5 = vpack.i.b16 %v2856_v55, %v13323_v45  ;;  %v2937_v8 = vshrl.u32 %v2797_v49, 16 }
 0x424   : > { %v2936_v7 = vpack.i.b16 %v2865_v58, %v2797_v49  ;;  %v2938_v9 = vshrl.u32 %v2865_v58, 16  ;;  %v2864_v10 = vcombine.high %v2840_v52, %v12687_v51  ;;  %v2921_v12 = vpack.i.b16 %v2920_v4, %v2919_v57 }
 0x425   : > { %v2948_v11 = vpack.i.b16 %v2866_v63, %v2798_v54  ;;  %v2943_v13 = vshrl.u32 %v13323_v45, 16  ;;  %v2944_v20 = vshrl.u32 %v2856_v55, 16  ;;  %v2925_v22 = vshrl.u32 %v2796_v61, 16 }
 0x426   : > { %v2976_v14 = vsel %vm2971_vm1, %v2936_v7, 0  ;;  %v2939_v15 = vpack.i.b16 %v2938_v9, %v2937_v8  ;;  %v2924_v19 = vpack.i.b16 %v2864_v10, %v2796_v61  ;;  %v2926_v26 = vshrl.u32 %v2864_v10, 16 }
 0x427   : > { %10624 = vmatpush3.bf16.xpose.msra.mxu1 %v2976_v14  ;;  %v3160_v21 = vsel %vm2971_vm1, %v2948_v11, 0  ;;  %v2945_v27 = vpack.i.b16 %v2944_v20, %v2943_v13  ;;  %v2949_v29 = vshrl.u32 %v2798_v54, 16  ;;  %v2950_v30 = vshrl.u32 %v2866_v63, 16 }
 0x428   : > { %10648 = vmatpush3.bf16.xpose.msra.mxu0 %v3160_v21  ;;  %10629 = vmatprep.subr.bf16.mxu1 %v12688_v6  ;;  %v2931_v31 = vshrl.u32 %v13320_v40, 16  ;;  %v2927_v43 = vpack.i.b16 %v2926_v26, %v2925_v22  ;;  %v2932_v34 = vshrl.u32 %v2847_v50, 16  ;;  %v2955_v16 = vshrl.u32 %v2795_v53, 16 }
 0x429   : > { %10659 = vmatprep.subr.bf16.mxu0 %v12688_v6  ;;  %v2956_v17 = vshrl.u32 %v2863_v56, 16  ;;  %v2951_v18 = vpack.i.b16 %v2950_v30, %v2949_v29  ;;  %v13348_v35 = vcombine.high %v2795_v53, %v12687_v51  ;;  %v13351_v0 = vcombine.high %v2863_v56, %v12687_v51 }
 0x42a   : > { %v2933_v36 = vpack.i.b16 %v2932_v34, %v2931_v31  ;;  %v3022_v38 = vsel %vm2971_vm1, %v2939_v15, 0  ;;  %v3326_v40 = vsel %vm3324_vm2, %v2954_v2, 0  ;;  %v3068_v41 = vsel %vm2971_vm1, %v2942_v5, 0 }
 0x42b   : > { %v2957_v1 = vpack.i.b16 %v2956_v17, %v2955_v16  ;;  %v2960_v44 = vpack.i.b16 %v13351_v0, %v13348_v35  ;;  %v2961_v37 = vshrl.u32 %v13348_v35, 16  ;;  %v2962_v28 = vshrl.u32 %v13351_v0, 16 }
 0x42c   : > { %v3114_v42 = vsel %vm2971_vm1, %v2945_v27, 0  ;;  %v3206_v45 = vsel %vm2971_vm1, %v2951_v18, 0 }
 0x42d   : > { %v13359_v39 = vpack.i.b16 %v2962_v28, %v2961_v37  ;;  %v3372_v46 = vsel %vm3324_vm2, %v2957_v1, 0 }
 0x42e   : > { %10626 = vmatmul.mubr.msk.bf16.vlgmr.msra.gmra.mrb[12].mxu1 %vm2971_vm1, %v2918_v59 }
 0x42f   : > { %10650 = vmatmul.mubr.msk.bf16.vlgmr.msra.gmra.mrb[12].mxu0 %vm2971_vm1, %v2930_v60  ;;  %10630 = vmatpush3.bf16.xpose.msra.mxu1 %v3022_v38  ;;  %v3464_v0 = vsel %vm3324_vm2, %v13359_v39, 0 }
 0x430   : > { %10660 = vmatpush3.bf16.msra.mxu0 %v3326_v40  ;;  %10631 = vmatprep.mubr.msk.bf16.mxu1 %vm12689_vm0, %v12688_v6 }
 0x431   : > { %10635 = vmatprep.subr.bf16.mxu1 %v12688_v6  ;;  %10661 = vmatprep.mubr.msk.bf16.mxu0 %vm12689_vm0, %v12688_v6 }
 0x432   : > { %10671 = vmatprep.subr.bf16.mxu0 %v12688_v6 }
 0x436   : > { %10632 = vmatmul.mubr.msk.bf16.vlgmr.msra.gmra.mrb[16].mxu1 %vm2971_vm1, %v2921_v12 }
 0x437   : > { %10636 = vmatpush3.bf16.xpose.msra.mxu1 %v3068_v41  ;;  %10637 = vmatprep.mubr.msk.bf16.mxu1 %vm12689_vm0, %v12688_v6 }
 0x438   : > { %10641 = vmatprep.subr.bf16.mxu1 %v12688_v6 }
 0x43e   : > { %10638 = vmatmul.mubr.msk.bf16.vlgmr.msra.gmra.mrb[20].mxu1 %vm2971_vm1, %v2924_v19 }
 0x43f   : > { %10642 = vmatpush3.bf16.xpose.msra.mxu1 %v3114_v42  ;;  %10643 = vmatprep.mubr.msk.bf16.mxu1 %vm12689_vm0, %v12688_v6 }
 0x440   : > { %10653 = vmatprep.subr.bf16.mxu1 %v12688_v6 }
 0x446   : > { %10644 = vmatmul.mubr.msk.bf16.vlgmr.msra.gmra.mrb[24].mxu1 %vm2971_vm1, %v2927_v43 }
 0x447   : > { %10654 = vmatpush3.bf16.xpose.msra.mxu1 %v3206_v45  ;;  %10655 = vmatprep.mubr.msk.bf16.mxu1 %vm12689_vm0, %v12688_v6 }
 0x448   : > { %10665 = vmatprep.subr.bf16.mxu1 %v12688_v6 }
 0x44e   : > { %10656 = vmatmul.mubr.msk.bf16.vlgmr.msra.gmra.mrb[28].mxu1 %vm2971_vm1, %v2933_v36 }
 0x44f   : > { %10666 = vmatpush3.bf16.msra.mxu1 %v3372_v46  ;;  %10667 = vmatprep.mubr.msk.bf16.mxu1 %vm12689_vm0, %v12688_v6 }
 0x450   : > { %10677 = vmatprep.subr.bf16.mxu1 %v12688_v6 }
 0x501   : > { %v3012_v48 = vpop.f32.mrb[12].mxu1 }
 0x502   : > { %v3013_v49 = vadd.f32 %v3012_v48, %v2970_v47  ;;  %v3196_v50 = vpop.f32.mrb[12].mxu0  ;;  %v10627_v52 = vpop.f32.mrb[13].mxu1 }
 0x503   : > { %v10651_v53 = vpop.f32.mrb[13].mxu0  ;;  %v3015_v54 = vpop.f32.mrb[14].mxu1  ;;  %v3197_v10 = vadd.f32 %v3196_v50, %v2970_v47 }
 0x504   : > { %v3199_v55 = vpop.f32.mrb[14].mxu0  ;;  %v10628_v56 = vpop.f32.mrb[15].mxu1  ;;  %v3249_v57 = vsel %vm3248_vm3, %v3013_v49, -inf }
 0x505   : > { %v10652_v58 = vpop.f32.mrb[15].mxu0  ;;  %3250 = vmax.xlane.f32.xlu1 %v3249_v57  ;;  %v3261_v13 = vsel %vm3248_vm3, %v3197_v10, -inf }
 0x509   : > { %v3058_v59 = vpop.f32.mrb[16].mxu1 }
 0x50a   : > { %v3059_v60 = vadd.f32 %v3058_v59, %v2970_v47  ;;  %v10633_v61 = vpop.f32.mrb[17].mxu1 }
 0x50b   : > { %v3061_v63 = vpop.f32.mrb[18].mxu1 }
 0x50c   : > { %v10634_v2 = vpop.f32.mrb[19].mxu1  ;;  %v3252_v4 = vsel %vm3248_vm3, %v3059_v60, -inf }
 0x50d   : > { %3253 = vmax.xlane.f32.xlu0 %v3252_v4  ;;  %v2447_v4 = vpack.c.bf16 %v13301_v32, %v13301_v32 }
 0x511   : > { %v3104_v5 = vpop.f32.mrb[20].mxu1 }
 0x512   : > { %v3105_v7 = vadd.f32 %v3104_v5, %v2970_v47  ;;  %v10639_v8 = vpop.f32.mrb[21].mxu1 }
 0x513   : > { %v3107_v9 = vpop.f32.mrb[22].mxu1 }
 0x514   : > { %v10640_v11 = vpop.f32.mrb[23].mxu1  ;;  %v3255_v12 = vsel %vm3248_vm3, %v3105_v7, -inf }
 0x515   : > { %3256 = vmax.xlane.f32.xlu0 %v3255_v12  ;;  %v3418_v11 = vsel %vm3324_vm2, %v2960_v44, 0 }
 0x519   : > { %v3150_v14 = vpop.f32.mrb[24].mxu1  ;;  %3262 = vmax.xlane.f32.xlu0 %v3261_v13  ;;  %v2625_v13 = vrot.slane %v2447_v4, %v13280_v33 }
 0x51a   : > { %v3151_v15 = vadd.f32 %v3150_v14, %v2970_v47  ;;  %v10645_v19 = vpop.f32.mrb[25].mxu1 }
 0x51b   : > { %v3153_v20 = vpop.f32.mrb[26].mxu1  ;;  %v2626_v19 = vcombine.high %v2625_v13, %v12687_v51  ;;  %v2633_v35 = vrot.slane %v2625_v13, %v13290_v3 }
 0x51c   : > { %v10646_v21 = vpop.f32.mrb[27].mxu1  ;;  %v3258_v22 = vsel %vm3248_vm3, %v3151_v15, -inf }
 0x51d   : > { %3259 = vmax.xlane.f32.xlu1 %v3258_v22  ;;  %v2640_v22 = vrot.slane %v2626_v19, %v13290_v3 }
 0x521   : > { %v3242_v26 = vpop.f32.mrb[28].mxu1 }
 0x522   : > { %v3243_v27 = vadd.f32 %v3242_v26, %v2970_v47  ;;  %v10657_v29 = vpop.f32.mrb[29].mxu1 }
 0x523   : > { %v3245_v30 = vpop.f32.mrb[30].mxu1  ;;  %v2641_v29 = vcombine.high %v2633_v35, %v12687_v51 }
 0x524   : > { %v10658_v31 = vpop.f32.mrb[31].mxu1  ;;  %v3264_v43 = vsel %vm3248_vm3, %v3243_v27, -inf }
 0x525   : > { %3265 = vmax.xlane.f32.xlu1 %v3264_v43  ;;  %v2642_v43 = vcombine.high %v2640_v22, %v12687_v51 }
 0x592   : > { %v3251_v34 = vpop.xlane.xlu1 %3250 }
 0x593   : > { %v3267_v16 = vsub.f32 %v3013_v49, %v3251_v34 }
 0x595   : > { %v3273_v17 = vmul.f32 1.442695, %v3267_v16 }
 0x597   : > { %12176 = vpow2.f32 %v3273_v17  ;;  %v2704_v17 = vshrl.u32 %v2633_v35, 16 }
 0x59a   : > { %v3254_v18 = vpop.xlane.xlu0 %3253 }
 0x59b   : > { %v3268_v36 = vsub.f32 %v3059_v60, %v3254_v18 }
 0x59d   : > { %v3275_v1 = vmul.f32 1.442695, %v3268_v36 }
 0x59f   : > { %12178 = vpow2.f32 %v3275_v1 }
 0x5a1   : > { %v12177_v37 = vpop.eup %12176 }
 0x5a2   : > { %v3257_v28 = vpop.xlane.xlu0 %3256  ;;  %v3285_v38 = vsel %vm3248_vm3, %v12177_v37, 0.0 }
 0x5a3   : > { %v3269_v40 = vsub.f32 %v3105_v7, %v3257_v28  ;;  %3286 = vadd.xlane.f32.xlu0 %v3285_v38  ;;  %v2720_v38 = vshrl.u32 %v2640_v22, 16 }
 0x5a5   : > { %v3277_v41 = vmul.f32 1.442695, %v3269_v40 }
 0x5a6   : > { %v3263_v42 = vpop.xlane.xlu0 %3262 }
 0x5a7   : > { %12180 = vpow2.f32 %v3277_v41  ;;  %v3271_v45 = vsub.f32 %v3197_v10, %v3263_v42 }
 0x5a9   : > { %v12179_v46 = vpop.eup %12178  ;;  %v3281_v47 = vmul.f32 1.442695, %v3271_v45 }
 0x5aa   : > { %v3260_v48 = vpop.xlane.xlu1 %3259  ;;  %v3288_v49 = vsel %vm3248_vm3, %v12179_v46, 0.0 }
 0x5ab   : > { %12182 = vpow2.f32 %v3281_v47  ;;  %v3270_v50 = vsub.f32 %v3151_v15, %v3260_v48  ;;  %3289 = vadd.xlane.f32.xlu1 %v3288_v49  ;;  %v2728_v48 = vshrl.u32 %v2642_v43, 16 }
 0x5ad   : > { %v3279_v52 = vmul.f32 1.442695, %v3270_v50 }
 0x5af   : > { %12184 = vpow2.f32 %v3279_v52 }
 0x5b1   : > { %v12181_v53 = vpop.eup %12180 }
 0x5b2   : > { %v3266_v54 = vpop.xlane.xlu1 %3265  ;;  %v3291_v55 = vsel %vm3248_vm3, %v12181_v53, 0.0 }
 0x5b3   : > { %v3272_v56 = vsub.f32 %v3243_v27, %v3266_v54  ;;  %3292 = vadd.xlane.f32.xlu0 %v3291_v55 }
 0x5b5   : > { %v13398_v57 = vpop.eup %12182  ;;  %v3283_v58 = vmul.f32 1.442695, %v3272_v56 }
 0x5b6   : > { %v3297_v59 = vsel %vm3248_vm3, %v13398_v57, 0.0 }
 0x5b7   : > { %12186 = vpow2.f32 %v3283_v58  ;;  %3298 = vadd.xlane.f32.xlu0 %v3297_v59 }
 0x5b9   : > { %v13402_v60 = vpop.eup %12184 }
 0x5ba   : > { %v3294_v61 = vsel %vm3248_vm3, %v13402_v60, 0.0 }
 0x5bb   : > { %3295 = vadd.xlane.f32.xlu1 %v3294_v61 }
 0x5c1   : > { %v13406_v63 = vpop.eup %12186 }
 0x5c2   : > { %v3300_v2 = vsel %vm3248_vm3, %v13406_v63, 0.0 }
 0x5c3   : > { %3301 = vadd.xlane.f32.xlu1 %v3300_v2 }
 0x5cd   : > { %2481 = vrot.lane.b32.xlu0 %v2447_v4, %s12691_s29 }
 0x630   : > { %v3287_v5 = vpop.xlane.xlu0 %3286 }
 0x631   : > { %12188 = vrcp.f32 %v3287_v5 }
 0x638   : > { %v3290_v7 = vpop.xlane.xlu1 %3289 }
 0x639   : > { %12190 = vrcp.f32 %v3290_v7 }
 0x63b   : > { %v12189_v8 = vpop.eup %12188 }
 0x63c   : > { %v3309_v9 = vmul.f32 %v12189_v8, %v12177_v37  ;;  %v2712_v37 = vshrl.u32 %v2641_v29, 16 }
 0x63e   : > { %v3315_v10 = vpack.c.bf16 %v3309_v9, %v3309_v9 }
 0x640   : > { %10662 = vmatmul.mubr.msk.bf16.vlgmr.msra.gmra.mrb[16].mxu0 %vm3248_vm3, %v3315_v10  ;;  %v3293_v12 = vpop.xlane.xlu0 %3292 }
 0x641   : > { %10672 = vmatpush3.bf16.msra.mxu0 %v3418_v11  ;;  %12192 = vrcp.f32 %v3293_v12  ;;  %10673 = vmatprep.mubr.msk.bf16.mxu0 %vm12689_vm0, %v12688_v6 }
 0x642   : > { %10683 = vmatprep.subr.bf16.mxu0 %v12688_v6 }
 0x643   : > { %v12191_v32 = vpop.eup %12190 }
 0x644   : > { %v3310_v14 = vmul.f32 %v12191_v32, %v12179_v46  ;;  %v3299_v15 = vpop.xlane.xlu0 %3298 }
 0x646   : > { %v3316_v20 = vpack.c.bf16 %v3310_v14, %v3310_v14 }
 0x648   : > { %10668 = vmatmul.mubr.msk.bf16.vlgmr.msra.gmra.mrb[32].mxu1 %vm3248_vm3, %v3316_v20  ;;  %v3296_v44 = vpop.xlane.xlu1 %3295  ;;  %v2482_v21 = vpop.permute.xlu0 %2481 }
 0x649   : > { %10678 = vmatpush3.bf16.msra.mxu1 %v3464_v0  ;;  %12194 = vrcp.f32 %v3296_v44  ;;  %v2650_v26 = vrot.slane %v2482_v21, %v13280_v33  ;;  %10679 = vmatprep.mubr.msk.bf16.mxu1 %vm12689_vm0, %v12688_v6 }
 0x64a   : > { %10689 = vmatprep.subr.bf16.mxu1 %v12688_v6  ;;  %12196 = vrcp.f32 %v3299_v15 }
 0x64b   : > { %v12193_v27 = vpop.eup %12192  ;;  %v2651_v30 = vcombine.high %v2650_v26, %v12687_v51  ;;  %v2658_v39 = vrot.slane %v2650_v26, %v13290_v3 }
 0x64c   : > { %v3311_v31 = vmul.f32 %v12193_v27, %v12181_v53  ;;  %v11264_v27 = vld [vmem:[#allocation11 + $0x4] ss:$12 sps:$4 sm:$0xff]  }
 0x64d   : > { %v2665_v34 = vrot.slane %v2651_v30, %v13290_v3  ;;  %v2666_v16 = vcombine.high %v2658_v39, %v12687_v51  ;;  %v2705_v18 = vshrl.u32 %v2658_v39, 16  ;;  %v2702_v40 = vpack.i.b16 %v2658_v39, %v2633_v35  ;;  %v11270_v30 = vld [vmem:[#allocation11 + $0x34] ss:$12 sps:$4 sm:$0xff]  }
 0x64e   : > { %v3317_v36 = vpack.c.bf16 %v3311_v31, %v3311_v31  ;;  %v11283_v39 = vld [vmem:[#allocation11 + $0x180] ss:$12 sps:$4 sm:$0xff]   ;;  %v11285_v31 = vld [vmem:[#allocation11 + $0x184] ss:$12 sps:$4 sm:$0xff]  }
 0x64f   : > { %v2667_v1 = vcombine.high %v2665_v34, %v12687_v51  ;;  %v2713_v28 = vshrl.u32 %v2666_v16, 16  ;;  %v2718_v41 = vpack.i.b16 %v2665_v34, %v2640_v22  ;;  %v2721_v42 = vshrl.u32 %v2665_v34, 16  ;;  %v11268_v34 = vld [vmem:[#allocation11 + $0x30] ss:$12 sps:$4 sm:$0xff]  }
 0x650   : > { %v3302_v45 = vpop.xlane.xlu1 %3301  ;;  %10674 = vmatmul.mubr.msk.bf16.vlgmr.msra.gmra.mrb[20].mxu0 %vm3248_vm3, %v3317_v36  ;;  %v2710_v46 = vpack.i.b16 %v2666_v16, %v2641_v29  ;;  %v2706_v50 = vpack.i.b16 %v2705_v18, %v2704_v17  ;;  %v11267_v29 = vld [vmem:[#allocation11 + $0x1c] ss:$12 sps:$4 sm:$0xff]   ;;  %v11273_v16 = vld [vmem:[#allocation11 + $0x4c] ss:$12 sps:$4 sm:$0xff]   ;;  %v11297_v18 = vld [vmem:[#allocation11 + $0x1b4] ss:$12 sps:$4 sm:$0xff]  }
 0x651   : > { %v2726_v47 = vpack.i.b16 %v2667_v1, %v2642_v43  ;;  %v2729_v49 = vshrl.u32 %v2667_v1, 16  ;;  %10685 = vmatprep.mubr.msk.bf16.mxu0 %vm12689_vm0, %v12688_v6  ;;  %v2722_v52 = vpack.i.b16 %v2721_v42, %v2720_v38  ;;  %v2868_v53 = vcombine.low %v2702_v40, %v2718_v41  ;;  %v11291_v43 = vld [vmem:[#allocation11 + $0x19c] ss:$12 sps:$4 sm:$0xff]   ;;  %v11289_v17 = vld [vmem:[#allocation11 + $0x198] ss:$12 sps:$4 sm:$0xff]  }
 0x652   : > { %12198 = vrcp.f32 %v3302_v45  ;;  %v2714_v55 = vpack.i.b16 %v2713_v28, %v2712_v37  ;;  %v11271_v36 = vld [vmem:[#allocation11 + $0x48] ss:$12 sps:$4 sm:$0xff]   ;;  %v11276_v1 = vld [vmem:[#allocation11 + $0x64] ss:$12 sps:$4 sm:$0xff]   ;;  %v11303_v28 = vld [vmem:[#allocation11 + $0x1cc] ss:$12 sps:$4 sm:$0xff]  }
 0x653   : > { %v12195_v54 = vpop.eup %12194  ;;  %v2730_v56 = vpack.i.b16 %v2729_v49, %v2728_v48  ;;  %v2876_v58 = vcombine.low %v2710_v46, %v2726_v47  ;;  %v2892_v61 = vcombine.low %v2706_v50, %v2722_v52  ;;  %v2875_v2 = vrot.slane %v2868_v53, %v13280_v33  ;;  %v11295_v37 = vld [vmem:[#allocation11 + $0x1b0] ss:$12 sps:$4 sm:$0xff]   ;;  %v11274_v38 = vld [vmem:[#allocation11 + $0x60] ss:$12 sps:$4 sm:$0xff]   ;;  %v11301_v41 = vld [vmem:[#allocation11 + $0x1c8] ss:$12 sps:$4 sm:$0xff]  }
 0x654   : > { %v3312_v59 = vmul.f32 %v12195_v54, %v13402_v60  ;;  %v12197_v60 = vpop.eup %12196  ;;  %v11279_v40 = vld [vmem:[#allocation11 + $0x7c] ss:$12 sps:$4 sm:$0xff]   ;;  %v11309_v42 = vld [vmem:[#allocation11 + $0x1e4] ss:$12 sps:$4 sm:$0xff]   ;;  %v11282_v46 = vld [vmem:[#allocation11 + $0x94] ss:$12 sps:$4 sm:$0xff]  }
 0x655   : > { %v2900_v4 = vcombine.low %v2714_v55, %v2730_v56  ;;  %v2883_v5 = vrot.slane %v2876_v58, %v13280_v33  ;;  %v2899_v9 = vrot.slane %v2892_v61, %v13280_v33  ;;  %v3313_v14 = vmul.f32 %v12197_v60, %v13398_v57  ;;  %v11262_v57 = vld [vmem:[#allocation11] ss:$12 sps:$4 sm:$0xff]   ;;  %v11277_v45 = vld [vmem:[#allocation11 + $0x78] ss:$12 sps:$4 sm:$0xff]   ;;  %v11315_v48 = vld [vmem:[#allocation11 + $0x1fc] ss:$12 sps:$4 sm:$0xff]  }
 0x656   : > { %v3318_v7 = vpack.c.bf16 %v3312_v59, %v3312_v59  ;;  %v11307_v47 = vld [vmem:[#allocation11 + $0x1e0] ss:$12 sps:$4 sm:$0xff]   ;;  %v11280_v49 = vld [vmem:[#allocation11 + $0x90] ss:$12 sps:$4 sm:$0xff]   ;;  %v11313_v52 = vld [vmem:[#allocation11 + $0x1f8] ss:$12 sps:$4 sm:$0xff]  }
 0x657   : > { %v2884_v8 = vcombine.low %v2875_v2, %v2883_v5  ;;  %v2907_v10 = vrot.slane %v2900_v4, %v13280_v33  ;;  %v3319_v22 = vpack.c.bf16 %v3313_v14, %v3313_v14  ;;  %v11288_v50 = vld [vmem:[#allocation11 + $0xac] ss:$12 sps:$4 sm:$0xff]   ;;  %v11321_v53 = vld [vmem:[#allocation11 + $0x214] ss:$12 sps:$4 sm:$0xff]   ;;  %v11294_v55 = vld [vmem:[#allocation11 + $0xc4] ss:$12 sps:$4 sm:$0xff]  }
 0x658   : > { %10680 = vmatmul.mubr.msk.bf16.vlgmr.msra.gmra.mrb[36].mxu1 %vm3248_vm3, %v3318_v7  ;;  %v11286_v54 = vld [vmem:[#allocation11 + $0xa8] ss:$12 sps:$4 sm:$0xff]   ;;  %v11319_v56 = vld [vmem:[#allocation11 + $0x210] ss:$12 sps:$4 sm:$0xff]   ;;  %v11327_v58 = vld [vmem:[#allocation11 + $0x22c] ss:$12 sps:$4 sm:$0xff]  }
 0x659   : > { %v2891_v11 = vrot.slane %v2884_v8, %v13290_v3  ;;  %v2908_v12 = vcombine.low %v2899_v9, %v2907_v10  ;;  %10691 = vmatprep.mubr.msk.bf16.mxu1 %vm12689_vm0, %v12688_v6  ;;  %v11292_v59 = vld [vmem:[#allocation11 + $0xc0] ss:$12 sps:$4 sm:$0xff]   ;;  %v11300_v61 = vld [vmem:[#allocation11 + $0xdc] ss:$12 sps:$4 sm:$0xff]   ;;  %v11298_v4 = vld [vmem:[#allocation11 + $0xd8] ss:$12 sps:$4 sm:$0xff]  }
 0x65a   : > { %v11325_v2 = vld [vmem:[#allocation11 + $0x228] ss:$12 sps:$4 sm:$0xff]   ;;  %v11304_v7 = vld [vmem:[#allocation11 + $0xf0] ss:$12 sps:$4 sm:$0xff]   ;;  %v11312_v8 = vld [vmem:[#allocation11 + $0x10c] ss:$12 sps:$4 sm:$0xff]  }
 0x65b   : > { %v2915_v13 = vrot.slane %v2908_v12, %v13290_v3  ;;  %v2967_v19 = vshrl.u32 %v2891_v11, 16  ;;  %v11306_v5 = vld [vmem:[#allocation11 + $0xf4] ss:$12 sps:$4 sm:$0xff]   ;;  %v11318_v10 = vld [vmem:[#allocation11 + $0x124] ss:$12 sps:$4 sm:$0xff]  }
 0x65c   : > { %v12199_v32 = vpop.eup %12198  ;;  %v11310_v9 = vld [vmem:[#allocation11 + $0x108] ss:$12 sps:$4 sm:$0xff]   ;;  %v11322_v60 = vld [vmem:[#allocation11 + $0x138] ss:$12 sps:$4 sm:$0xff]  }
 0x65d   : > { %v2966_v15 = vpack.i.b16 %v2915_v13, %v2891_v11  ;;  %v2968_v20 = vshrl.u32 %v2915_v13, 16  ;;  %v3314_v35 = vmul.f32 %v12199_v32, %v13406_v63  ;;  %v11265_v63 = vld [vmem:[#allocation11 + $0x18] ss:$12 sps:$4 sm:$0xff]   ;;  %v11316_v11 = vld [vmem:[#allocation11 + $0x120] ss:$12 sps:$4 sm:$0xff]  }
 0x65e   : > { %v11324_v12 = vld [vmem:[#allocation11 + $0x13c] ss:$12 sps:$4 sm:$0xff]   ;;  %v11330_v13 = vld [vmem:[#allocation11 + $0x154] ss:$12 sps:$4 sm:$0xff]  }
 0x65f   : > { %v3510_v0 = vsel %vm3324_vm2, %v2966_v15, 0  ;;  %v2969_v44 = vpack.i.b16 %v2968_v20, %v2967_v19  ;;  %v3320_v26 = vpack.c.bf16 %v3314_v35, %v3314_v35  ;;  %v11328_v32 = vld [vmem:[#allocation11 + $0x150] ss:$12 sps:$4 sm:$0xff]  }
 0x660   : > { %10684 = vmatpush3.bf16.msra.mxu0 %v3510_v0 }
 0x661   : > { %v3556_v21 = vsel %vm3324_vm2, %v2969_v44, 0  ;;  %4301 = vmatprep.subr.bf16.mxu0 %v11264_v27 }
 0x662   : > { %10690 = vmatpush3.bf16.msra.mxu1 %v3556_v21 }
 0x663   : > { %10686 = vmatmul.mubr.msk.bf16.vlgmr.msra.gmra.mrb[24].mxu0 %vm3248_vm3, %v3319_v22  ;;  %4342 = vmatprep.subr.bf16.mxu1 %v11285_v31 }
 0x664   : > { %4302 = vmatpush1.bf16.msra.mxu0 %v11262_v57 }
 0x665   : > { %10692 = vmatmul.mubr.msk.bf16.vlgmr.msra.gmra.mrb[40].mxu1 %vm3248_vm3, %v3320_v26  ;;  %4303 = vmatprep.subr.bf16.mxu0 %v11267_v29 }
 0x666   : > { %4374 = vmatprep.mubr.bf16.mxu1 %v12687_v51  ;;  %4343 = vmatpush1.bf16.msra.mxu1 %v11283_v39 }
 0x667   : > { %4344 = vmatprep.subr.bf16.mxu1 %v11291_v43 }
 0x668   : > { %4304 = vmatpush1.bf16.msra.mxu0 %v11265_v63 }
 0x669   : > { %4305 = vmatprep.subr.bf16.mxu0 %v11270_v30 }
 0x66a   : > { %4345 = vmatpush1.bf16.msra.mxu1 %v11289_v17 }
 0x66b   : > { %4346 = vmatprep.subr.bf16.mxu1 %v11297_v18 }
 0x66c   : > { %4306 = vmatpush1.bf16.msra.mxu0 %v11268_v34 }
 0x66d   : > { %4307 = vmatprep.subr.bf16.mxu0 %v11273_v16 }
 0x66e   : > { %4347 = vmatpush1.bf16.msra.mxu1 %v11295_v37 }
 0x66f   : > { %4348 = vmatprep.subr.bf16.mxu1 %v11303_v28 }
 0x670   : > { %4308 = vmatpush1.bf16.msra.mxu0 %v11271_v36 }
 0x671   : > { %4309 = vmatprep.subr.bf16.mxu0 %v11276_v1 }
 0x672   : > { %4349 = vmatpush1.bf16.msra.mxu1 %v11301_v41 }
 0x673   : > { %4350 = vmatprep.subr.bf16.mxu1 %v11309_v42 }
 0x674   : > { %4310 = vmatpush1.bf16.msra.mxu0 %v11274_v38 }
 0x675   : > { %4311 = vmatprep.subr.bf16.mxu0 %v11279_v40 }
 0x676   : > { %4351 = vmatpush1.bf16.msra.mxu1 %v11307_v47 }
 0x677   : > { %4352 = vmatprep.subr.bf16.mxu1 %v11315_v48 }
 0x678   : > { %4312 = vmatpush1.bf16.msra.mxu0 %v11277_v45 }
 0x679   : > { %4313 = vmatprep.subr.bf16.mxu0 %v11282_v46 }
 0x67a   : > { %4353 = vmatpush1.bf16.msra.mxu1 %v11313_v52 }
 0x67b   : > { %4354 = vmatprep.subr.bf16.mxu1 %v11321_v53 }
 0x67c   : > { %4314 = vmatpush1.bf16.msra.mxu0 %v11280_v49 }
 0x67d   : > { %4315 = vmatprep.subr.bf16.mxu0 %v11288_v50 }
 0x67e   : > { %4355 = vmatpush1.bf16.msra.mxu1 %v11319_v56 }
 0x67f   : > { %4356 = vmatprep.subr.bf16.mxu1 %v11327_v58 }
 0x680   : > { %4316 = vmatpush1.bf16.msra.mxu0 %v11286_v54 }
 0x681   : > { %4317 = vmatprep.subr.bf16.mxu0 %v11294_v55 }
 0x682   : > { %4357 = vmatpush1.bf16.msra.mxu1 %v11325_v2 }
 0x684   : > { %4318 = vmatpush1.bf16.msra.mxu0 %v11292_v59 }
 0x685   : > { %4319 = vmatprep.subr.bf16.mxu0 %v11300_v61 }
 0x688   : > { %4320 = vmatpush1.bf16.msra.mxu0 %v11298_v4 }
 0x689   : > { %4321 = vmatprep.subr.bf16.mxu0 %v11306_v5 }
 0x68c   : > { %4322 = vmatpush1.bf16.msra.mxu0 %v11304_v7 }
 0x68d   : > { %4323 = vmatprep.subr.bf16.mxu0 %v11312_v8 }
 0x690   : > { %4324 = vmatpush1.bf16.msra.mxu0 %v11310_v9 }
 0x691   : > { %4325 = vmatprep.subr.bf16.mxu0 %v11318_v10 }
 0x694   : > { %4326 = vmatpush1.bf16.msra.mxu0 %v11316_v11 }
 0x695   : > { %4327 = vmatprep.subr.bf16.mxu0 %v11324_v12 }
 0x698   : > { %4328 = vmatpush1.bf16.msra.mxu0 %v11322_v60 }
 0x699   : > { %4329 = vmatprep.subr.bf16.mxu0 %v11330_v13 }
 0x69c   : > { %4330 = vmatpush1.bf16.msra.mxu0 %v11328_v32 }
 0x713   : > { %v3362_v14 = vpop.f32.mrb[16].mxu0 }
 0x714   : > { %v10663_v15 = vpop.f32.mrb[17].mxu0 }
 0x715   : > { %v3365_v19 = vpop.f32.mrb[18].mxu0 }
 0x716   : > { %v10664_v20 = vpop.f32.mrb[19].mxu0 }
 0x71b   : > { %v3408_v35 = vpop.f32.mrb[32].mxu1 }
 0x71c   : > { %v10669_v0 = vpop.f32.mrb[33].mxu1 }
 0x71d   : > { %v3411_v44 = vpop.f32.mrb[34].mxu1 }
 0x71e   : > { %v10670_v21 = vpop.f32.mrb[35].mxu1 }
 0x723   : > { %v3454_v22 = vpop.f32.mrb[20].mxu0 }
 0x724   : > { %v10675_v26 = vpop.f32.mrb[21].mxu0  ;;  %v3610_v31 = vpack.c.bf16 %v3454_v22, %v3454_v22 }
 0x725   : > { %v3457_v57 = vpop.f32.mrb[22].mxu0  ;;  %v11331_v26 = vld [vmem:[#allocation11 + $0xc8] ss:$12 sps:$4 sm:$0xff]  }
 0x726   : > { %v10676_v27 = vpop.f32.mrb[23].mxu0  ;;  %v3617_v1 = vrot.slane %v3610_v31, %v13280_v33  ;;  %v11332_v57 = vld [vmem:[#allocation11 + $0x168] ss:$12 sps:$4 sm:$0xff]   ;;  %10440 = vmatprep.subr.bf16.mxu1 %v11331_v26  ;;  %v11360_v26 = vld [vmem:[#allocation17 + $0x4] ss:$48 sps:$4 sm:$0xff]  }
 0x727   : > { %v11334_v27 = vld [vmem:[#allocation11 + $0x16c] ss:$12 sps:$4 sm:$0xff]  }
 0x728   : > { %4331 = vmatprep.subr.bf16.mxu0 %v11334_v27  ;;  %v11363_v27 = vld [vmem:[#allocation17 + $0xc] ss:$48 sps:$4 sm:$0xff]  }
 0x729   : > { %4332 = vmatpush1.bf16.msra.mxu0 %v11332_v57  ;;  %v11361_v57 = vld [vmem:[#allocation17 + $0x8] ss:$48 sps:$4 sm:$0xff]  }
 0x72a   : > { %10695 = vmatprep.subr.bf16.mxu0 %v12688_v6 }
 0x72b   : > { %v3500_v29 = vpop.f32.mrb[36].mxu1 }
 0x72c   : > { %v10681_v63 = vpop.f32.mrb[37].mxu1  ;;  %v3644_v34 = vpack.c.bf16 %v3500_v29, %v3500_v29 }
 0x72d   : > { %v3503_v30 = vpop.f32.mrb[38].mxu1 }
 0x72e   : > { %v10682_v39 = vpop.f32.mrb[39].mxu1  ;;  %v3651_v42 = vrot.slane %v3644_v34, %v13280_v33 }
 0x736   : > { %v3546_v43 = vpop.f32.mrb[24].mxu0 }
 0x737   : > { %v9732_v16 = vpack.c.bf16 %v3546_v43, %v3362_v14  ;;  %v10687_v17 = vpop.f32.mrb[25].mxu0 }
 0x738   : > { %v3549_v18 = vpop.f32.mrb[26].mxu0  ;;  %v3592_v36 = vpop.f32.mrb[40].mxu1 }
 0x739   : > { %v3609_v37 = vrot.slane %v9732_v16, %v13280_v33  ;;  %v9733_v28 = vpack.c.bf16 %v3592_v36, %v3408_v35  ;;  %v10688_v38 = vpop.f32.mrb[27].mxu0  ;;  %v10693_v40 = vpop.f32.mrb[41].mxu1 }
 0x73a   : > { %v3595_v41 = vpop.f32.mrb[42].mxu1 }
 0x73b   : > { %v3618_v45 = vcombine.low %v3609_v37, %v3617_v1  ;;  %v3619_v46 = vcombine.high %v3609_v37, %v3617_v1  ;;  %v3643_v47 = vrot.slane %v9733_v28, %v13280_v33  ;;  %v10694_v48 = vpop.f32.mrb[43].mxu1 }
 0x73d   : > { %v3626_v49 = vrot.slane %v3618_v45, %v13290_v3  ;;  %v3633_v50 = vrot.slane %v3619_v46, %v13290_v3  ;;  %v3652_v52 = vcombine.low %v3643_v47, %v3651_v42  ;;  %v3653_v53 = vcombine.high %v3643_v47, %v3651_v42 }
 0x73f   : > { %v3634_v54 = vcombine.high %v3626_v49, %v12687_v51  ;;  %v3660_v55 = vrot.slane %v3652_v52, %v13290_v3  ;;  %v3667_v56 = vrot.slane %v3653_v53, %v13290_v3  ;;  %v3635_v58 = vcombine.high %v3633_v50, %v12687_v51  ;;  %v11336_v53 = vld [vmem:[#allocation11 + $0xe0] ss:$12 sps:$4 sm:$0xff]  }
 0x740   : > { %v3674_v59 = vshrl.u32 %v3626_v49, 16  ;;  %v3690_v8 = vshrl.u32 %v3633_v50, 16 }
 0x741   : > { %v3668_v61 = vcombine.high %v3660_v55, %v12687_v51  ;;  %v3669_v2 = vcombine.high %v3667_v56, %v12687_v51  ;;  %v3672_v4 = vpack.i.b16 %v3660_v55, %v3626_v49  ;;  %v3675_v5 = vshrl.u32 %v3660_v55, 16 }
 0x742   : > { %v3682_v7 = vshrl.u32 %v3634_v54, 16  ;;  %v3688_v9 = vpack.i.b16 %v3667_v56, %v3633_v50  ;;  %v3691_v10 = vshrl.u32 %v3667_v56, 16  ;;  %v3698_v32 = vshrl.u32 %v3635_v58, 16  ;;  %v11337_v56 = vld [vmem:[#allocation11 + $0x20] ss:$12 sps:$4 sm:$0xff]  }
 0x743   : > { %v3676_v11 = vpack.i.b16 %v3675_v5, %v3674_v59  ;;  %v3680_v12 = vpack.i.b16 %v3668_v61, %v3634_v54  ;;  %v3683_v60 = vshrl.u32 %v3668_v61, 16  ;;  %v3696_v13 = vpack.i.b16 %v3669_v2, %v3635_v58  ;;  %v11338_v59 = vld [vmem:[#allocation11 + $0x188] ss:$12 sps:$4 sm:$0xff]   ;;  %v11339_v61 = vld [vmem:[#allocation11 + $0xf8] ss:$12 sps:$4 sm:$0xff]  }
 0x744   : > { %v3692_v14 = vpack.i.b16 %v3691_v10, %v3690_v8  ;;  %v3699_v15 = vshrl.u32 %v3669_v2, 16  ;;  %v3702_v19 = vcombine.low %v3672_v4, %v3688_v9  ;;  %v11340_v5 = vld [vmem:[#allocation11 + $0x38] ss:$12 sps:$4 sm:$0xff]   ;;  %v11342_v8 = vld [vmem:[#allocation11 + $0x110] ss:$12 sps:$4 sm:$0xff]  }
 0x745   : > { %v3684_v20 = vpack.i.b16 %v3683_v60, %v3682_v7  ;;  %v3710_v35 = vcombine.low %v3680_v12, %v3696_v13  ;;  %v11341_v7 = vld [vmem:[#allocation11 + $0x1a0] ss:$12 sps:$4 sm:$0xff]   ;;  %v11343_v9 = vld [vmem:[#allocation11 + $0x50] ss:$12 sps:$4 sm:$0xff]   ;;  %v11344_v10 = vld [vmem:[#allocation11 + $0x1b8] ss:$12 sps:$4 sm:$0xff]  }
 0x746   : > { %v3700_v0 = vpack.i.b16 %v3699_v15, %v3698_v32  ;;  %v3735_v44 = vcombine.low %v3676_v11, %v3692_v14  ;;  %v3709_v21 = vrot.slane %v3702_v19, %v13280_v33  ;;  %v11345_v11 = vld [vmem:[#allocation11 + $0x128] ss:$12 sps:$4 sm:$0xff]   ;;  %v11347_v60 = vld [vmem:[#allocation11 + $0x1d0] ss:$12 sps:$4 sm:$0xff]   ;;  %v11348_v13 = vld [vmem:[#allocation11 + $0x140] ss:$12 sps:$4 sm:$0xff]  }
 0x747   : > { %v3717_v22 = vrot.slane %v3710_v35, %v13280_v33  ;;  %v11346_v12 = vld [vmem:[#allocation11 + $0x68] ss:$12 sps:$4 sm:$0xff]   ;;  %v11349_v32 = vld [vmem:[#allocation11 + $0x80] ss:$12 sps:$4 sm:$0xff]   ;;  %v11351_v15 = vld [vmem:[#allocation11 + $0x158] ss:$12 sps:$4 sm:$0xff]  }
 0x748   : > { %v3743_v29 = vcombine.low %v3684_v20, %v3700_v0  ;;  %v3742_v39 = vrot.slane %v3735_v44, %v13280_v33  ;;  %v11350_v14 = vld [vmem:[#allocation11 + $0x1e8] ss:$12 sps:$4 sm:$0xff]   ;;  %v11352_v19 = vld [vmem:[#allocation11 + $0x98] ss:$12 sps:$4 sm:$0xff]   ;;  %v11353_v20 = vld [vmem:[#allocation11 + $0x200] ss:$12 sps:$4 sm:$0xff]  }
 0x749   : > { %v3719_v63 = vcombine.high %v3709_v21, %v3717_v22  ;;  %v3718_v30 = vcombine.low %v3709_v21, %v3717_v22  ;;  %v11354_v35 = vld [vmem:[#allocation11 + $0x170] ss:$12 sps:$4 sm:$0xff]   ;;  %v11356_v44 = vld [vmem:[#allocation11 + $0x218] ss:$12 sps:$4 sm:$0xff]  }
 0x74a   : > { %v3750_v31 = vrot.slane %v3743_v29, %v13280_v33  ;;  %v11355_v0 = vld [vmem:[#allocation11 + $0xb0] ss:$12 sps:$4 sm:$0xff]  }
 0x74b   : > { %v3734_v43 = vrot.slane %v3719_v63, %v13290_v3  ;;  %v3726_v34 = vrot.slane %v3718_v30, %v13290_v3  ;;  %v11357_v21 = vld [vmem:[#allocation11 + $0x230] ss:$12 sps:$4 sm:$0xff]   ;;  %v11369_v63 = vld [vmem:[#allocation17 + $0x6c] ss:$48 sps:$4 sm:$0xff]  }
 0x74c   : > { %v3752_v16 = vcombine.high %v3742_v39, %v3750_v31  ;;  %v3751_v17 = vcombine.low %v3742_v39, %v3750_v31  ;;  %v11358_v22 = vld [vmem:[#allocation17] ss:$48 sps:$4 sm:$0xff]   ;;  %v11366_v29 = vld [vmem:[#allocation17 + $0x64] ss:$48 sps:$4 sm:$0xff]   ;;  %v11367_v39 = vld [vmem:[#allocation17 + $0x68] ss:$48 sps:$4 sm:$0xff]  }
 0x74d   : > { %v3727_v18 = vcombine.high %v3726_v34, %v12687_v51  ;;  %v3783_v37 = vshrl.u32 %v3734_v43, 16  ;;  %v3771_v28 = vshrl.u32 %v3726_v34, 16  ;;  %v11364_v30 = vld [vmem:[#allocation17 + $0x60] ss:$48 sps:$4 sm:$0xff]   ;;  %v11372_v31 = vld [vmem:[#allocation17 + $0xc4] ss:$48 sps:$4 sm:$0xff]  }
 0x74e   : > { %v3767_v36 = vrot.slane %v3752_v16, %v13290_v3  ;;  %v3759_v1 = vrot.slane %v3751_v17, %v13290_v3  ;;  %v11335_v3 = vld [vmem:[#allocation11 + $0x8] ss:$12 sps:$4 sm:$0xff]   ;;  %v11378_v16 = vld [vmem:[#allocation17 + $0x124] ss:$48 sps:$4 sm:$0xff]  }
 0x74f   : > { %v3777_v42 = vshrl.u32 %v3727_v18, 16  ;;  %v11381_v17 = vld [vmem:[#allocation17 + $0x12c] ss:$48 sps:$4 sm:$0xff]  }
 0x750   : > { %v3784_v38 = vshrl.u32 %v3767_v36, 16  ;;  %v3772_v40 = vshrl.u32 %v3759_v1, 16  ;;  %v3760_v33 = vcombine.high %v3759_v1, %v12687_v51  ;;  %v3782_v41 = vpack.i.b16 %v3767_v36, %v3734_v43  ;;  %v11375_v43 = vld [vmem:[#allocation17 + $0xcc] ss:$48 sps:$4 sm:$0xff]   ;;  %v11379_v36 = vld [vmem:[#allocation17 + $0x128] ss:$48 sps:$4 sm:$0xff]  }
 0x751   : > { %v3770_v45 = vpack.i.b16 %v3759_v1, %v3726_v34  ;;  %v11373_v34 = vld [vmem:[#allocation17 + $0xc8] ss:$48 sps:$4 sm:$0xff]   ;;  %v11384_v1 = vld [vmem:[#allocation17 + $0x184] ss:$48 sps:$4 sm:$0xff]  }
 0x752   : > { %v3785_v46 = vpack.i.b16 %v3784_v38, %v3783_v37  ;;  %v3773_v47 = vpack.i.b16 %v3772_v40, %v3771_v28  ;;  %v3778_v48 = vshrl.u32 %v3760_v33, 16  ;;  %v3776_v49 = vpack.i.b16 %v3760_v33, %v3727_v18  ;;  %v11376_v18 = vld [vmem:[#allocation17 + $0x120] ss:$48 sps:$4 sm:$0xff]   ;;  %v11387_v37 = vld [vmem:[#allocation17 + $0x18c] ss:$48 sps:$4 sm:$0xff]  }
 0x753   : > { %v11382_v28 = vld [vmem:[#allocation17 + $0x180] ss:$48 sps:$4 sm:$0xff]   ;;  %v11385_v38 = vld [vmem:[#allocation17 + $0x188] ss:$48 sps:$4 sm:$0xff]   ;;  %v11390_v40 = vld [vmem:[#allocation17 + $0x1e4] ss:$48 sps:$4 sm:$0xff]  }
 0x754   : > { %3790 = vrot.lane.b32.xlu1 %v3785_v46, %s12691_s29  ;;  %3786 = vrot.lane.b32.xlu0 %v3773_v47, %s12691_s29  ;;  %v3779_v50 = vpack.i.b16 %v3778_v48, %v3777_v42  ;;  %v11393_v33 = vld [vmem:[#allocation17 + $0x1ec] ss:$48 sps:$4 sm:$0xff]   ;;  %v11391_v42 = vld [vmem:[#allocation17 + $0x1e8] ss:$48 sps:$4 sm:$0xff]   ;;  %v11394_v47 = vld [vmem:[#allocation17 + $0x240] ss:$48 sps:$4 sm:$0xff]  }
 0x755   : > { %v11399_v46 = vld [vmem:[#allocation17 + $0x24c] ss:$48 sps:$4 sm:$0xff]   ;;  %v11397_v48 = vld [vmem:[#allocation17 + $0x248] ss:$48 sps:$4 sm:$0xff]  }
 0x758   : > { %3788 = vrot.lane.b32.xlu1 %v3779_v50, %s12691_s29  ;;  %v11405_v50 = vld [vmem:[#allocation17 + $0x2ac] ss:$48 sps:$4 sm:$0xff]  }
 0x7c6   : > { %v3791_v52 = vpop.permute.xlu1 %3790  ;;  %v3787_v55 = vpop.permute.xlu0 %3786 }
 0x7c7   : > { %v3802_v54 = vsel %vm2971_vm1, %v3782_v41, %v3791_v52  ;;  %v3794_v4 = vsel %vm2971_vm1, %v3770_v45, %v3787_v55  ;;  %v11388_v41 = vld [vmem:[#allocation17 + $0x1e0] ss:$48 sps:$4 sm:$0xff]   ;;  %v11396_v45 = vld [vmem:[#allocation17 + $0x244] ss:$48 sps:$4 sm:$0xff]   ;;  %v11403_v52 = vld [vmem:[#allocation17 + $0x2a8] ss:$48 sps:$4 sm:$0xff]  }
 0x7c8   : > { %4375 = vmatmul.mubr.bf16.vlgmr.msra.gmra.mrb[44].mxu1 %v3802_v54  ;;  %v11406_v55 = vld [vmem:[#allocation17 + $0x300] ss:$48 sps:$4 sm:$0xff]  }
 0x7c9   : > { %10441 = vmatpush3.bf16.msra.mxu1 %v11335_v3  ;;  %v11400_v3 = vld [vmem:[#allocation17 + $0x2a0] ss:$48 sps:$4 sm:$0xff]  }
 0x7ca   : > { %v3789_v58 = vpop.permute.xlu1 %3788  ;;  %10442 = vmatprep.subr.bf16.mxu1 %v11336_v53  ;;  %v11408_v53 = vld [vmem:[#allocation17 + $0x304] ss:$48 sps:$4 sm:$0xff]  }
 0x7cb   : > { %v3798_v2 = vsel %vm2971_vm1, %v3776_v49, %v3789_v58  ;;  %v11402_v49 = vld [vmem:[#allocation17 + $0x2a4] ss:$48 sps:$4 sm:$0xff]  }
 0x7cc   : > { %4333 = vmatprep.mubr.bf16.mxu0 %v3798_v2  ;;  %4415 = vmatprep.mubr.bf16.mxu1 %v3798_v2  ;;  %v3900_v58 = vld [vmem:[#allocation13] sm:$0x7] }
 0x7cd   : > { %10443 = vmatpush3.bf16.msra.mxu1 %v11337_v56  ;;  %4334 = vmatmul.mubr.bf16.vlgmr.msra.gmra.mrb[28].mxu0 %v3794_v4  ;;  %v11409_v56 = vld [vmem:[#allocation17 + $0x308] ss:$48 sps:$4 sm:$0xff]  }
 0x7ce   : > { %10696 = vmatpush3.bf16.msra.mxu0 %v11338_v59  ;;  %10444 = vmatprep.subr.bf16.mxu1 %v11339_v61 }
 0x7cf   : > { %10697 = vmatprep.subr.bf16.mxu0 %v12688_v6  ;;  %10711 = vmatprep.mubr.msk.bf16.mxu0 %vm12689_vm0, %v12688_v6 }
 0x7d1   : > { %10445 = vmatpush3.bf16.msra.mxu1 %v11340_v5 }
 0x7d2   : > { %10698 = vmatpush3.bf16.msra.mxu0 %v11341_v7  ;;  %10446 = vmatprep.subr.bf16.mxu1 %v11342_v8  ;;  %v3909_v7 = vrot.slane %v3900_v58, %v13203_v24 }
 0x7d3   : > { %10699 = vmatprep.subr.bf16.mxu0 %v12688_v6 }
 0x7d5   : > { %10447 = vmatpush3.bf16.msra.mxu1 %v11343_v9 }
 0x7d6   : > { %10700 = vmatpush3.bf16.msra.mxu0 %v11344_v10  ;;  %10448 = vmatprep.subr.bf16.mxu1 %v11345_v11 }
 0x7d7   : > { %10701 = vmatprep.subr.bf16.mxu0 %v12688_v6 }
 0x7d9   : > { %10449 = vmatpush3.bf16.msra.mxu1 %v11346_v12 }
 0x7da   : > { %10702 = vmatpush3.bf16.msra.mxu0 %v11347_v60  ;;  %10450 = vmatprep.subr.bf16.mxu1 %v11348_v13 }
 0x7db   : > { %10703 = vmatprep.subr.bf16.mxu0 %v12688_v6 }
 0x7dd   : > { %10451 = vmatpush3.bf16.msra.mxu1 %v11349_v32 }
 0x7de   : > { %10704 = vmatpush3.bf16.msra.mxu0 %v11350_v14  ;;  %10452 = vmatprep.subr.bf16.mxu1 %v11351_v15  ;;  %v3913_v15 = vrot.slane %v3900_v58, %v13239_v62 }
 0x7df   : > { %10705 = vmatprep.subr.bf16.mxu0 %v12688_v6 }
 0x7e1   : > { %10453 = vmatpush3.bf16.msra.mxu1 %v11352_v19 }
 0x7e2   : > { %10706 = vmatpush3.bf16.msra.mxu0 %v11353_v20  ;;  %10454 = vmatprep.subr.bf16.mxu1 %v11354_v35  ;;  %v12203_v20 = vld [vmem:[%s13153_s20] sm:$0xff] }
 0x7e3   : > { %10707 = vmatprep.subr.bf16.mxu0 %v12688_v6 }
 0x7e5   : > { %10455 = vmatpush3.bf16.msra.mxu1 %v11355_v0  ;;  %v12204_v0 = vld [vmem:[%s13153_s20 + $0x8] sm:$0xff] }
 0x7e6   : > { %10708 = vmatpush3.bf16.msra.mxu0 %v11356_v44  ;;  %6325 = vmatprep.subr.bf16.mxu1 %v11360_v26 }
 0x7e7   : > { %10709 = vmatprep.subr.bf16.mxu0 %v12688_v6  ;;  %v11370_v6 = vld [vmem:[#allocation17 + $0xc0] ss:$48 sps:$4 sm:$0xff]  }
 0x7e8   : > { %4416 = vmatmul.mubr.bf16.vlgmr.msra.gmra.mrb[48].mxu1 %v3794_v4  ;;  %v3905_v4 = vrot.slane %v3900_v58, %v13206_v25  ;;  %v11439_v58 = vld [vmem:[#allocation17 + $0x4e8] ss:$48 sps:$4 sm:$0xff]  }
 0x7e9   : > { %6326 = vmatpush1.bf16.msra.mxu1 %v11358_v22 }
 0x7ea   : > { %10710 = vmatpush3.bf16.msra.mxu0 %v11357_v21  ;;  %6327 = vmatprep.subr.bf16.mxu1 %v11366_v29 }
 0x7eb   : > { %6407 = vmatprep.subr.bf16.mxu0 %v11363_v27 }
 0x7ed   : > { %10712 = vmatmul.mubr.bf16.vlgmr.msra.gmra.mrb[32].mxu0 %v3802_v54  ;;  %6328 = vmatpush1.bf16.msra.mxu1 %v11364_v30  ;;  %v11411_v54 = vld [vmem:[#allocation17 + $0x30c] ss:$48 sps:$4 sm:$0xff]  }
 0x7ee   : > { %6408 = vmatpush1.bf16.msra.mxu0 %v11361_v57  ;;  %6329 = vmatprep.subr.bf16.mxu1 %v11372_v31 }
 0x7ef   : > { %6409 = vmatprep.subr.bf16.mxu0 %v11369_v63 }
 0x7f1   : > { %6330 = vmatpush1.bf16.msra.mxu1 %v11370_v6 }
 0x7f2   : > { %6410 = vmatpush1.bf16.msra.mxu0 %v11367_v39  ;;  %6331 = vmatprep.subr.bf16.mxu1 %v11378_v16 }
 0x7f3   : > { %6411 = vmatprep.subr.bf16.mxu0 %v11375_v43  ;;  %v12205_v43 = vld [vmem:[%s13153_s20 + $0x10] sm:$0xff]  ;;  %s12578_s20 = scalar_lea.vmem %s12577_s16, 768 }
 0x7f4   : > { %p12580_p7 = scmp.lt.s32.totalorder %s12578_s20, %s12572_s21 }
 0x7f5   : > { %6332 = vmatpush1.bf16.msra.mxu1 %v11376_v18 }
 0x7f6   : > { %6412 = vmatpush1.bf16.msra.mxu0 %v11373_v34  ;;  %6333 = vmatprep.subr.bf16.mxu1 %v11384_v1  ;;  %p12581_p9 = por %p12580_p7, %p12579_p12 }
 0x7f7   : > { %6413 = vmatprep.subr.bf16.mxu0 %v11381_v17 }
 0x7f8   : > { %p12582_p4 = pnand %p12581_p9, %p12575_p11 }
 0x7f9   : > { %6334 = vmatpush1.bf16.msra.mxu1 %v11382_v28  ;;  %v11414_v28 = vld [vmem:[#allocation17 + $0x364] ss:$48 sps:$4 sm:$0xff]  }
 0x7fa   : > { %6414 = vmatpush1.bf16.msra.mxu0 %v11379_v36  ;;  %6335 = vmatprep.subr.bf16.mxu1 %v11390_v40  ;;  %v11417_v40 = vld [vmem:[#allocation17 + $0x36c] ss:$48 sps:$4 sm:$0xff]  }
 0x7fb   : > { %6415 = vmatprep.subr.bf16.mxu0 %v11387_v37  ;;  %v11412_v37 = vld [vmem:[#allocation17 + $0x360] ss:$48 sps:$4 sm:$0xff]  }
 0x7fd   : > { %6336 = vmatpush1.bf16.msra.mxu1 %v11388_v41  ;;  %v11423_v41 = vld [vmem:[#allocation17 + $0x3cc] ss:$48 sps:$4 sm:$0xff]  }
 0x7fe   : > { %6416 = vmatpush1.bf16.msra.mxu0 %v11385_v38  ;;  %6337 = vmatprep.subr.bf16.mxu1 %v11396_v45  ;;  %v11415_v38 = vld [vmem:[#allocation17 + $0x368] ss:$48 sps:$4 sm:$0xff]  }
 0x7ff   : > { %6417 = vmatprep.subr.bf16.mxu0 %v11393_v33  ;;  %v11420_v33 = vld [vmem:[#allocation17 + $0x3c4] ss:$48 sps:$4 sm:$0xff]   ;;  %v11421_v45 = vld [vmem:[#allocation17 + $0x3c8] ss:$48 sps:$4 sm:$0xff]  }
 0x801   : > { %6338 = vmatpush1.bf16.msra.mxu1 %v11394_v47  ;;  %v11429_v47 = vld [vmem:[#allocation17 + $0x42c] ss:$48 sps:$4 sm:$0xff]  }
 0x802   : > { %6418 = vmatpush1.bf16.msra.mxu0 %v11391_v42  ;;  %6339 = vmatprep.subr.bf16.mxu1 %v11402_v49  ;;  %v11418_v42 = vld [vmem:[#allocation17 + $0x3c0] ss:$48 sps:$4 sm:$0xff]   ;;  %v11427_v49 = vld [vmem:[#allocation17 + $0x428] ss:$48 sps:$4 sm:$0xff]  }
 0x803   : > { %6419 = vmatprep.subr.bf16.mxu0 %v11399_v46  ;;  %v11426_v46 = vld [vmem:[#allocation17 + $0x424] ss:$48 sps:$4 sm:$0xff]  }
 0x805   : > { %6340 = vmatpush1.bf16.msra.mxu1 %v11400_v3  ;;  %v11435_v3 = vld [vmem:[#allocation17 + $0x48c] ss:$48 sps:$4 sm:$0xff]  }
 0x806   : > { %6420 = vmatpush1.bf16.msra.mxu0 %v11397_v48  ;;  %6341 = vmatprep.subr.bf16.mxu1 %v11408_v53  ;;  %v11424_v48 = vld [vmem:[#allocation17 + $0x420] ss:$48 sps:$4 sm:$0xff]   ;;  %v11433_v53 = vld [vmem:[#allocation17 + $0x488] ss:$48 sps:$4 sm:$0xff]  }
 0x807   : > { %6421 = vmatprep.subr.bf16.mxu0 %v11405_v50  ;;  %v11432_v50 = vld [vmem:[#allocation17 + $0x484] ss:$48 sps:$4 sm:$0xff]  }
 0x809   : > { %6342 = vmatpush1.bf16.msra.mxu1 %v11406_v55  ;;  %v11441_v55 = vld [vmem:[#allocation17 + $0x4ec] ss:$48 sps:$4 sm:$0xff]  }
 0x80a   : > { %6422 = vmatpush1.bf16.msra.mxu0 %v11403_v52  ;;  %6343 = vmatprep.subr.bf16.mxu1 %v11414_v28  ;;  %v11430_v52 = vld [vmem:[#allocation17 + $0x480] ss:$48 sps:$4 sm:$0xff]   ;;  %v11462_v28 = vld [vmem:[#allocation17 + $0x664] ss:$48 sps:$4 sm:$0xff]  }
 0x80b   : > { %6423 = vmatprep.subr.bf16.mxu0 %v11411_v54  ;;  %v11438_v54 = vld [vmem:[#allocation17 + $0x4e4] ss:$48 sps:$4 sm:$0xff]  }
 0x80d   : > { %6344 = vmatpush1.bf16.msra.mxu1 %v11412_v37 }
 0x80e   : > { %6424 = vmatpush1.bf16.msra.mxu0 %v11409_v56  ;;  %6345 = vmatprep.subr.bf16.mxu1 %v11420_v33  ;;  %v11436_v56 = vld [vmem:[#allocation17 + $0x4e0] ss:$48 sps:$4 sm:$0xff]   ;;  %v11463_v33 = vld [vmem:[#allocation17 + $0x668] ss:$48 sps:$4 sm:$0xff]  }
 0x80f   : > { %6425 = vmatprep.subr.bf16.mxu0 %v11417_v40  ;;  %v11460_v40 = vld [vmem:[#allocation17 + $0x660] ss:$48 sps:$4 sm:$0xff]  }
 0x811   : > { %6346 = vmatpush1.bf16.msra.mxu1 %v11418_v42  ;;  %v11471_v42 = vld [vmem:[#allocation17 + $0x6cc] ss:$48 sps:$4 sm:$0xff]  }
 0x812   : > { %6426 = vmatpush1.bf16.msra.mxu0 %v11415_v38  ;;  %6347 = vmatprep.subr.bf16.mxu1 %v11426_v46  ;;  %v11465_v38 = vld [vmem:[#allocation17 + $0x66c] ss:$48 sps:$4 sm:$0xff]   ;;  %v11469_v46 = vld [vmem:[#allocation17 + $0x6c8] ss:$48 sps:$4 sm:$0xff]  }
 0x813   : > { %6427 = vmatprep.subr.bf16.mxu0 %v11423_v41  ;;  %v11468_v41 = vld [vmem:[#allocation17 + $0x6c4] ss:$48 sps:$4 sm:$0xff]  }
 0x815   : > { %6348 = vmatpush1.bf16.msra.mxu1 %v11424_v48  ;;  %v11477_v48 = vld [vmem:[#allocation17 + $0x72c] ss:$48 sps:$4 sm:$0xff]  }
 0x816   : > { %6428 = vmatpush1.bf16.msra.mxu0 %v11421_v45  ;;  %6349 = vmatprep.subr.bf16.mxu1 %v11432_v50  ;;  %v11466_v45 = vld [vmem:[#allocation17 + $0x6c0] ss:$48 sps:$4 sm:$0xff]   ;;  %v11475_v50 = vld [vmem:[#allocation17 + $0x728] ss:$48 sps:$4 sm:$0xff]  }
 0x817   : > { %6429 = vmatprep.subr.bf16.mxu0 %v11429_v47  ;;  %v11474_v47 = vld [vmem:[#allocation17 + $0x724] ss:$48 sps:$4 sm:$0xff]  }
 0x819   : > { %6350 = vmatpush1.bf16.msra.mxu1 %v11430_v52  ;;  %v11483_v52 = vld [vmem:[#allocation17 + $0x78c] ss:$48 sps:$4 sm:$0xff]  }
 0x81a   : > { %6430 = vmatpush1.bf16.msra.mxu0 %v11427_v49  ;;  %6351 = vmatprep.subr.bf16.mxu1 %v11438_v54  ;;  %v11472_v49 = vld [vmem:[#allocation17 + $0x720] ss:$48 sps:$4 sm:$0xff]   ;;  %v11481_v54 = vld [vmem:[#allocation17 + $0x788] ss:$48 sps:$4 sm:$0xff]  }
 0x81b   : > { %6431 = vmatprep.subr.bf16.mxu0 %v11435_v3  ;;  %v11480_v3 = vld [vmem:[#allocation17 + $0x784] ss:$48 sps:$4 sm:$0xff]  }
 0x81d   : > { %6352 = vmatpush1.bf16.msra.mxu1 %v11436_v56  ;;  %v11489_v56 = vld [vmem:[#allocation17 + $0x7ec] ss:$48 sps:$4 sm:$0xff]  }
 0x81e   : > { %6432 = vmatpush1.bf16.msra.mxu0 %v11433_v53  ;;  %v11478_v53 = vld [vmem:[#allocation17 + $0x780] ss:$48 sps:$4 sm:$0xff]  }
 0x81f   : > { %6433 = vmatprep.subr.bf16.mxu0 %v11441_v55  ;;  %v11486_v55 = vld [vmem:[#allocation17 + $0x7e4] ss:$48 sps:$4 sm:$0xff]  }
 0x822   : > { %6434 = vmatpush1.bf16.msra.mxu0 %v11439_v58 }
 0x89b   : > { %v4376_v59 = vpop.f32.mrb[44].mxu1 }
 0x89c   : > { %v4378_v61 = vpop.f32.mrb[45].mxu1 }
 0x89d   : > { %v4380_v2 = vpop.f32.mrb[46].mxu1 }
 0x89e   : > { %v4381_v5 = vpop.f32.mrb[47].mxu1  ;;  %v11442_v2 = vld [vmem:[#allocation17 + $0x540] ss:$48 sps:$4 sm:$0xff]  }
 0x89f   : > { %v11450_v5 = vld [vmem:[#allocation17 + $0x5a4] ss:$48 sps:$4 sm:$0xff]  }
 0x8a0   : > { %v4335_v8 = vpop.f32.mrb[28].mxu0 }
 0x8a1   : > { %v4336_v9 = vadd.f32 %v4335_v8, %v3905_v4  ;;  %v4337_v10 = vpop.f32.mrb[29].mxu0  ;;  %v11445_v4 = vld [vmem:[#allocation17 + $0x548] ss:$48 sps:$4 sm:$0xff]   ;;  %v11448_v8 = vld [vmem:[#allocation17 + $0x5a0] ss:$48 sps:$4 sm:$0xff]  }
 0x8a2   : > { %v4338_v11 = vadd.f32 %v4337_v10, %v3909_v7  ;;  %v4339_v12 = vpop.f32.mrb[30].mxu0  ;;  %v11453_v7 = vld [vmem:[#allocation17 + $0x5ac] ss:$48 sps:$4 sm:$0xff]   ;;  %v11456_v10 = vld [vmem:[#allocation17 + $0x604] ss:$48 sps:$4 sm:$0xff]  }
 0x8a3   : > { %v4377_v60 = vadd.f32 %v4376_v59, %v4336_v9  ;;  %v4340_v13 = vpop.f32.mrb[31].mxu0  ;;  %v11444_v59 = vld [vmem:[#allocation17 + $0x544] ss:$48 sps:$4 sm:$0xff]   ;;  %v11451_v9 = vld [vmem:[#allocation17 + $0x5a8] ss:$48 sps:$4 sm:$0xff]  }
 0x8a4   : > { %v4379_v32 = vadd.f32 %v4378_v61, %v4338_v11  ;;  %v11447_v61 = vld [vmem:[#allocation17 + $0x54c] ss:$48 sps:$4 sm:$0xff]   ;;  %6353 = vmatprep.subr.bf16.mxu1 %v11444_v59  ;;  %v11484_v59 = vld [vmem:[#allocation17 + $0x7e0] ss:$48 sps:$4 sm:$0xff]  }
 0x8a5   : > { %v13501_v35 = vadd.f32 %v12203_v20, %v4377_v60  ;;  %6435 = vmatprep.subr.bf16.mxu0 %v11447_v61  ;;  %6354 = vmatpush1.bf16.msra.mxu1 %v11442_v2  ;;  %v11459_v11 = vld [vmem:[#allocation17 + $0x60c] ss:$48 sps:$4 sm:$0xff]   ;;  %v11487_v61 = vld [vmem:[#allocation17 + $0x7e8] ss:$48 sps:$4 sm:$0xff]   ;;  %v11492_v2 = vld [vmem:[#allocation17 + $0x844] ss:$48 sps:$4 sm:$0xff]  }
 0x8a6   : > { %v13504_v44 = vadd.f32 %v12204_v0, %v4379_v32  ;;  %6436 = vmatpush1.bf16.msra.mxu0 %v11445_v4  ;;  %6355 = vmatprep.subr.bf16.mxu1 %v11450_v5  ;;  %v13522_v0 = vld [vmem:[#allocation14] sm:$0x7]  ;;  %v11495_v4 = vld [vmem:[#allocation17 + $0x84c] ss:$48 sps:$4 sm:$0xff]  }
 0x8a7   : > { %v4473_v30 = vmul.f32 %v13501_v35, %v13501_v35  ;;  %6437 = vmatprep.subr.bf16.mxu0 %v11453_v7  ;;  %v4504_v7 = vrot.slane %v13522_v0, %v13239_v62 }
 0x8a8   : > { %v4474_v39 = vmul.f32 %v13504_v44, %v13504_v44  ;;  %v4468_v16 = vadd.f32 %v13504_v44, %v13501_v35 }
 0x8a9   : > { %6356 = vmatpush1.bf16.msra.mxu1 %v11448_v8  ;;  %v11490_v8 = vld [vmem:[#allocation17 + $0x840] ss:$48 sps:$4 sm:$0xff]  }
 0x8aa   : > { %v4476_v36 = vadd.f32 %v4474_v39, %v4473_v30  ;;  %6438 = vmatpush1.bf16.msra.mxu0 %v11451_v9  ;;  %6366 = vmatprep.subr.bf16.mxu1 %v11456_v10  ;;  %v11493_v9 = vld [vmem:[#allocation17 + $0x848] ss:$48 sps:$4 sm:$0xff]   ;;  %v11498_v10 = vld [vmem:[#allocation17 + $0x8a4] ss:$48 sps:$4 sm:$0xff]  }
 0x8ab   : > { %6448 = vmatprep.subr.bf16.mxu0 %v11459_v11  ;;  %v11501_v11 = vld [vmem:[#allocation17 + $0x8ac] ss:$48 sps:$4 sm:$0xff]  }
 0x8bb   : > { %v10456_v14 = vpop.f32.mrb[48].mxu1 }
 0x8bc   : > { %v10457_v19 = vpop.f32.mrb[49].mxu1 }
 0x8bd   : > { %v10458_v21 = vadd.f32 %v10457_v19, %v10456_v14  ;;  %v10459_v22 = vpop.f32.mrb[50].mxu1 }
 0x8be   : > { %v10460_v26 = vpop.f32.mrb[51].mxu1 }
 0x8bf   : > { %v4418_v57 = vadd.f32 %v10458_v21, %v3913_v15  ;;  %v13524_v21 = vld [vmem:[#allocation16] sm:$0x7] }
 0x8c0   : > { %v4457_v27 = vpop.f32.mrb[32].mxu0  ;;  %v4519_v30 = vrot.slane %v13524_v21, %v13203_v24 }
 0x8c1   : > { %v4458_v29 = vadd.f32 %v4457_v27, %v4418_v57  ;;  %v10713_v63 = vpop.f32.mrb[33].mxu0  ;;  %v4500_v57 = vrot.slane %v13522_v0, %v13203_v24  ;;  %v4496_v27 = vrot.slane %v13522_v0, %v13206_v25 }
 0x8c2   : > { %v4460_v31 = vpop.f32.mrb[34].mxu0 }
 0x8c3   : > { %v13511_v6 = vadd.f32 %v12205_v43, %v4458_v29  ;;  %v10714_v34 = vpop.f32.mrb[35].mxu0  ;;  %v4515_v31 = vrot.slane %v13524_v21, %v13206_v25 }
 0x8c5   : > { %v4469_v17 = vadd.f32 %v4468_v16, %v13511_v6  ;;  %v4475_v18 = vmul.f32 %v13511_v6, %v13511_v6 }
 0x8c7   : > { %4470 = vadd.xlane.f32.xlu1 %v4469_v17  ;;  %v4477_v1 = vadd.f32 %v4476_v36, %v4475_v18  ;;  %v11454_v36 = vld [vmem:[#allocation17 + $0x600] ss:$48 sps:$4 sm:$0xff]  }
 0x8c9   : > { %4478 = vadd.xlane.f32.xlu0 %v4477_v1  ;;  %v11457_v1 = vld [vmem:[#allocation17 + $0x608] ss:$48 sps:$4 sm:$0xff]  }
 0x954   : > { %v4471_v12 = vpop.xlane.xlu1 %4470 }
 0x955   : > { %v13518_v60 = vmul.f32 0.0026041667, %v4471_v12 }
 0x956   : > { %v4479_v13 = vpop.xlane.xlu0 %4478 }
 0x957   : > { %v4480_v32 = vmul.f32 0.0026041667, %v4479_v13  ;;  %v4481_v14 = vmul.f32 %v13518_v60, %v13518_v60  ;;  %v4484_v22 = vsub.f32 %v13501_v35, %v13518_v60  ;;  %v4485_v26 = vsub.f32 %v13504_v44, %v13518_v60  ;;  %v11496_v13 = vld [vmem:[#allocation17 + $0x8a0] ss:$48 sps:$4 sm:$0xff]  }
 0x958   : > { %v4486_v58 = vsub.f32 %v13511_v6, %v13518_v60  ;;  %v4523_v60 = vrot.slane %v13524_v21, %v13239_v62  ;;  %v11508_v21 = vld [vmem:[#allocation17 + $0x70] ss:$48 sps:$4 sm:$0xff]  }
 0x959   : > { %v4482_v15 = vsub.f32 %v4480_v32, %v4481_v14  ;;  %v11499_v32 = vld [vmem:[#allocation17 + $0x8a8] ss:$48 sps:$4 sm:$0xff]  }
 0x95b   : > { %v4483_v19 = vmax.f32 %v4482_v15, 0.0  ;;  %v11504_v15 = vld [vmem:[#allocation17 + $0x14] ss:$48 sps:$4 sm:$0xff]  }
 0x95d   : > { %v4487_v20 = vadd.f32 1e-05, %v4483_v19  ;;  %v11507_v19 = vld [vmem:[#allocation17 + $0x1c] ss:$48 sps:$4 sm:$0xff]  }
 0x95f   : > { %12200 = vrsqrt.f32 %v4487_v20  ;;  %v11502_v20 = vld [vmem:[#allocation17 + $0x10] ss:$48 sps:$4 sm:$0xff]  }
 0x969   : > { %v12201_v29 = vpop.eup %12200 }
 0x96a   : > { %v4490_v63 = vmul.f32 %v12201_v29, %v4485_v26  ;;  %v4489_v39 = vmul.f32 %v12201_v29, %v4484_v22  ;;  %v4491_v5 = vmul.f32 %v12201_v29, %v4486_v58  ;;  %v11505_v22 = vld [vmem:[#allocation17 + $0x18] ss:$48 sps:$4 sm:$0xff]   ;;  %v11510_v26 = vld [vmem:[#allocation17 + $0x74] ss:$48 sps:$4 sm:$0xff]   ;;  %v11561_v58 = vld [vmem:[#allocation17 + $0x37c] ss:$48 sps:$4 sm:$0xff]  }
 0x96b   : > { %v11516_v29 = vld [vmem:[#allocation17 + $0xd4] ss:$48 sps:$4 sm:$0xff]  }
 0x96c   : > { %v4509_v43 = vmul.f32 %v4500_v57, %v4490_v63  ;;  %v4508_v34 = vmul.f32 %v4496_v27, %v4489_v39  ;;  %v4510_v12 = vmul.f32 %v4504_v7, %v4491_v5  ;;  %v11513_v57 = vld [vmem:[#allocation17 + $0x7c] ss:$48 sps:$4 sm:$0xff]   ;;  %v11511_v27 = vld [vmem:[#allocation17 + $0x78] ss:$48 sps:$4 sm:$0xff]   ;;  %v11562_v5 = vld [vmem:[#allocation17 + $0x3d0] ss:$48 sps:$4 sm:$0xff]  }
 0x96d   : > { %v11519_v63 = vld [vmem:[#allocation17 + $0xdc] ss:$48 sps:$4 sm:$0xff]   ;;  %v11517_v39 = vld [vmem:[#allocation17 + $0xd8] ss:$48 sps:$4 sm:$0xff]  }
 0x96e   : > { %v4528_v16 = vadd.f32 %v4519_v30, %v4509_v43  ;;  %v4527_v17 = vadd.f32 %v4515_v31, %v4508_v34  ;;  %v4529_v14 = vadd.f32 %v4523_v60, %v4510_v12  ;;  %v11514_v30 = vld [vmem:[#allocation17 + $0xd0] ss:$48 sps:$4 sm:$0xff]   ;;  %v11522_v31 = vld [vmem:[#allocation17 + $0x134] ss:$48 sps:$4 sm:$0xff]   ;;  %v11525_v43 = vld [vmem:[#allocation17 + $0x13c] ss:$48 sps:$4 sm:$0xff]  }
 0x96f   : > { %v11520_v34 = vld [vmem:[#allocation17 + $0x130] ss:$48 sps:$4 sm:$0xff]   ;;  %v11565_v7 = vld [vmem:[#allocation17 + $0x3d8] ss:$48 sps:$4 sm:$0xff]   ;;  %v11576_v12 = vld [vmem:[#allocation17 + $0x494] ss:$48 sps:$4 sm:$0xff]  }
 0x970   : > { %v13538_v18 = vpack.c.bf16 %v4528_v16, %v4528_v16  ;;  %v13540_v37 = vpack.c.bf16 %v4527_v17, %v4527_v17  ;;  %v13554_v0 = vpack.c.bf16 %v4529_v14, %v4529_v14  ;;  %v11523_v16 = vld [vmem:[#allocation17 + $0x138] ss:$48 sps:$4 sm:$0xff]   ;;  %v11528_v17 = vld [vmem:[#allocation17 + $0x194] ss:$48 sps:$4 sm:$0xff]   ;;  %v11579_v60 = vld [vmem:[#allocation17 + $0x49c] ss:$48 sps:$4 sm:$0xff]  }
 0x971   : > { %v11582_v14 = vld [vmem:[#allocation17 + $0x4f4] ss:$48 sps:$4 sm:$0xff]  }
 0x972   : > { %6357 = vmatprep.mubr.bf16.mxu1 %v13538_v18  ;;  %6439 = vmatprep.mubr.bf16.mxu0 %v13538_v18 }
 0x973   : > { %6358 = vmatmul.mubr.bf16.vlgmr.msra.gmra.mrb[52].mxu1 %v13540_v37  ;;  %6440 = vmatmul.mubr.bf16.vlgmr.msra.gmra.mrb[36].mxu0 %v13540_v37 }
 0x974   : > { %6367 = vmatpush1.bf16.msra.mxu1 %v11454_v36  ;;  %6449 = vmatpush1.bf16.msra.mxu0 %v11457_v1  ;;  %v11531_v36 = vld [vmem:[#allocation17 + $0x19c] ss:$48 sps:$4 sm:$0xff]   ;;  %v11526_v1 = vld [vmem:[#allocation17 + $0x190] ss:$48 sps:$4 sm:$0xff]  }
 0x975   : > { %6368 = vmatprep.subr.bf16.mxu1 %v11462_v28  ;;  %6450 = vmatprep.subr.bf16.mxu0 %v11465_v38  ;;  %v11529_v28 = vld [vmem:[#allocation17 + $0x198] ss:$48 sps:$4 sm:$0xff]   ;;  %v11534_v38 = vld [vmem:[#allocation17 + $0x1f4] ss:$48 sps:$4 sm:$0xff]  }
 0x976   : > { %6398 = vmatprep.mubr.bf16.mxu1 %v12687_v51  ;;  %6480 = vmatprep.mubr.bf16.mxu0 %v12687_v51 }
 0x978   : > { %6369 = vmatpush1.bf16.msra.mxu1 %v11460_v40  ;;  %6451 = vmatpush1.bf16.msra.mxu0 %v11463_v33  ;;  %v11537_v40 = vld [vmem:[#allocation17 + $0x1fc] ss:$48 sps:$4 sm:$0xff]   ;;  %v11532_v33 = vld [vmem:[#allocation17 + $0x1f0] ss:$48 sps:$4 sm:$0xff]  }
 0x979   : > { %6370 = vmatprep.subr.bf16.mxu1 %v11468_v41  ;;  %6452 = vmatprep.subr.bf16.mxu0 %v11471_v42  ;;  %v11535_v41 = vld [vmem:[#allocation17 + $0x1f8] ss:$48 sps:$4 sm:$0xff]   ;;  %v11540_v42 = vld [vmem:[#allocation17 + $0x254] ss:$48 sps:$4 sm:$0xff]  }
 0x97c   : > { %6371 = vmatpush1.bf16.msra.mxu1 %v11466_v45  ;;  %6453 = vmatpush1.bf16.msra.mxu0 %v11469_v46  ;;  %v11543_v45 = vld [vmem:[#allocation17 + $0x25c] ss:$48 sps:$4 sm:$0xff]   ;;  %v11538_v46 = vld [vmem:[#allocation17 + $0x250] ss:$48 sps:$4 sm:$0xff]  }
 0x97d   : > { %6372 = vmatprep.subr.bf16.mxu1 %v11474_v47  ;;  %6454 = vmatprep.subr.bf16.mxu0 %v11477_v48  ;;  %v11541_v47 = vld [vmem:[#allocation17 + $0x258] ss:$48 sps:$4 sm:$0xff]   ;;  %v11546_v48 = vld [vmem:[#allocation17 + $0x2b4] ss:$48 sps:$4 sm:$0xff]  }
 0x980   : > { %6373 = vmatpush1.bf16.msra.mxu1 %v11472_v49  ;;  %6455 = vmatpush1.bf16.msra.mxu0 %v11475_v50  ;;  %v11549_v49 = vld [vmem:[#allocation17 + $0x2bc] ss:$48 sps:$4 sm:$0xff]   ;;  %v11544_v50 = vld [vmem:[#allocation17 + $0x2b0] ss:$48 sps:$4 sm:$0xff]  }
 0x981   : > { %6374 = vmatprep.subr.bf16.mxu1 %v11480_v3  ;;  %6456 = vmatprep.subr.bf16.mxu0 %v11483_v52  ;;  %v11547_v3 = vld [vmem:[#allocation17 + $0x2b8] ss:$48 sps:$4 sm:$0xff]   ;;  %v11552_v52 = vld [vmem:[#allocation17 + $0x314] ss:$48 sps:$4 sm:$0xff]  }
 0x984   : > { %6375 = vmatpush1.bf16.msra.mxu1 %v11478_v53  ;;  %6457 = vmatpush1.bf16.msra.mxu0 %v11481_v54  ;;  %v11555_v53 = vld [vmem:[#allocation17 + $0x31c] ss:$48 sps:$4 sm:$0xff]   ;;  %v11550_v54 = vld [vmem:[#allocation17 + $0x310] ss:$48 sps:$4 sm:$0xff]  }
 0x985   : > { %6376 = vmatprep.subr.bf16.mxu1 %v11486_v55  ;;  %6458 = vmatprep.subr.bf16.mxu0 %v11489_v56  ;;  %v11553_v55 = vld [vmem:[#allocation17 + $0x318] ss:$48 sps:$4 sm:$0xff]   ;;  %v11558_v56 = vld [vmem:[#allocation17 + $0x374] ss:$48 sps:$4 sm:$0xff]  }
 0x988   : > { %6377 = vmatpush1.bf16.msra.mxu1 %v11484_v59  ;;  %6459 = vmatpush1.bf16.msra.mxu0 %v11487_v61  ;;  %v11556_v59 = vld [vmem:[#allocation17 + $0x370] ss:$48 sps:$4 sm:$0xff]   ;;  %v11559_v61 = vld [vmem:[#allocation17 + $0x378] ss:$48 sps:$4 sm:$0xff]  }
 0x989   : > { %6378 = vmatprep.subr.bf16.mxu1 %v11492_v2  ;;  %6460 = vmatprep.subr.bf16.mxu0 %v11495_v4  ;;  %v11564_v2 = vld [vmem:[#allocation17 + $0x3d4] ss:$48 sps:$4 sm:$0xff]   ;;  %v11567_v4 = vld [vmem:[#allocation17 + $0x3dc] ss:$48 sps:$4 sm:$0xff]  }
 0x98c   : > { %6379 = vmatpush1.bf16.msra.mxu1 %v11490_v8  ;;  %6461 = vmatpush1.bf16.msra.mxu0 %v11493_v9  ;;  %v11570_v8 = vld [vmem:[#allocation17 + $0x434] ss:$48 sps:$4 sm:$0xff]   ;;  %v11573_v9 = vld [vmem:[#allocation17 + $0x43c] ss:$48 sps:$4 sm:$0xff]  }
 0x98d   : > { %6380 = vmatprep.subr.bf16.mxu1 %v11498_v10  ;;  %6462 = vmatprep.subr.bf16.mxu0 %v11501_v11  ;;  %v11568_v10 = vld [vmem:[#allocation17 + $0x430] ss:$48 sps:$4 sm:$0xff]   ;;  %v11571_v11 = vld [vmem:[#allocation17 + $0x438] ss:$48 sps:$4 sm:$0xff]  }
 0x990   : > { %6381 = vmatpush1.bf16.msra.mxu1 %v11496_v13  ;;  %6463 = vmatpush1.bf16.msra.mxu0 %v11499_v32  ;;  %v11574_v13 = vld [vmem:[#allocation17 + $0x490] ss:$48 sps:$4 sm:$0xff]   ;;  %v11577_v32 = vld [vmem:[#allocation17 + $0x498] ss:$48 sps:$4 sm:$0xff]  }
 0x991   : > { %6489 = vmatprep.subr.bf16.mxu1 %v11504_v15  ;;  %6571 = vmatprep.subr.bf16.mxu0 %v11507_v19  ;;  %v11585_v15 = vld [vmem:[#allocation17 + $0x4fc] ss:$48 sps:$4 sm:$0xff]   ;;  %v11580_v19 = vld [vmem:[#allocation17 + $0x4f0] ss:$48 sps:$4 sm:$0xff]  }
 0x993   : > { %6399 = vmatmul.mubr.bf16.vlgmr.msra.gmra.mrb[52].mxu1 %v13554_v0  ;;  %6481 = vmatmul.mubr.bf16.vlgmr.msra.gmra.mrb[36].mxu0 %v13554_v0 }
 0x994   : > { %6490 = vmatpush1.bf16.msra.mxu1 %v11502_v20  ;;  %6521 = vmatprep.mubr.bf16.mxu1 %v13538_v18  ;;  %v11583_v20 = vld [vmem:[#allocation17 + $0x4f8] ss:$48 sps:$4 sm:$0xff]  }
 0x995   : > { %6572 = vmatpush1.bf16.msra.mxu0 %v11505_v22  ;;  %6603 = vmatprep.mubr.bf16.mxu0 %v13538_v18  ;;  %v11588_v22 = vld [vmem:[#allocation17 + $0x554] ss:$48 sps:$4 sm:$0xff]  }
 0x996   : > { %6491 = vmatprep.subr.bf16.mxu1 %v11510_v26  ;;  %6573 = vmatprep.subr.bf16.mxu0 %v11513_v57  ;;  %v11591_v26 = vld [vmem:[#allocation17 + $0x55c] ss:$48 sps:$4 sm:$0xff]   ;;  %v11586_v57 = vld [vmem:[#allocation17 + $0x550] ss:$48 sps:$4 sm:$0xff]  }
 0x998   : > { %6492 = vmatpush1.bf16.msra.mxu1 %v11508_v21  ;;  %v11589_v21 = vld [vmem:[#allocation17 + $0x558] ss:$48 sps:$4 sm:$0xff]  }
 0x999   : > { %6574 = vmatpush1.bf16.msra.mxu0 %v11511_v27  ;;  %6493 = vmatprep.subr.bf16.mxu1 %v11516_v29  ;;  %v11594_v27 = vld [vmem:[#allocation17 + $0x5b4] ss:$48 sps:$4 sm:$0xff]   ;;  %v11597_v29 = vld [vmem:[#allocation17 + $0x5bc] ss:$48 sps:$4 sm:$0xff]  }
 0x99a   : > { %6575 = vmatprep.subr.bf16.mxu0 %v11519_v63  ;;  %v11592_v63 = vld [vmem:[#allocation17 + $0x5b0] ss:$48 sps:$4 sm:$0xff]  }
 0x99c   : > { %6494 = vmatpush1.bf16.msra.mxu1 %v11514_v30  ;;  %v11595_v30 = vld [vmem:[#allocation17 + $0x5b8] ss:$48 sps:$4 sm:$0xff]  }
 0x99d   : > { %6576 = vmatpush1.bf16.msra.mxu0 %v11517_v39  ;;  %6495 = vmatprep.subr.bf16.mxu1 %v11522_v31  ;;  %v11600_v39 = vld [vmem:[#allocation17 + $0x614] ss:$48 sps:$4 sm:$0xff]   ;;  %v11603_v31 = vld [vmem:[#allocation17 + $0x61c] ss:$48 sps:$4 sm:$0xff]  }
 0x99e   : > { %6577 = vmatprep.subr.bf16.mxu0 %v11525_v43  ;;  %v11598_v43 = vld [vmem:[#allocation17 + $0x610] ss:$48 sps:$4 sm:$0xff]  }
 0x9a0   : > { %6496 = vmatpush1.bf16.msra.mxu1 %v11520_v34  ;;  %v11601_v34 = vld [vmem:[#allocation17 + $0x618] ss:$48 sps:$4 sm:$0xff]  }
 0x9a1   : > { %6578 = vmatpush1.bf16.msra.mxu0 %v11523_v16  ;;  %6497 = vmatprep.subr.bf16.mxu1 %v11528_v17  ;;  %v11606_v16 = vld [vmem:[#allocation17 + $0x674] ss:$48 sps:$4 sm:$0xff]   ;;  %v11609_v17 = vld [vmem:[#allocation17 + $0x67c] ss:$48 sps:$4 sm:$0xff]  }
 0x9a2   : > { %6579 = vmatprep.subr.bf16.mxu0 %v11531_v36  ;;  %v11604_v36 = vld [vmem:[#allocation17 + $0x670] ss:$48 sps:$4 sm:$0xff]  }
 0x9a4   : > { %6498 = vmatpush1.bf16.msra.mxu1 %v11526_v1  ;;  %v11607_v1 = vld [vmem:[#allocation17 + $0x678] ss:$48 sps:$4 sm:$0xff]  }
 0x9a5   : > { %6580 = vmatpush1.bf16.msra.mxu0 %v11529_v28  ;;  %6499 = vmatprep.subr.bf16.mxu1 %v11534_v38  ;;  %v11612_v28 = vld [vmem:[#allocation17 + $0x6d4] ss:$48 sps:$4 sm:$0xff]   ;;  %v11615_v38 = vld [vmem:[#allocation17 + $0x6dc] ss:$48 sps:$4 sm:$0xff]  }
 0x9a6   : > { %6581 = vmatprep.subr.bf16.mxu0 %v11537_v40  ;;  %v11610_v40 = vld [vmem:[#allocation17 + $0x6d0] ss:$48 sps:$4 sm:$0xff]  }
 0x9a8   : > { %6500 = vmatpush1.bf16.msra.mxu1 %v11532_v33  ;;  %v11613_v33 = vld [vmem:[#allocation17 + $0x6d8] ss:$48 sps:$4 sm:$0xff]  }
 0x9a9   : > { %6582 = vmatpush1.bf16.msra.mxu0 %v11535_v41  ;;  %6501 = vmatprep.subr.bf16.mxu1 %v11540_v42  ;;  %v11618_v41 = vld [vmem:[#allocation17 + $0x734] ss:$48 sps:$4 sm:$0xff]   ;;  %v11621_v42 = vld [vmem:[#allocation17 + $0x73c] ss:$48 sps:$4 sm:$0xff]  }
 0x9aa   : > { %6583 = vmatprep.subr.bf16.mxu0 %v11543_v45  ;;  %v11616_v45 = vld [vmem:[#allocation17 + $0x730] ss:$48 sps:$4 sm:$0xff]  }
 0x9ac   : > { %6502 = vmatpush1.bf16.msra.mxu1 %v11538_v46  ;;  %v11619_v46 = vld [vmem:[#allocation17 + $0x738] ss:$48 sps:$4 sm:$0xff]  }
 0x9ad   : > { %6584 = vmatpush1.bf16.msra.mxu0 %v11541_v47  ;;  %6503 = vmatprep.subr.bf16.mxu1 %v11546_v48  ;;  %v11624_v47 = vld [vmem:[#allocation17 + $0x794] ss:$48 sps:$4 sm:$0xff]   ;;  %v11627_v48 = vld [vmem:[#allocation17 + $0x79c] ss:$48 sps:$4 sm:$0xff]  }
 0x9ae   : > { %6585 = vmatprep.subr.bf16.mxu0 %v11549_v49  ;;  %v11622_v49 = vld [vmem:[#allocation17 + $0x790] ss:$48 sps:$4 sm:$0xff]  }
 0x9b0   : > { %6504 = vmatpush1.bf16.msra.mxu1 %v11544_v50  ;;  %v11625_v50 = vld [vmem:[#allocation17 + $0x798] ss:$48 sps:$4 sm:$0xff]  }
 0x9b1   : > { %6586 = vmatpush1.bf16.msra.mxu0 %v11547_v3  ;;  %6505 = vmatprep.subr.bf16.mxu1 %v11552_v52  ;;  %v11630_v3 = vld [vmem:[#allocation17 + $0x7f4] ss:$48 sps:$4 sm:$0xff]   ;;  %v11633_v52 = vld [vmem:[#allocation17 + $0x7fc] ss:$48 sps:$4 sm:$0xff]  }
 0x9b2   : > { %6587 = vmatprep.subr.bf16.mxu0 %v11555_v53  ;;  %v11628_v53 = vld [vmem:[#allocation17 + $0x7f0] ss:$48 sps:$4 sm:$0xff]  }
 0x9b4   : > { %6506 = vmatpush1.bf16.msra.mxu1 %v11550_v54  ;;  %v11631_v54 = vld [vmem:[#allocation17 + $0x7f8] ss:$48 sps:$4 sm:$0xff]  }
 0x9b5   : > { %6588 = vmatpush1.bf16.msra.mxu0 %v11553_v55  ;;  %6507 = vmatprep.subr.bf16.mxu1 %v11558_v56  ;;  %v11636_v55 = vld [vmem:[#allocation17 + $0x854] ss:$48 sps:$4 sm:$0xff]   ;;  %v11639_v56 = vld [vmem:[#allocation17 + $0x85c] ss:$48 sps:$4 sm:$0xff]  }
 0x9b6   : > { %6589 = vmatprep.subr.bf16.mxu0 %v11561_v58  ;;  %v11634_v58 = vld [vmem:[#allocation17 + $0x850] ss:$48 sps:$4 sm:$0xff]  }
 0x9b8   : > { %6508 = vmatpush1.bf16.msra.mxu1 %v11556_v59  ;;  %v11637_v59 = vld [vmem:[#allocation17 + $0x858] ss:$48 sps:$4 sm:$0xff]  }
 0x9b9   : > { %6590 = vmatpush1.bf16.msra.mxu0 %v11559_v61  ;;  %6509 = vmatprep.subr.bf16.mxu1 %v11564_v2  ;;  %v11642_v61 = vld [vmem:[#allocation17 + $0x8b4] ss:$48 sps:$4 sm:$0xff]   ;;  %v11645_v2 = vld [vmem:[#allocation17 + $0x8bc] ss:$48 sps:$4 sm:$0xff]  }
 0x9ba   : > { %6591 = vmatprep.subr.bf16.mxu0 %v11567_v4  ;;  %v11640_v4 = vld [vmem:[#allocation17 + $0x8b0] ss:$48 sps:$4 sm:$0xff]  }
 0x9bc   : > { %6510 = vmatpush1.bf16.msra.mxu1 %v11562_v5  ;;  %v11643_v5 = vld [vmem:[#allocation17 + $0x8b8] ss:$48 sps:$4 sm:$0xff]  }
 0x9bd   : > { %6592 = vmatpush1.bf16.msra.mxu0 %v11565_v7  ;;  %6511 = vmatprep.subr.bf16.mxu1 %v11570_v8  ;;  %v11648_v7 = vld [vmem:[#allocation17 + $0x24] ss:$48 sps:$4 sm:$0xff]   ;;  %v11651_v8 = vld [vmem:[#allocation17 + $0x2c] ss:$48 sps:$4 sm:$0xff]  }
 0x9be   : > { %6593 = vmatprep.subr.bf16.mxu0 %v11573_v9  ;;  %v11646_v9 = vld [vmem:[#allocation17 + $0x20] ss:$48 sps:$4 sm:$0xff]  }
 0x9c0   : > { %6512 = vmatpush1.bf16.msra.mxu1 %v11568_v10  ;;  %v11649_v10 = vld [vmem:[#allocation17 + $0x28] ss:$48 sps:$4 sm:$0xff]  }
 0x9c1   : > { %6594 = vmatpush1.bf16.msra.mxu0 %v11571_v11  ;;  %6513 = vmatprep.subr.bf16.mxu1 %v11576_v12  ;;  %v11654_v11 = vld [vmem:[#allocation17 + $0x84] ss:$48 sps:$4 sm:$0xff]   ;;  %v11657_v12 = vld [vmem:[#allocation17 + $0x8c] ss:$48 sps:$4 sm:$0xff]  }
 0x9c2   : > { %6595 = vmatprep.subr.bf16.mxu0 %v11579_v60  ;;  %v11652_v60 = vld [vmem:[#allocation17 + $0x80] ss:$48 sps:$4 sm:$0xff]  }
 0x9c4   : > { %6514 = vmatpush1.bf16.msra.mxu1 %v11574_v13  ;;  %v11655_v13 = vld [vmem:[#allocation17 + $0x88] ss:$48 sps:$4 sm:$0xff]  }
 0x9c5   : > { %6596 = vmatpush1.bf16.msra.mxu0 %v11577_v32  ;;  %6515 = vmatprep.subr.bf16.mxu1 %v11582_v14  ;;  %v11660_v32 = vld [vmem:[#allocation17 + $0xe4] ss:$48 sps:$4 sm:$0xff]   ;;  %v11663_v14 = vld [vmem:[#allocation17 + $0xec] ss:$48 sps:$4 sm:$0xff]  }
 0x9c6   : > { %6597 = vmatprep.subr.bf16.mxu0 %v11585_v15  ;;  %v11658_v15 = vld [vmem:[#allocation17 + $0xe0] ss:$48 sps:$4 sm:$0xff]  }
 0x9c8   : > { %6516 = vmatpush1.bf16.msra.mxu1 %v11580_v19  ;;  %v11661_v19 = vld [vmem:[#allocation17 + $0xe8] ss:$48 sps:$4 sm:$0xff]  }
 0x9c9   : > { %6598 = vmatpush1.bf16.msra.mxu0 %v11583_v20  ;;  %6517 = vmatprep.subr.bf16.mxu1 %v11588_v22  ;;  %v11666_v20 = vld [vmem:[#allocation17 + $0x144] ss:$48 sps:$4 sm:$0xff]   ;;  %v11669_v22 = vld [vmem:[#allocation17 + $0x14c] ss:$48 sps:$4 sm:$0xff]  }
 0x9ca   : > { %6599 = vmatprep.subr.bf16.mxu0 %v11591_v26  ;;  %v11664_v26 = vld [vmem:[#allocation17 + $0x140] ss:$48 sps:$4 sm:$0xff]  }
 0x9cc   : > { %6518 = vmatpush1.bf16.msra.mxu1 %v11586_v57  ;;  %v11667_v57 = vld [vmem:[#allocation17 + $0x148] ss:$48 sps:$4 sm:$0xff]  }
 0x9cd   : > { %6600 = vmatpush1.bf16.msra.mxu0 %v11589_v21  ;;  %6519 = vmatprep.subr.bf16.mxu1 %v11594_v27  ;;  %v11672_v21 = vld [vmem:[#allocation17 + $0x1a4] ss:$48 sps:$4 sm:$0xff]   ;;  %v11675_v27 = vld [vmem:[#allocation17 + $0x1ac] ss:$48 sps:$4 sm:$0xff]  }
 0x9ce   : > { %6601 = vmatprep.subr.bf16.mxu0 %v11597_v29  ;;  %v11673_v29 = vld [vmem:[#allocation17 + $0x1a8] ss:$48 sps:$4 sm:$0xff]  }
 0x9d0   : > { %6520 = vmatpush1.bf16.msra.mxu1 %v11592_v63  ;;  %v11678_v63 = vld [vmem:[#allocation17 + $0x204] ss:$48 sps:$4 sm:$0xff]  }
 0x9d1   : > { %6602 = vmatpush1.bf16.msra.mxu0 %v11595_v30  ;;  %6530 = vmatprep.subr.bf16.mxu1 %v11600_v39  ;;  %v11681_v30 = vld [vmem:[#allocation17 + $0x20c] ss:$48 sps:$4 sm:$0xff]   ;;  %v11676_v39 = vld [vmem:[#allocation17 + $0x200] ss:$48 sps:$4 sm:$0xff]  }
 0x9d2   : > { %6612 = vmatprep.subr.bf16.mxu0 %v11603_v31  ;;  %v11679_v31 = vld [vmem:[#allocation17 + $0x208] ss:$48 sps:$4 sm:$0xff]  }
 0x9d3   : > { %6522 = vmatmul.mubr.bf16.vlgmr.msra.gmra.mrb[56].mxu1 %v13540_v37 }
 0x9d4   : > { %6604 = vmatmul.mubr.bf16.vlgmr.msra.gmra.mrb[40].mxu0 %v13540_v37  ;;  %6531 = vmatpush1.bf16.msra.mxu1 %v11598_v43  ;;  %v11684_v43 = vld [vmem:[#allocation17 + $0x264] ss:$48 sps:$4 sm:$0xff]  }
 0x9d5   : > { %6613 = vmatpush1.bf16.msra.mxu0 %v11601_v34  ;;  %6532 = vmatprep.subr.bf16.mxu1 %v11606_v16  ;;  %v11687_v34 = vld [vmem:[#allocation17 + $0x26c] ss:$48 sps:$4 sm:$0xff]   ;;  %v11682_v16 = vld [vmem:[#allocation17 + $0x260] ss:$48 sps:$4 sm:$0xff]  }
 0x9d6   : > { %6614 = vmatprep.subr.bf16.mxu0 %v11609_v17  ;;  %6562 = vmatprep.mubr.bf16.mxu1 %v12687_v51  ;;  %v11685_v17 = vld [vmem:[#allocation17 + $0x268] ss:$48 sps:$4 sm:$0xff]  }
 0x9d7   : > { %6644 = vmatprep.mubr.bf16.mxu0 %v12687_v51 }
 0x9d8   : > { %6533 = vmatpush1.bf16.msra.mxu1 %v11604_v36  ;;  %v11690_v36 = vld [vmem:[#allocation17 + $0x2c4] ss:$48 sps:$4 sm:$0xff]  }
 0x9d9   : > { %6615 = vmatpush1.bf16.msra.mxu0 %v11607_v1  ;;  %6534 = vmatprep.subr.bf16.mxu1 %v11612_v28  ;;  %v11693_v1 = vld [vmem:[#allocation17 + $0x2cc] ss:$48 sps:$4 sm:$0xff]   ;;  %v11688_v28 = vld [vmem:[#allocation17 + $0x2c0] ss:$48 sps:$4 sm:$0xff]  }
 0x9da   : > { %6616 = vmatprep.subr.bf16.mxu0 %v11615_v38  ;;  %v11691_v38 = vld [vmem:[#allocation17 + $0x2c8] ss:$48 sps:$4 sm:$0xff]  }
 0x9dc   : > { %6535 = vmatpush1.bf16.msra.mxu1 %v11610_v40  ;;  %v11696_v40 = vld [vmem:[#allocation17 + $0x324] ss:$48 sps:$4 sm:$0xff]  }
 0x9dd   : > { %6617 = vmatpush1.bf16.msra.mxu0 %v11613_v33  ;;  %6536 = vmatprep.subr.bf16.mxu1 %v11618_v41  ;;  %v11699_v33 = vld [vmem:[#allocation17 + $0x32c] ss:$48 sps:$4 sm:$0xff]   ;;  %v11694_v41 = vld [vmem:[#allocation17 + $0x320] ss:$48 sps:$4 sm:$0xff]  }
 0x9de   : > { %6618 = vmatprep.subr.bf16.mxu0 %v11621_v42  ;;  %v11697_v42 = vld [vmem:[#allocation17 + $0x328] ss:$48 sps:$4 sm:$0xff]  }
 0x9e0   : > { %6537 = vmatpush1.bf16.msra.mxu1 %v11616_v45  ;;  %v11702_v45 = vld [vmem:[#allocation17 + $0x384] ss:$48 sps:$4 sm:$0xff]  }
 0x9e1   : > { %6619 = vmatpush1.bf16.msra.mxu0 %v11619_v46  ;;  %6538 = vmatprep.subr.bf16.mxu1 %v11624_v47  ;;  %v11705_v46 = vld [vmem:[#allocation17 + $0x38c] ss:$48 sps:$4 sm:$0xff]   ;;  %v11700_v47 = vld [vmem:[#allocation17 + $0x380] ss:$48 sps:$4 sm:$0xff]  }
 0x9e2   : > { %6620 = vmatprep.subr.bf16.mxu0 %v11627_v48  ;;  %v11703_v48 = vld [vmem:[#allocation17 + $0x388] ss:$48 sps:$4 sm:$0xff]  }
 0x9e4   : > { %6539 = vmatpush1.bf16.msra.mxu1 %v11622_v49  ;;  %v11708_v49 = vld [vmem:[#allocation17 + $0x3e4] ss:$48 sps:$4 sm:$0xff]  }
 0x9e5   : > { %6621 = vmatpush1.bf16.msra.mxu0 %v11625_v50  ;;  %6540 = vmatprep.subr.bf16.mxu1 %v11630_v3  ;;  %v11711_v50 = vld [vmem:[#allocation17 + $0x3ec] ss:$48 sps:$4 sm:$0xff]   ;;  %v11706_v3 = vld [vmem:[#allocation17 + $0x3e0] ss:$48 sps:$4 sm:$0xff]  }
 0x9e6   : > { %6622 = vmatprep.subr.bf16.mxu0 %v11633_v52  ;;  %v11709_v52 = vld [vmem:[#allocation17 + $0x3e8] ss:$48 sps:$4 sm:$0xff]  }
 0x9e8   : > { %6541 = vmatpush1.bf16.msra.mxu1 %v11628_v53  ;;  %v11714_v53 = vld [vmem:[#allocation17 + $0x444] ss:$48 sps:$4 sm:$0xff]  }
 0x9e9   : > { %6623 = vmatpush1.bf16.msra.mxu0 %v11631_v54  ;;  %6542 = vmatprep.subr.bf16.mxu1 %v11636_v55  ;;  %v11717_v54 = vld [vmem:[#allocation17 + $0x44c] ss:$48 sps:$4 sm:$0xff]   ;;  %v11712_v55 = vld [vmem:[#allocation17 + $0x440] ss:$48 sps:$4 sm:$0xff]  }
 0x9ea   : > { %6624 = vmatprep.subr.bf16.mxu0 %v11639_v56  ;;  %v11715_v56 = vld [vmem:[#allocation17 + $0x448] ss:$48 sps:$4 sm:$0xff]  }
 0x9ec   : > { %6543 = vmatpush1.bf16.msra.mxu1 %v11634_v58  ;;  %v11720_v58 = vld [vmem:[#allocation17 + $0x4a4] ss:$48 sps:$4 sm:$0xff]  }
 0x9ed   : > { %6625 = vmatpush1.bf16.msra.mxu0 %v11637_v59  ;;  %6544 = vmatprep.subr.bf16.mxu1 %v11642_v61  ;;  %v11723_v59 = vld [vmem:[#allocation17 + $0x4ac] ss:$48 sps:$4 sm:$0xff]   ;;  %v11718_v61 = vld [vmem:[#allocation17 + $0x4a0] ss:$48 sps:$4 sm:$0xff]  }
 0x9ee   : > { %6626 = vmatprep.subr.bf16.mxu0 %v11645_v2  ;;  %v11721_v2 = vld [vmem:[#allocation17 + $0x4a8] ss:$48 sps:$4 sm:$0xff]  }
 0x9f0   : > { %6545 = vmatpush1.bf16.msra.mxu1 %v11640_v4  ;;  %v11726_v4 = vld [vmem:[#allocation17 + $0x504] ss:$48 sps:$4 sm:$0xff]  }
 0x9f1   : > { %6627 = vmatpush1.bf16.msra.mxu0 %v11643_v5  ;;  %6653 = vmatprep.subr.bf16.mxu1 %v11648_v7  ;;  %v11729_v5 = vld [vmem:[#allocation17 + $0x50c] ss:$48 sps:$4 sm:$0xff]   ;;  %v11724_v7 = vld [vmem:[#allocation17 + $0x500] ss:$48 sps:$4 sm:$0xff]  }
 0x9f2   : > { %6735 = vmatprep.subr.bf16.mxu0 %v11651_v8  ;;  %v11727_v8 = vld [vmem:[#allocation17 + $0x508] ss:$48 sps:$4 sm:$0xff]  }
 0x9f3   : > { %6563 = vmatmul.mubr.bf16.vlgmr.msra.gmra.mrb[56].mxu1 %v13554_v0 }
 0x9f4   : > { %6645 = vmatmul.mubr.bf16.vlgmr.msra.gmra.mrb[40].mxu0 %v13554_v0  ;;  %6654 = vmatpush1.bf16.msra.mxu1 %v11646_v9  ;;  %v11732_v9 = vld [vmem:[#allocation17 + $0x564] ss:$48 sps:$4 sm:$0xff]  }
 0x9f5   : > { %6685 = vmatprep.mubr.bf16.mxu1 %v13538_v18  ;;  %6736 = vmatpush1.bf16.msra.mxu0 %v11649_v10  ;;  %v11735_v10 = vld [vmem:[#allocation17 + $0x56c] ss:$48 sps:$4 sm:$0xff]  }
 0x9f6   : > { %6767 = vmatprep.mubr.bf16.mxu0 %v13538_v18  ;;  %6655 = vmatprep.subr.bf16.mxu1 %v11654_v11  ;;  %v11670_v18 = vld [vmem:[#allocation17 + $0x1a0] ss:$48 sps:$4 sm:$0xff]  }
 0x9f7   : > { %6737 = vmatprep.subr.bf16.mxu0 %v11657_v12  ;;  %v11730_v11 = vld [vmem:[#allocation17 + $0x560] ss:$48 sps:$4 sm:$0xff]   ;;  %v11733_v12 = vld [vmem:[#allocation17 + $0x568] ss:$48 sps:$4 sm:$0xff]  }
 0x9f8   : > { %6656 = vmatpush1.bf16.msra.mxu1 %v11652_v60  ;;  %v11738_v60 = vld [vmem:[#allocation17 + $0x5c4] ss:$48 sps:$4 sm:$0xff]  }
 0x9f9   : > { %6738 = vmatpush1.bf16.msra.mxu0 %v11655_v13  ;;  %6657 = vmatprep.subr.bf16.mxu1 %v11660_v32  ;;  %v11741_v13 = vld [vmem:[#allocation17 + $0x5cc] ss:$48 sps:$4 sm:$0xff]   ;;  %v11736_v32 = vld [vmem:[#allocation17 + $0x5c0] ss:$48 sps:$4 sm:$0xff]  }
 0x9fa   : > { %6739 = vmatprep.subr.bf16.mxu0 %v11663_v14  ;;  %v11739_v14 = vld [vmem:[#allocation17 + $0x5c8] ss:$48 sps:$4 sm:$0xff]  }
 0x9fc   : > { %6658 = vmatpush1.bf16.msra.mxu1 %v11658_v15  ;;  %v11744_v15 = vld [vmem:[#allocation17 + $0x624] ss:$48 sps:$4 sm:$0xff]  }
 0x9fd   : > { %6740 = vmatpush1.bf16.msra.mxu0 %v11661_v19  ;;  %6659 = vmatprep.subr.bf16.mxu1 %v11666_v20  ;;  %v11747_v19 = vld [vmem:[#allocation17 + $0x62c] ss:$48 sps:$4 sm:$0xff]   ;;  %v11742_v20 = vld [vmem:[#allocation17 + $0x620] ss:$48 sps:$4 sm:$0xff]  }
 0x9fe   : > { %6741 = vmatprep.subr.bf16.mxu0 %v11669_v22  ;;  %v11745_v22 = vld [vmem:[#allocation17 + $0x628] ss:$48 sps:$4 sm:$0xff]  }
 0xa00   : > { %6660 = vmatpush1.bf16.msra.mxu1 %v11664_v26  ;;  %v11750_v26 = vld [vmem:[#allocation17 + $0x684] ss:$48 sps:$4 sm:$0xff]  }
 0xa01   : > { %6742 = vmatpush1.bf16.msra.mxu0 %v11667_v57  ;;  %6661 = vmatprep.subr.bf16.mxu1 %v11672_v21  ;;  %v11753_v57 = vld [vmem:[#allocation17 + $0x68c] ss:$48 sps:$4 sm:$0xff]   ;;  %v11748_v21 = vld [vmem:[#allocation17 + $0x680] ss:$48 sps:$4 sm:$0xff]  }
 0xa02   : > { %6743 = vmatprep.subr.bf16.mxu0 %v11675_v27  ;;  %v11751_v27 = vld [vmem:[#allocation17 + $0x688] ss:$48 sps:$4 sm:$0xff]  }
 0xa04   : > { %6662 = vmatpush1.bf16.msra.mxu1 %v11670_v18  ;;  %v11756_v18 = vld [vmem:[#allocation17 + $0x6e4] ss:$48 sps:$4 sm:$0xff]  }
 0xa05   : > { %6744 = vmatpush1.bf16.msra.mxu0 %v11673_v29  ;;  %6663 = vmatprep.subr.bf16.mxu1 %v11678_v63  ;;  %v11759_v29 = vld [vmem:[#allocation17 + $0x6ec] ss:$48 sps:$4 sm:$0xff]   ;;  %v11754_v63 = vld [vmem:[#allocation17 + $0x6e0] ss:$48 sps:$4 sm:$0xff]  }
 0xa06   : > { %6745 = vmatprep.subr.bf16.mxu0 %v11681_v30  ;;  %v11757_v30 = vld [vmem:[#allocation17 + $0x6e8] ss:$48 sps:$4 sm:$0xff]  }
 0xa08   : > { %6664 = vmatpush1.bf16.msra.mxu1 %v11676_v39  ;;  %v11762_v39 = vld [vmem:[#allocation17 + $0x744] ss:$48 sps:$4 sm:$0xff]  }
 0xa09   : > { %6746 = vmatpush1.bf16.msra.mxu0 %v11679_v31  ;;  %6665 = vmatprep.subr.bf16.mxu1 %v11684_v43  ;;  %v11760_v31 = vld [vmem:[#allocation17 + $0x740] ss:$48 sps:$4 sm:$0xff]   ;;  %v11763_v43 = vld [vmem:[#allocation17 + $0x748] ss:$48 sps:$4 sm:$0xff]  }
 0xa0a   : > { %6747 = vmatprep.subr.bf16.mxu0 %v11687_v34  ;;  %v11768_v34 = vld [vmem:[#allocation17 + $0x7a4] ss:$48 sps:$4 sm:$0xff]  }
 0xa0c   : > { %6666 = vmatpush1.bf16.msra.mxu1 %v11682_v16  ;;  %v11771_v16 = vld [vmem:[#allocation17 + $0x7ac] ss:$48 sps:$4 sm:$0xff]  }
 0xa0d   : > { %6748 = vmatpush1.bf16.msra.mxu0 %v11685_v17  ;;  %6667 = vmatprep.subr.bf16.mxu1 %v11690_v36  ;;  %v11766_v17 = vld [vmem:[#allocation17 + $0x7a0] ss:$48 sps:$4 sm:$0xff]   ;;  %v11774_v36 = vld [vmem:[#allocation17 + $0x804] ss:$48 sps:$4 sm:$0xff]  }
 0xa0e   : > { %6749 = vmatprep.subr.bf16.mxu0 %v11693_v1  ;;  %v11777_v1 = vld [vmem:[#allocation17 + $0x80c] ss:$48 sps:$4 sm:$0xff]  }
 0xa10   : > { %6668 = vmatpush1.bf16.msra.mxu1 %v11688_v28  ;;  %v11772_v28 = vld [vmem:[#allocation17 + $0x800] ss:$48 sps:$4 sm:$0xff]  }
 0xa11   : > { %6750 = vmatpush1.bf16.msra.mxu0 %v11691_v38  ;;  %6669 = vmatprep.subr.bf16.mxu1 %v11696_v40  ;;  %v11775_v38 = vld [vmem:[#allocation17 + $0x808] ss:$48 sps:$4 sm:$0xff]   ;;  %v11780_v40 = vld [vmem:[#allocation17 + $0x864] ss:$48 sps:$4 sm:$0xff]  }
 0xa12   : > { %6751 = vmatprep.subr.bf16.mxu0 %v11699_v33  ;;  %v11783_v33 = vld [vmem:[#allocation17 + $0x86c] ss:$48 sps:$4 sm:$0xff]  }
 0xa14   : > { %6670 = vmatpush1.bf16.msra.mxu1 %v11694_v41  ;;  %v11778_v41 = vld [vmem:[#allocation17 + $0x860] ss:$48 sps:$4 sm:$0xff]  }
 0xa15   : > { %6752 = vmatpush1.bf16.msra.mxu0 %v11697_v42  ;;  %6671 = vmatprep.subr.bf16.mxu1 %v11702_v45  ;;  %v11781_v42 = vld [vmem:[#allocation17 + $0x868] ss:$48 sps:$4 sm:$0xff]   ;;  %v11786_v45 = vld [vmem:[#allocation17 + $0x8c4] ss:$48 sps:$4 sm:$0xff]  }
 0xa16   : > { %6753 = vmatprep.subr.bf16.mxu0 %v11705_v46  ;;  %v11789_v46 = vld [vmem:[#allocation17 + $0x8cc] ss:$48 sps:$4 sm:$0xff]  }
 0xa18   : > { %6672 = vmatpush1.bf16.msra.mxu1 %v11700_v47  ;;  %v11784_v47 = vld [vmem:[#allocation17 + $0x8c0] ss:$48 sps:$4 sm:$0xff]  }
 0xa19   : > { %6754 = vmatpush1.bf16.msra.mxu0 %v11703_v48  ;;  %6673 = vmatprep.subr.bf16.mxu1 %v11708_v49  ;;  %v11787_v48 = vld [vmem:[#allocation17 + $0x8c8] ss:$48 sps:$4 sm:$0xff]   ;;  %v11792_v49 = vld [vmem:[#allocation20 + $0x4] ss:$12 sps:$4 sm:$0xff]  }
 0xa1a   : > { %6755 = vmatprep.subr.bf16.mxu0 %v11711_v50  ;;  %v11795_v50 = vld [vmem:[#allocation20 + $0x184] ss:$12 sps:$4 sm:$0xff]  }
 0xa1c   : > { %6674 = vmatpush1.bf16.msra.mxu1 %v11706_v3  ;;  %v11790_v3 = vld [vmem:[#allocation20] ss:$12 sps:$4 sm:$0xff]  }
 0xa1d   : > { %6756 = vmatpush1.bf16.msra.mxu0 %v11709_v52  ;;  %6675 = vmatprep.subr.bf16.mxu1 %v11714_v53  ;;  %v11793_v52 = vld [vmem:[#allocation20 + $0x180] ss:$12 sps:$4 sm:$0xff]   ;;  %v11798_v53 = vld [vmem:[#allocation20 + $0x1c] ss:$12 sps:$4 sm:$0xff]  }
 0xa1e   : > { %6757 = vmatprep.subr.bf16.mxu0 %v11717_v54  ;;  %v11801_v54 = vld [vmem:[#allocation20 + $0x19c] ss:$12 sps:$4 sm:$0xff]  }
 0xa20   : > { %6676 = vmatpush1.bf16.msra.mxu1 %v11712_v55  ;;  %v11796_v55 = vld [vmem:[#allocation20 + $0x18] ss:$12 sps:$4 sm:$0xff]  }
 0xa21   : > { %6758 = vmatpush1.bf16.msra.mxu0 %v11715_v56  ;;  %6677 = vmatprep.subr.bf16.mxu1 %v11720_v58  ;;  %v11799_v56 = vld [vmem:[#allocation20 + $0x198] ss:$12 sps:$4 sm:$0xff]   ;;  %v11804_v58 = vld [vmem:[#allocation20 + $0x34] ss:$12 sps:$4 sm:$0xff]  }
 0xa22   : > { %6759 = vmatprep.subr.bf16.mxu0 %v11723_v59  ;;  %v11807_v59 = vld [vmem:[#allocation20 + $0x1b4] ss:$12 sps:$4 sm:$0xff]  }
 0xa24   : > { %6678 = vmatpush1.bf16.msra.mxu1 %v11718_v61  ;;  %v11802_v61 = vld [vmem:[#allocation20 + $0x30] ss:$12 sps:$4 sm:$0xff]  }
 0xa25   : > { %6760 = vmatpush1.bf16.msra.mxu0 %v11721_v2  ;;  %6679 = vmatprep.subr.bf16.mxu1 %v11726_v4  ;;  %v11805_v2 = vld [vmem:[#allocation20 + $0x1b0] ss:$12 sps:$4 sm:$0xff]   ;;  %v11810_v4 = vld [vmem:[#allocation20 + $0x4c] ss:$12 sps:$4 sm:$0xff]  }
 0xa26   : > { %6761 = vmatprep.subr.bf16.mxu0 %v11729_v5  ;;  %v11813_v5 = vld [vmem:[#allocation20 + $0x1cc] ss:$12 sps:$4 sm:$0xff]  }
 0xa28   : > { %6680 = vmatpush1.bf16.msra.mxu1 %v11724_v7  ;;  %v11808_v7 = vld [vmem:[#allocation20 + $0x48] ss:$12 sps:$4 sm:$0xff]  }
 0xa29   : > { %6762 = vmatpush1.bf16.msra.mxu0 %v11727_v8  ;;  %6681 = vmatprep.subr.bf16.mxu1 %v11732_v9  ;;  %v11816_v8 = vld [vmem:[#allocation20 + $0x64] ss:$12 sps:$4 sm:$0xff]  }
 0xa2a   : > { %6763 = vmatprep.subr.bf16.mxu0 %v11735_v10  ;;  %v11819_v9 = vld [vmem:[#allocation20 + $0x1e4] ss:$12 sps:$4 sm:$0xff]   ;;  %v11814_v10 = vld [vmem:[#allocation20 + $0x60] ss:$12 sps:$4 sm:$0xff]  }
 0xa2c   : > { %6682 = vmatpush1.bf16.msra.mxu1 %v11730_v11  ;;  %v4839_v11 = vsub.s32 3, %v13200_v23 }
 0xa2d   : > { %6764 = vmatpush1.bf16.msra.mxu0 %v11733_v12  ;;  %6683 = vmatprep.subr.bf16.mxu1 %v11738_v60  ;;  %v11817_v12 = vld [vmem:[#allocation20 + $0x1e0] ss:$12 sps:$4 sm:$0xff]   ;;  %v13575_v60 = vld [vmem:[#allocation19] sm:$0xff] }
 0xa2e   : > { %6765 = vmatprep.subr.bf16.mxu0 %v11741_v13  ;;  %v11822_v13 = vld [vmem:[#allocation20 + $0x7c] ss:$12 sps:$4 sm:$0xff]  }
 0xa30   : > { %6684 = vmatpush1.bf16.msra.mxu1 %v11736_v32  ;;  %v11825_v32 = vld [vmem:[#allocation20 + $0x1fc] ss:$12 sps:$4 sm:$0xff]  }
 0xa31   : > { %6766 = vmatpush1.bf16.msra.mxu0 %v11739_v14  ;;  %6694 = vmatprep.subr.bf16.mxu1 %v11744_v15  ;;  %v4832_v14 = vrot.slane %v13575_v60, %v13203_v24  ;;  %v4840_v15 = vrot.slane %v13575_v60, %v4839_v11 }
 0xa32   : > { %6776 = vmatprep.subr.bf16.mxu0 %v11747_v19  ;;  %v11820_v19 = vld [vmem:[#allocation20 + $0x78] ss:$12 sps:$4 sm:$0xff]  }
 0xa33   : > { %6686 = vmatmul.mubr.bf16.vlgmr.msra.gmra.mrb[60].mxu1 %v13540_v37 }
 0xa34   : > { %6768 = vmatmul.mubr.bf16.vlgmr.msra.gmra.mrb[44].mxu0 %v13540_v37  ;;  %6695 = vmatpush1.bf16.msra.mxu1 %v11742_v20  ;;  %v11765_v37 = vld [vmem:[#allocation17 + $0x74c] ss:$48 sps:$4 sm:$0xff]   ;;  %v11823_v20 = vld [vmem:[#allocation20 + $0x1f8] ss:$12 sps:$4 sm:$0xff]  }
 0xa35   : > { %6777 = vmatpush1.bf16.msra.mxu0 %v11745_v22  ;;  %6696 = vmatprep.subr.bf16.mxu1 %v11750_v26  ;;  %v11828_v22 = vld [vmem:[#allocation20 + $0x94] ss:$12 sps:$4 sm:$0xff]  }
 0xa36   : > { %6778 = vmatprep.subr.bf16.mxu0 %v11753_v57  ;;  %6726 = vmatprep.mubr.bf16.mxu1 %v12687_v51 }
 0xa37   : > { %6808 = vmatprep.mubr.bf16.mxu0 %v12687_v51  ;;  %v11769_v51 = vld [vmem:[#allocation17 + $0x7a8] ss:$48 sps:$4 sm:$0xff]  }
 0xa38   : > { %6697 = vmatpush1.bf16.msra.mxu1 %v11748_v21  ;;  %v11831_v21 = vld [vmem:[#allocation20 + $0x214] ss:$12 sps:$4 sm:$0xff]  }
 0xa39   : > { %6779 = vmatpush1.bf16.msra.mxu0 %v11751_v27  ;;  %6698 = vmatprep.subr.bf16.mxu1 %v11756_v18 }
 0xa3a   : > { %6780 = vmatprep.subr.bf16.mxu0 %v11759_v29 }
 0xa3c   : > { %6699 = vmatpush1.bf16.msra.mxu1 %v11754_v63 }
 0xa3d   : > { %6781 = vmatpush1.bf16.msra.mxu0 %v11757_v30  ;;  %6700 = vmatprep.subr.bf16.mxu1 %v11762_v39 }
 0xa3e   : > { %6782 = vmatprep.subr.bf16.mxu0 %v11765_v37  ;;  %v11826_v37 = vld [vmem:[#allocation20 + $0x90] ss:$12 sps:$4 sm:$0xff]  }
 0xa40   : > { %6701 = vmatpush1.bf16.msra.mxu1 %v11760_v31 }
 0xa41   : > { %6783 = vmatpush1.bf16.msra.mxu0 %v11763_v43  ;;  %6702 = vmatprep.subr.bf16.mxu1 %v11768_v34  ;;  %v11829_v34 = vld [vmem:[#allocation20 + $0x210] ss:$12 sps:$4 sm:$0xff]  }
 0xa42   : > { %6784 = vmatprep.subr.bf16.mxu0 %v11771_v16  ;;  %v11834_v16 = vld [vmem:[#allocation20 + $0xac] ss:$12 sps:$4 sm:$0xff]  }
 0xa44   : > { %6703 = vmatpush1.bf16.msra.mxu1 %v11766_v17 }
 0xa45   : > { %6785 = vmatpush1.bf16.msra.mxu0 %v11769_v51  ;;  %6704 = vmatprep.subr.bf16.mxu1 %v11774_v36  ;;  %v11837_v36 = vld [vmem:[#allocation20 + $0x22c] ss:$12 sps:$4 sm:$0xff]  }
 0xa46   : > { %6786 = vmatprep.subr.bf16.mxu0 %v11777_v1 }
 0xa48   : > { %6705 = vmatpush1.bf16.msra.mxu1 %v11772_v28 }
 0xa49   : > { %6787 = vmatpush1.bf16.msra.mxu0 %v11775_v38  ;;  %6706 = vmatprep.subr.bf16.mxu1 %v11780_v40  ;;  %v11832_v38 = vld [vmem:[#allocation20 + $0xa8] ss:$12 sps:$4 sm:$0xff]  }
 0xa4a   : > { %6788 = vmatprep.subr.bf16.mxu0 %v11783_v33  ;;  %v11835_v40 = vld [vmem:[#allocation20 + $0x228] ss:$12 sps:$4 sm:$0xff]   ;;  %v11840_v33 = vld [vmem:[#allocation20 + $0xc4] ss:$12 sps:$4 sm:$0xff]  }
 0xa4c   : > { %6707 = vmatpush1.bf16.msra.mxu1 %v11778_v41  ;;  %v11843_v41 = vld [vmem:[#allocation20 + $0x244] ss:$12 sps:$4 sm:$0xff]  }
 0xa4d   : > { %6789 = vmatpush1.bf16.msra.mxu0 %v11781_v42  ;;  %6708 = vmatprep.subr.bf16.mxu1 %v11786_v45  ;;  %v11838_v42 = vld [vmem:[#allocation20 + $0xc0] ss:$12 sps:$4 sm:$0xff]  }
 0xa4e   : > { %6790 = vmatprep.subr.bf16.mxu0 %v11789_v46  ;;  %v11841_v45 = vld [vmem:[#allocation20 + $0x240] ss:$12 sps:$4 sm:$0xff]   ;;  %v11846_v46 = vld [vmem:[#allocation20 + $0xdc] ss:$12 sps:$4 sm:$0xff]  }
 0xa50   : > { %6709 = vmatpush1.bf16.msra.mxu1 %v11784_v47  ;;  %v11849_v47 = vld [vmem:[#allocation20 + $0x25c] ss:$12 sps:$4 sm:$0xff]  }
 0xa51   : > { %6791 = vmatpush1.bf16.msra.mxu0 %v11787_v48  ;;  %8778 = vmatprep.subr.bf16.mxu1 %v11792_v49  ;;  %v11844_v48 = vld [vmem:[#allocation20 + $0xd8] ss:$12 sps:$4 sm:$0xff]  }
 0xa52   : > { %8819 = vmatprep.subr.bf16.mxu0 %v11795_v50  ;;  %v11847_v49 = vld [vmem:[#allocation20 + $0x258] ss:$12 sps:$4 sm:$0xff]   ;;  %v11852_v50 = vld [vmem:[#allocation20 + $0xf4] ss:$12 sps:$4 sm:$0xff]  }
 0xa53   : > { %6727 = vmatmul.mubr.bf16.vlgmr.msra.gmra.mrb[60].mxu1 %v13554_v0 }
 0xa54   : > { %6809 = vmatmul.mubr.bf16.vlgmr.msra.gmra.mrb[44].mxu0 %v13554_v0  ;;  %8779 = vmatpush1.bf16.msra.mxu1 %v11790_v3  ;;  %v11811_v0 = vld [vmem:[#allocation20 + $0x1c8] ss:$12 sps:$4 sm:$0xff]  }
 0xa55   : > { %8820 = vmatpush1.bf16.msra.mxu0 %v11793_v52  ;;  %8780 = vmatprep.subr.bf16.mxu1 %v11798_v53  ;;  %v11855_v3 = vld [vmem:[#allocation20 + $0x274] ss:$12 sps:$4 sm:$0xff]   ;;  %v11850_v52 = vld [vmem:[#allocation20 + $0xf0] ss:$12 sps:$4 sm:$0xff]  }
 0xa56   : > { %8821 = vmatprep.subr.bf16.mxu0 %v11801_v54  ;;  %v11853_v53 = vld [vmem:[#allocation20 + $0x270] ss:$12 sps:$4 sm:$0xff]   ;;  %v11858_v54 = vld [vmem:[#allocation20 + $0x10c] ss:$12 sps:$4 sm:$0xff]  }
 0xa58   : > { %8781 = vmatpush1.bf16.msra.mxu1 %v11796_v55  ;;  %v11861_v55 = vld [vmem:[#allocation20 + $0x28c] ss:$12 sps:$4 sm:$0xff]  }
 0xa59   : > { %8822 = vmatpush1.bf16.msra.mxu0 %v11799_v56  ;;  %8782 = vmatprep.subr.bf16.mxu1 %v11804_v58  ;;  %v11856_v56 = vld [vmem:[#allocation20 + $0x108] ss:$12 sps:$4 sm:$0xff]  }
 0xa5a   : > { %8823 = vmatprep.subr.bf16.mxu0 %v11807_v59  ;;  %v11859_v58 = vld [vmem:[#allocation20 + $0x288] ss:$12 sps:$4 sm:$0xff]   ;;  %v11864_v59 = vld [vmem:[#allocation20 + $0x124] ss:$12 sps:$4 sm:$0xff]  }
 0xa5c   : > { %8783 = vmatpush1.bf16.msra.mxu1 %v11802_v61  ;;  %v11867_v61 = vld [vmem:[#allocation20 + $0x2a4] ss:$12 sps:$4 sm:$0xff]  }
 0xa5d   : > { %8824 = vmatpush1.bf16.msra.mxu0 %v11805_v2  ;;  %8784 = vmatprep.subr.bf16.mxu1 %v11810_v4  ;;  %v11862_v2 = vld [vmem:[#allocation20 + $0x120] ss:$12 sps:$4 sm:$0xff]  }
 0xa5e   : > { %8825 = vmatprep.subr.bf16.mxu0 %v11813_v5  ;;  %v11865_v4 = vld [vmem:[#allocation20 + $0x2a0] ss:$12 sps:$4 sm:$0xff]   ;;  %v11870_v5 = vld [vmem:[#allocation20 + $0x13c] ss:$12 sps:$4 sm:$0xff]  }
 0xa60   : > { %8785 = vmatpush1.bf16.msra.mxu1 %v11808_v7  ;;  %v11873_v7 = vld [vmem:[#allocation20 + $0x2bc] ss:$12 sps:$4 sm:$0xff]  }
 0xa61   : > { %8826 = vmatpush1.bf16.msra.mxu0 %v11811_v0  ;;  %8786 = vmatprep.subr.bf16.mxu1 %v11816_v8  ;;  %v11868_v0 = vld [vmem:[#allocation20 + $0x138] ss:$12 sps:$4 sm:$0xff]   ;;  %v4828_v8 = vrot.slane %v13575_v60, %v13206_v25 }
 0xa62   : > { %8827 = vmatprep.subr.bf16.mxu0 %v11819_v9  ;;  %v11871_v9 = vld [vmem:[#allocation20 + $0x2b8] ss:$12 sps:$4 sm:$0xff]  }
 0xa64   : > { %8787 = vmatpush1.bf16.msra.mxu1 %v11814_v10  ;;  %v11876_v10 = vld [vmem:[#allocation20 + $0x154] ss:$12 sps:$4 sm:$0xff]  }
 0xa65   : > { %8828 = vmatpush1.bf16.msra.mxu0 %v11817_v12  ;;  %8788 = vmatprep.subr.bf16.mxu1 %v11822_v13  ;;  %v4836_v12 = vrot.slane %v13575_v60, %v13239_v62  ;;  %v11879_v13 = vld [vmem:[#allocation20 + $0x2d4] ss:$12 sps:$4 sm:$0xff]  }
 0xa66   : > { %v13582_v26 = vpop.f32.mrb[52].mxu1  ;;  %v13584_v57 = vpop.f32.mrb[36].mxu0  ;;  %8829 = vmatprep.subr.bf16.mxu0 %v11825_v32  ;;  %v11874_v32 = vld [vmem:[#allocation20 + $0x150] ss:$12 sps:$4 sm:$0xff]  }
 0xa67   : > { %v6402_v27 = vpop.f32.mrb[53].mxu1  ;;  %v6484_v18 = vpop.f32.mrb[37].mxu0 }
 0xa68   : > { %v10716_v29 = vadd.f32 %v6402_v27, %v4832_v14  ;;  %v10718_v63 = vadd.f32 %v6484_v18, %v4840_v15  ;;  %v6404_v30 = vpop.f32.mrb[54].mxu1  ;;  %v6486_v39 = vpop.f32.mrb[38].mxu0  ;;  %8789 = vmatpush1.bf16.msra.mxu1 %v11820_v19  ;;  %v10715_v14 = vadd.f32 %v13582_v26, %v4828_v8  ;;  %v11877_v15 = vld [vmem:[#allocation20 + $0x2d0] ss:$12 sps:$4 sm:$0xff]   ;;  %v11882_v19 = vld [vmem:[#allocation20 + $0x16c] ss:$12 sps:$4 sm:$0xff]  }
 0xa69   : > { %8830 = vmatpush1.bf16.msra.mxu0 %v11823_v20  ;;  %v6405_v31 = vpop.f32.mrb[55].mxu1  ;;  %v6487_v43 = vpop.f32.mrb[39].mxu0  ;;  %8790 = vmatprep.subr.bf16.mxu1 %v11828_v22  ;;  %v10717_v20 = vadd.f32 %v13584_v57, %v4836_v12  ;;  %v11885_v22 = vld [vmem:[#allocation20 + $0x2ec] ss:$12 sps:$4 sm:$0xff]   ;;  %v11883_v18 = vld [vmem:[#allocation20 + $0x2e8] ss:$12 sps:$4 sm:$0xff]  }
 0xa6a   : > { %v6818_v17 = vmax.f32 %v10716_v29, 0.0  ;;  %v6820_v51 = vmax.f32 %v10718_v63, 0.0  ;;  %8831 = vmatprep.subr.bf16.mxu0 %v11831_v21  ;;  %v11880_v21 = vld [vmem:[#allocation20 + $0x168] ss:$12 sps:$4 sm:$0xff]   ;;  %v6817_v27 = vmax.f32 %v10715_v14, 0.0 }
 0xa6b   : > { %v11888_v29 = vld [vmem:[#allocation20 + $0x304] ss:$12 sps:$4 sm:$0xff]   ;;  %v6819_v63 = vmax.f32 %v10717_v20, 0.0  ;;  %v11886_v26 = vld [vmem:[#allocation20 + $0x300] ss:$12 sps:$4 sm:$0xff]  }
 0xa6c   : > { %v13586_v1 = vpack.c.bf16 %v6818_v17, %v6818_v17  ;;  %v13588_v28 = vpack.c.bf16 %v6820_v51, %v6820_v51  ;;  %8791 = vmatpush1.bf16.msra.mxu1 %v11826_v37  ;;  %v11891_v30 = vld [vmem:[#allocation20 + $0x484] ss:$12 sps:$4 sm:$0xff]   ;;  %v13598_v39 = vpack.c.bf16 %v6817_v27, %v6817_v27  ;;  %v11889_v37 = vld [vmem:[#allocation20 + $0x480] ss:$12 sps:$4 sm:$0xff]   ;;  %v11894_v57 = vld [vmem:[#allocation20 + $0x31c] ss:$12 sps:$4 sm:$0xff]  }
 0xa6d   : > { %8832 = vmatpush1.bf16.msra.mxu0 %v11829_v34  ;;  %8792 = vmatprep.subr.bf16.mxu1 %v11834_v16  ;;  %v13600_v31 = vpack.c.bf16 %v6819_v63, %v6819_v63  ;;  %v11897_v43 = vld [vmem:[#allocation20 + $0x49c] ss:$12 sps:$4 sm:$0xff]   ;;  %v11892_v34 = vld [vmem:[#allocation20 + $0x318] ss:$12 sps:$4 sm:$0xff]   ;;  %v11900_v17 = vld [vmem:[#allocation20 + $0x334] ss:$12 sps:$4 sm:$0xff]  }
 0xa6e   : > { %8810 = vmatprep.mubr.bf16.mxu1 %v13586_v1  ;;  %8851 = vmatprep.mubr.bf16.mxu0 %v13588_v28  ;;  %v11895_v16 = vld [vmem:[#allocation20 + $0x498] ss:$12 sps:$4 sm:$0xff]   ;;  %v11903_v51 = vld [vmem:[#allocation20 + $0x4b4] ss:$12 sps:$4 sm:$0xff]   ;;  %v11942_v8 = vld [vmem:[#allocation20 + $0x3dc] ss:$12 sps:$4 sm:$0xff]  }
 0xa6f   : > { %8833 = vmatprep.subr.bf16.mxu0 %v11837_v36  ;;  %v11898_v36 = vld [vmem:[#allocation20 + $0x330] ss:$12 sps:$4 sm:$0xff]   ;;  %v11943_v12 = vld [vmem:[#allocation20 + $0x558] ss:$12 sps:$4 sm:$0xff]   ;;  %v4847_v63 = vsub.s32 5, %v13200_v23 }
 0xa70   : > { %8793 = vmatpush1.bf16.msra.mxu1 %v11832_v38  ;;  %v11901_v38 = vld [vmem:[#allocation20 + $0x4b0] ss:$12 sps:$4 sm:$0xff]   ;;  %v11957_v20 = vld [vmem:[#allocation20 + $0x58c] ss:$12 sps:$4 sm:$0xff]  }
 0xa71   : > { %8834 = vmatpush1.bf16.msra.mxu0 %v11835_v40  ;;  %8794 = vmatprep.subr.bf16.mxu1 %v11840_v33  ;;  %v11906_v40 = vld [vmem:[#allocation20 + $0x34c] ss:$12 sps:$4 sm:$0xff]   ;;  %v11946_v14 = vld [vmem:[#allocation20 + $0x3f0] ss:$12 sps:$4 sm:$0xff]  }
 0xa72   : > { %8835 = vmatprep.subr.bf16.mxu0 %v11843_v41  ;;  %v11909_v33 = vld [vmem:[#allocation20 + $0x4cc] ss:$12 sps:$4 sm:$0xff]   ;;  %v11904_v41 = vld [vmem:[#allocation20 + $0x348] ss:$12 sps:$4 sm:$0xff]   ;;  %v11960_v27 = vld [vmem:[#allocation20 + $0x424] ss:$12 sps:$4 sm:$0xff]  }
 0xa74   : > { %8795 = vmatpush1.bf16.msra.mxu1 %v11838_v42  ;;  %v11907_v42 = vld [vmem:[#allocation20 + $0x4c8] ss:$12 sps:$4 sm:$0xff]  }
 0xa75   : > { %8836 = vmatpush1.bf16.msra.mxu0 %v11841_v45  ;;  %8796 = vmatprep.subr.bf16.mxu1 %v11846_v46  ;;  %v11912_v45 = vld [vmem:[#allocation20 + $0x364] ss:$12 sps:$4 sm:$0xff]  }
 0xa76   : > { %8837 = vmatprep.subr.bf16.mxu0 %v11849_v47  ;;  %v11915_v46 = vld [vmem:[#allocation20 + $0x4e4] ss:$12 sps:$4 sm:$0xff]   ;;  %v11910_v47 = vld [vmem:[#allocation20 + $0x360] ss:$12 sps:$4 sm:$0xff]  }
 0xa78   : > { %8797 = vmatpush1.bf16.msra.mxu1 %v11844_v48  ;;  %v11913_v48 = vld [vmem:[#allocation20 + $0x4e0] ss:$12 sps:$4 sm:$0xff]  }
 0xa79   : > { %8838 = vmatpush1.bf16.msra.mxu0 %v11847_v49  ;;  %8798 = vmatprep.subr.bf16.mxu1 %v11852_v50  ;;  %v11918_v49 = vld [vmem:[#allocation20 + $0x37c] ss:$12 sps:$4 sm:$0xff]  }
 0xa7a   : > { %8839 = vmatprep.subr.bf16.mxu0 %v11855_v3  ;;  %v11921_v50 = vld [vmem:[#allocation20 + $0x4fc] ss:$12 sps:$4 sm:$0xff]   ;;  %v11916_v3 = vld [vmem:[#allocation20 + $0x378] ss:$12 sps:$4 sm:$0xff]  }
 0xa7c   : > { %8799 = vmatpush1.bf16.msra.mxu1 %v11850_v52  ;;  %v11919_v52 = vld [vmem:[#allocation20 + $0x4f8] ss:$12 sps:$4 sm:$0xff]  }
 0xa7d   : > { %8840 = vmatpush1.bf16.msra.mxu0 %v11853_v53  ;;  %8800 = vmatprep.subr.bf16.mxu1 %v11858_v54  ;;  %v11924_v53 = vld [vmem:[#allocation20 + $0x394] ss:$12 sps:$4 sm:$0xff]  }
 0xa7e   : > { %8841 = vmatprep.subr.bf16.mxu0 %v11861_v55  ;;  %v11927_v54 = vld [vmem:[#allocation20 + $0x514] ss:$12 sps:$4 sm:$0xff]   ;;  %v11922_v55 = vld [vmem:[#allocation20 + $0x390] ss:$12 sps:$4 sm:$0xff]  }
 0xa80   : > { %8801 = vmatpush1.bf16.msra.mxu1 %v11856_v56  ;;  %v11925_v56 = vld [vmem:[#allocation20 + $0x510] ss:$12 sps:$4 sm:$0xff]  }
 0xa81   : > { %8842 = vmatpush1.bf16.msra.mxu0 %v11859_v58  ;;  %8802 = vmatprep.subr.bf16.mxu1 %v11864_v59  ;;  %v11930_v58 = vld [vmem:[#allocation20 + $0x3ac] ss:$12 sps:$4 sm:$0xff]  }
 0xa82   : > { %8843 = vmatprep.subr.bf16.mxu0 %v11867_v61  ;;  %v11933_v59 = vld [vmem:[#allocation20 + $0x52c] ss:$12 sps:$4 sm:$0xff]   ;;  %v11928_v61 = vld [vmem:[#allocation20 + $0x3a8] ss:$12 sps:$4 sm:$0xff]  }
 0xa84   : > { %8803 = vmatpush1.bf16.msra.mxu1 %v11862_v2  ;;  %v11931_v2 = vld [vmem:[#allocation20 + $0x528] ss:$12 sps:$4 sm:$0xff]  }
 0xa85   : > { %8844 = vmatpush1.bf16.msra.mxu0 %v11865_v4  ;;  %8804 = vmatprep.subr.bf16.mxu1 %v11870_v5  ;;  %v11936_v4 = vld [vmem:[#allocation20 + $0x3c4] ss:$12 sps:$4 sm:$0xff]  }
 0xa86   : > { %8845 = vmatprep.subr.bf16.mxu0 %v11873_v7  ;;  %v11939_v5 = vld [vmem:[#allocation20 + $0x544] ss:$12 sps:$4 sm:$0xff]   ;;  %v11934_v7 = vld [vmem:[#allocation20 + $0x3c0] ss:$12 sps:$4 sm:$0xff]  }
 0xa88   : > { %8805 = vmatpush1.bf16.msra.mxu1 %v11868_v0  ;;  %v11937_v0 = vld [vmem:[#allocation20 + $0x540] ss:$12 sps:$4 sm:$0xff]  }
 0xa89   : > { %8846 = vmatpush1.bf16.msra.mxu0 %v11871_v9  ;;  %8806 = vmatprep.subr.bf16.mxu1 %v11876_v10  ;;  %v11945_v9 = vld [vmem:[#allocation20 + $0x55c] ss:$12 sps:$4 sm:$0xff]   ;;  %v11940_v10 = vld [vmem:[#allocation20 + $0x3d8] ss:$12 sps:$4 sm:$0xff]  }
 0xa8a   : > { %8847 = vmatprep.subr.bf16.mxu0 %v11879_v13  ;;  %v11948_v13 = vld [vmem:[#allocation20 + $0x3f4] ss:$12 sps:$4 sm:$0xff]  }
 0xa8c   : > { %8807 = vmatpush1.bf16.msra.mxu1 %v11874_v32  ;;  %v11951_v32 = vld [vmem:[#allocation20 + $0x574] ss:$12 sps:$4 sm:$0xff]  }
 0xa8d   : > { %8848 = vmatpush1.bf16.msra.mxu0 %v11877_v15  ;;  %8808 = vmatprep.subr.bf16.mxu1 %v11882_v19  ;;  %v11949_v15 = vld [vmem:[#allocation20 + $0x570] ss:$12 sps:$4 sm:$0xff]   ;;  %v11954_v19 = vld [vmem:[#allocation20 + $0x40c] ss:$12 sps:$4 sm:$0xff]  }
 0xa8e   : > { %8849 = vmatprep.subr.bf16.mxu0 %v11885_v22  ;;  %v11952_v22 = vld [vmem:[#allocation20 + $0x408] ss:$12 sps:$4 sm:$0xff]  }
 0xa90   : > { %8809 = vmatpush1.bf16.msra.mxu1 %v11880_v21  ;;  %v11955_v21 = vld [vmem:[#allocation20 + $0x588] ss:$12 sps:$4 sm:$0xff]  }
 0xa91   : > { %8850 = vmatpush1.bf16.msra.mxu0 %v11883_v18  ;;  %8860 = vmatprep.subr.bf16.mxu1 %v11888_v29  ;;  %v11963_v18 = vld [vmem:[#allocation20 + $0x5a4] ss:$12 sps:$4 sm:$0xff]   ;;  %v11958_v29 = vld [vmem:[#allocation20 + $0x420] ss:$12 sps:$4 sm:$0xff]  }
 0xa92   : > { %8901 = vmatprep.subr.bf16.mxu0 %v11891_v30  ;;  %v11961_v30 = vld [vmem:[#allocation20 + $0x5a0] ss:$12 sps:$4 sm:$0xff]  }
 0xa93   : > { %8811 = vmatmul.mubr.bf16.vlgmr.msra.gmra.mrb[64].mxu1 %v13598_v39 }
 0xa94   : > { %8852 = vmatmul.mubr.bf16.vlgmr.msra.gmra.mrb[48].mxu0 %v13600_v31  ;;  %8861 = vmatpush1.bf16.msra.mxu1 %v11886_v26  ;;  %v4843_v26 = vsub.s32 4, %v13200_v23 }
 0xa95   : > { %8902 = vmatpush1.bf16.msra.mxu0 %v11889_v37  ;;  %8862 = vmatprep.subr.bf16.mxu1 %v11894_v57  ;;  %v4855_v37 = vsub.s32 7, %v13200_v23  ;;  %v11966_v57 = vld [vmem:[#allocation20 + $0x43c] ss:$12 sps:$4 sm:$0xff]  }
 0xa96   : > { %8903 = vmatprep.subr.bf16.mxu0 %v11897_v43  ;;  %v4851_v43 = vsub.s32 6, %v13200_v23  ;;  %v12080_v23 = vld [vmem:[#allocation20 + $0x8] ss:$12 sps:$4 sm:$0xff]  }
 0xa98   : > { %8863 = vmatpush1.bf16.msra.mxu1 %v11892_v34  ;;  %v11969_v34 = vld [vmem:[#allocation20 + $0x5bc] ss:$12 sps:$4 sm:$0xff]  }
 0xa99   : > { %8904 = vmatpush1.bf16.msra.mxu0 %v11895_v16  ;;  %8864 = vmatprep.subr.bf16.mxu1 %v11900_v17  ;;  %v4848_v16 = vrot.slane %v13575_v60, %v4847_v63  ;;  %v11964_v17 = vld [vmem:[#allocation20 + $0x438] ss:$12 sps:$4 sm:$0xff]   ;;  %v11997_v63 = vld [vmem:[#allocation20 + $0x7b0] ss:$12 sps:$4 sm:$0xff]  }
 0xa9a   : > { %8905 = vmatprep.subr.bf16.mxu0 %v11903_v51  ;;  %v4844_v51 = vrot.slane %v13575_v60, %v4843_v26  ;;  %v12005_v26 = vld [vmem:[#allocation20 + $0x7cc] ss:$12 sps:$4 sm:$0xff]  }
 0xa9c   : > { %8865 = vmatpush1.bf16.msra.mxu1 %v11898_v36  ;;  %v4856_v36 = vrot.slane %v13575_v60, %v4855_v37  ;;  %v12000_v37 = vld [vmem:[#allocation20 + $0x648] ss:$12 sps:$4 sm:$0xff]  }
 0xa9d   : > { %8906 = vmatpush1.bf16.msra.mxu0 %v11901_v38  ;;  %8866 = vmatprep.subr.bf16.mxu1 %v11906_v40  ;;  %v11967_v38 = vld [vmem:[#allocation20 + $0x5b8] ss:$12 sps:$4 sm:$0xff]   ;;  %v11972_v40 = vld [vmem:[#allocation20 + $0x454] ss:$12 sps:$4 sm:$0xff]  }
 0xa9e   : > { %8907 = vmatprep.subr.bf16.mxu0 %v11909_v33 }
 0xaa0   : > { %8867 = vmatpush1.bf16.msra.mxu1 %v11904_v41  ;;  %v4852_v41 = vrot.slane %v13575_v60, %v4851_v43  ;;  %v12008_v43 = vld [vmem:[#allocation20 + $0x664] ss:$12 sps:$4 sm:$0xff]  }
 0xaa1   : > { %8908 = vmatpush1.bf16.msra.mxu0 %v11907_v42  ;;  %8868 = vmatprep.subr.bf16.mxu1 %v11912_v45  ;;  %v11975_v42 = vld [vmem:[#allocation20 + $0x5d4] ss:$12 sps:$4 sm:$0xff]  }
 0xaa2   : > { %8909 = vmatprep.subr.bf16.mxu0 %v11915_v46 }
 0xaa4   : > { %8869 = vmatpush1.bf16.msra.mxu1 %v11910_v47 }
 0xaa5   : > { %8910 = vmatpush1.bf16.msra.mxu0 %v11913_v48  ;;  %8870 = vmatprep.subr.bf16.mxu1 %v11918_v49 }
 0xaa6   : > { %8911 = vmatprep.subr.bf16.mxu0 %v11921_v50  ;;  %v11970_v50 = vld [vmem:[#allocation20 + $0x450] ss:$12 sps:$4 sm:$0xff]  }
 0xaa8   : > { %8871 = vmatpush1.bf16.msra.mxu1 %v11916_v3 }
 0xaa9   : > { %8912 = vmatpush1.bf16.msra.mxu0 %v11919_v52  ;;  %8872 = vmatprep.subr.bf16.mxu1 %v11924_v53 }
 0xaaa   : > { %8913 = vmatprep.subr.bf16.mxu0 %v11927_v54 }
 0xaac   : > { %8873 = vmatpush1.bf16.msra.mxu1 %v11922_v55  ;;  %v11973_v55 = vld [vmem:[#allocation20 + $0x5d0] ss:$12 sps:$4 sm:$0xff]  }
 0xaad   : > { %8914 = vmatpush1.bf16.msra.mxu0 %v11925_v56  ;;  %8874 = vmatprep.subr.bf16.mxu1 %v11930_v58  ;;  %v11978_v56 = vld [vmem:[#allocation20 + $0x46c] ss:$12 sps:$4 sm:$0xff]  }
 0xaae   : > { %8915 = vmatprep.subr.bf16.mxu0 %v11933_v59 }
 0xab0   : > { %8875 = vmatpush1.bf16.msra.mxu1 %v11928_v61  ;;  %v11981_v61 = vld [vmem:[#allocation20 + $0x5ec] ss:$12 sps:$4 sm:$0xff]  }
 0xab1   : > { %8916 = vmatpush1.bf16.msra.mxu0 %v11931_v2  ;;  %8876 = vmatprep.subr.bf16.mxu1 %v11936_v4 }
 0xab2   : > { %8917 = vmatprep.subr.bf16.mxu0 %v11939_v5  ;;  %v11976_v5 = vld [vmem:[#allocation20 + $0x468] ss:$12 sps:$4 sm:$0xff]  }
 0xab4   : > { %8877 = vmatpush1.bf16.msra.mxu1 %v11934_v7 }
 0xab5   : > { %8918 = vmatpush1.bf16.msra.mxu0 %v11937_v0  ;;  %8878 = vmatprep.subr.bf16.mxu1 %v11942_v8  ;;  %v11979_v8 = vld [vmem:[#allocation20 + $0x5e8] ss:$12 sps:$4 sm:$0xff]  }
 0xab6   : > { %8919 = vmatprep.subr.bf16.mxu0 %v11945_v9  ;;  %v11984_v9 = vld [vmem:[#allocation20 + $0x604] ss:$12 sps:$4 sm:$0xff]  }
 0xab8   : > { %8879 = vmatpush1.bf16.msra.mxu1 %v11940_v10 }
 0xab9   : > { %8920 = vmatpush1.bf16.msra.mxu0 %v11943_v12  ;;  %8880 = vmatprep.subr.bf16.mxu1 %v11948_v13  ;;  %v11987_v12 = vld [vmem:[#allocation20 + $0x784] ss:$12 sps:$4 sm:$0xff]   ;;  %v11982_v13 = vld [vmem:[#allocation20 + $0x600] ss:$12 sps:$4 sm:$0xff]  }
 0xaba   : > { %8921 = vmatprep.subr.bf16.mxu0 %v11951_v32 }
 0xabc   : > { %8881 = vmatpush1.bf16.msra.mxu1 %v11946_v14  ;;  %v11985_v14 = vld [vmem:[#allocation20 + $0x780] ss:$12 sps:$4 sm:$0xff]  }
 0xabd   : > { %8922 = vmatpush1.bf16.msra.mxu0 %v11949_v15  ;;  %8882 = vmatprep.subr.bf16.mxu1 %v11954_v19  ;;  %v11990_v15 = vld [vmem:[#allocation20 + $0x61c] ss:$12 sps:$4 sm:$0xff]  }
 0xabe   : > { %8923 = vmatprep.subr.bf16.mxu0 %v11957_v20  ;;  %v11993_v20 = vld [vmem:[#allocation20 + $0x79c] ss:$12 sps:$4 sm:$0xff]  }
 0xac0   : > { %8883 = vmatpush1.bf16.msra.mxu1 %v11952_v22  ;;  %v11988_v22 = vld [vmem:[#allocation20 + $0x618] ss:$12 sps:$4 sm:$0xff]  }
 0xac1   : > { %8924 = vmatpush1.bf16.msra.mxu0 %v11955_v21  ;;  %8884 = vmatprep.subr.bf16.mxu1 %v11960_v27  ;;  %v11991_v21 = vld [vmem:[#allocation20 + $0x798] ss:$12 sps:$4 sm:$0xff]   ;;  %v11996_v27 = vld [vmem:[#allocation20 + $0x634] ss:$12 sps:$4 sm:$0xff]  }
 0xac2   : > { %8925 = vmatprep.subr.bf16.mxu0 %v11963_v18  ;;  %v11999_v18 = vld [vmem:[#allocation20 + $0x7b4] ss:$12 sps:$4 sm:$0xff]  }
 0xac4   : > { %8885 = vmatpush1.bf16.msra.mxu1 %v11958_v29  ;;  %v11994_v29 = vld [vmem:[#allocation20 + $0x630] ss:$12 sps:$4 sm:$0xff]  }
 0xac5   : > { %8926 = vmatpush1.bf16.msra.mxu0 %v11961_v30  ;;  %8886 = vmatprep.subr.bf16.mxu1 %v11966_v57  ;;  %v12002_v30 = vld [vmem:[#allocation20 + $0x64c] ss:$12 sps:$4 sm:$0xff]   ;;  %v12003_v57 = vld [vmem:[#allocation20 + $0x7c8] ss:$12 sps:$4 sm:$0xff]  }
 0xac6   : > { %v6564_v33 = vpop.f32.mrb[56].mxu1  ;;  %8927 = vmatprep.subr.bf16.mxu0 %v11969_v34  ;;  %v12011_v34 = vld [vmem:[#allocation20 + $0x7e4] ss:$12 sps:$4 sm:$0xff]  }
 0xac7   : > { %v6646_v45 = vpop.f32.mrb[40].mxu0  ;;  %v6566_v46 = vpop.f32.mrb[57].mxu1  ;;  %v10719_v3 = vadd.f32 %v6564_v33, %v4844_v51  ;;  %v12014_v51 = vld [vmem:[#allocation20 + $0x67c] ss:$12 sps:$4 sm:$0xff]   ;;  %v12020_v33 = vld [vmem:[#allocation20 + $0x694] ss:$12 sps:$4 sm:$0xff]  }
 0xac8   : > { %v10720_v47 = vadd.f32 %v6566_v46, %v4848_v16  ;;  %v6648_v48 = vpop.f32.mrb[41].mxu0  ;;  %v6568_v49 = vpop.f32.mrb[58].mxu1  ;;  %8887 = vmatpush1.bf16.msra.mxu1 %v11964_v17  ;;  %v10721_v58 = vadd.f32 %v6646_v45, %v4852_v41  ;;  %v12006_v16 = vld [vmem:[#allocation20 + $0x660] ss:$12 sps:$4 sm:$0xff]   ;;  %v12021_v45 = vld [vmem:[#allocation20 + $0x810] ss:$12 sps:$4 sm:$0xff]  }
 0xac9   : > { %v10722_v52 = vadd.f32 %v6648_v48, %v4856_v36  ;;  %v6650_v53 = vpop.f32.mrb[42].mxu0  ;;  %8928 = vmatpush1.bf16.msra.mxu0 %v11967_v38  ;;  %v6569_v54 = vpop.f32.mrb[59].mxu1  ;;  %8888 = vmatprep.subr.bf16.mxu1 %v11972_v40  ;;  %v6821_v7 = vmax.f32 %v10719_v3, 0.0  ;;  %v12009_v17 = vld [vmem:[#allocation20 + $0x7e0] ss:$12 sps:$4 sm:$0xff]  }
 0xaca   : > { %v6822_v59 = vmax.f32 %v10720_v47, 0.0  ;;  %v6651_v60 = vpop.f32.mrb[43].mxu0  ;;  %8929 = vmatprep.subr.bf16.mxu0 %v11975_v42  ;;  %v6823_v10 = vmax.f32 %v10721_v58, 0.0  ;;  %v12017_v36 = vld [vmem:[#allocation20 + $0x7fc] ss:$12 sps:$4 sm:$0xff]  }
 0xacb   : > { %v6824_v2 = vmax.f32 %v10722_v52, 0.0  ;;  %v13618_v32 = vpack.c.bf16 %v6821_v7, %v6821_v7  ;;  %v12012_v38 = vld [vmem:[#allocation20 + $0x678] ss:$12 sps:$4 sm:$0xff]   ;;  %v12023_v41 = vld [vmem:[#allocation20 + $0x814] ss:$12 sps:$4 sm:$0xff]  }
 0xacc   : > { %v13612_v4 = vpack.c.bf16 %v6822_v59, %v6822_v59  ;;  %8889 = vmatpush1.bf16.msra.mxu1 %v11970_v50  ;;  %v13620_v19 = vpack.c.bf16 %v6823_v10, %v6823_v10  ;;  %v12015_v40 = vld [vmem:[#allocation20 + $0x7f8] ss:$12 sps:$4 sm:$0xff]   ;;  %v12018_v42 = vld [vmem:[#allocation20 + $0x690] ss:$12 sps:$4 sm:$0xff]   ;;  %v12024_v48 = vld [vmem:[#allocation20 + $0x6a8] ss:$12 sps:$4 sm:$0xff]  }
 0xacd   : > { %v13614_v0 = vpack.c.bf16 %v6824_v2, %v6824_v2  ;;  %8930 = vmatpush1.bf16.msra.mxu0 %v11973_v55  ;;  %8890 = vmatprep.subr.bf16.mxu1 %v11978_v56  ;;  %v12026_v46 = vld [vmem:[#allocation20 + $0x6ac] ss:$12 sps:$4 sm:$0xff]   ;;  %v12027_v49 = vld [vmem:[#allocation20 + $0x828] ss:$12 sps:$4 sm:$0xff]   ;;  %v12032_v50 = vld [vmem:[#allocation20 + $0x6c4] ss:$12 sps:$4 sm:$0xff]  }
 0xace   : > { %8892 = vmatprep.mubr.bf16.mxu1 %v13612_v4  ;;  %8931 = vmatprep.subr.bf16.mxu0 %v11981_v61  ;;  %v12029_v47 = vld [vmem:[#allocation20 + $0x82c] ss:$12 sps:$4 sm:$0xff]   ;;  %v12035_v3 = vld [vmem:[#allocation20 + $0x844] ss:$12 sps:$4 sm:$0xff]   ;;  %v12038_v54 = vld [vmem:[#allocation20 + $0x6dc] ss:$12 sps:$4 sm:$0xff]  }
 0xacf   : > { %8933 = vmatprep.mubr.bf16.mxu0 %v13614_v0  ;;  %v12030_v52 = vld [vmem:[#allocation20 + $0x6c0] ss:$12 sps:$4 sm:$0xff]   ;;  %v12041_v55 = vld [vmem:[#allocation20 + $0x85c] ss:$12 sps:$4 sm:$0xff]   ;;  %v12036_v56 = vld [vmem:[#allocation20 + $0x6d8] ss:$12 sps:$4 sm:$0xff]  }
 0xad0   : > { %8891 = vmatpush1.bf16.msra.mxu1 %v11976_v5  ;;  %v12033_v53 = vld [vmem:[#allocation20 + $0x840] ss:$12 sps:$4 sm:$0xff]   ;;  %v12039_v58 = vld [vmem:[#allocation20 + $0x858] ss:$12 sps:$4 sm:$0xff]   ;;  %v12042_v61 = vld [vmem:[#allocation20 + $0x6f0] ss:$12 sps:$4 sm:$0xff]  }
 0xad1   : > { %8932 = vmatpush1.bf16.msra.mxu0 %v11979_v8  ;;  %8942 = vmatprep.subr.bf16.mxu1 %v11984_v9  ;;  %v12044_v59 = vld [vmem:[#allocation20 + $0x6f4] ss:$12 sps:$4 sm:$0xff]   ;;  %v12045_v2 = vld [vmem:[#allocation20 + $0x870] ss:$12 sps:$4 sm:$0xff]   ;;  %v12050_v5 = vld [vmem:[#allocation20 + $0x70c] ss:$12 sps:$4 sm:$0xff]  }
 0xad2   : > { %8983 = vmatprep.subr.bf16.mxu0 %v11987_v12  ;;  %v12047_v60 = vld [vmem:[#allocation20 + $0x874] ss:$12 sps:$4 sm:$0xff]   ;;  %v12053_v7 = vld [vmem:[#allocation20 + $0x88c] ss:$12 sps:$4 sm:$0xff]   ;;  %v12056_v10 = vld [vmem:[#allocation20 + $0x724] ss:$12 sps:$4 sm:$0xff]  }
 0xad3   : > { %8893 = vmatmul.mubr.bf16.vlgmr.msra.gmra.mrb[68].mxu1 %v13618_v32  ;;  %v12048_v8 = vld [vmem:[#allocation20 + $0x708] ss:$12 sps:$4 sm:$0xff]   ;;  %v12059_v12 = vld [vmem:[#allocation20 + $0x8a4] ss:$12 sps:$4 sm:$0xff]  }
 0xad4   : > { %8934 = vmatmul.mubr.bf16.vlgmr.msra.gmra.mrb[52].mxu0 %v13620_v19  ;;  %8943 = vmatpush1.bf16.msra.mxu1 %v11982_v13  ;;  %v12051_v9 = vld [vmem:[#allocation20 + $0x888] ss:$12 sps:$4 sm:$0xff]   ;;  %v12054_v13 = vld [vmem:[#allocation20 + $0x720] ss:$12 sps:$4 sm:$0xff]  }
 0xad5   : > { %8984 = vmatpush1.bf16.msra.mxu0 %v11985_v14  ;;  %8944 = vmatprep.subr.bf16.mxu1 %v11990_v15  ;;  %v12057_v14 = vld [vmem:[#allocation20 + $0x8a0] ss:$12 sps:$4 sm:$0xff]   ;;  %v12062_v15 = vld [vmem:[#allocation20 + $0x73c] ss:$12 sps:$4 sm:$0xff]  }
 0xad6   : > { %8985 = vmatprep.subr.bf16.mxu0 %v11993_v20  ;;  %v12065_v20 = vld [vmem:[#allocation20 + $0x8bc] ss:$12 sps:$4 sm:$0xff]  }
 0xad8   : > { %8945 = vmatpush1.bf16.msra.mxu1 %v11988_v22  ;;  %v12060_v22 = vld [vmem:[#allocation20 + $0x738] ss:$12 sps:$4 sm:$0xff]  }
 0xad9   : > { %8986 = vmatpush1.bf16.msra.mxu0 %v11991_v21  ;;  %8946 = vmatprep.subr.bf16.mxu1 %v11996_v27  ;;  %v12063_v21 = vld [vmem:[#allocation20 + $0x8b8] ss:$12 sps:$4 sm:$0xff]   ;;  %v12068_v27 = vld [vmem:[#allocation20 + $0x754] ss:$12 sps:$4 sm:$0xff]  }
 0xada   : > { %8987 = vmatprep.subr.bf16.mxu0 %v11999_v18  ;;  %v12071_v18 = vld [vmem:[#allocation20 + $0x8d4] ss:$12 sps:$4 sm:$0xff]  }
 0xadc   : > { %8947 = vmatpush1.bf16.msra.mxu1 %v11994_v29  ;;  %v12066_v29 = vld [vmem:[#allocation20 + $0x750] ss:$12 sps:$4 sm:$0xff]  }
 0xadd   : > { %8988 = vmatpush1.bf16.msra.mxu0 %v11997_v63  ;;  %8948 = vmatprep.subr.bf16.mxu1 %v12002_v30  ;;  %v12069_v63 = vld [vmem:[#allocation20 + $0x8d0] ss:$12 sps:$4 sm:$0xff]   ;;  %v12074_v30 = vld [vmem:[#allocation20 + $0x76c] ss:$12 sps:$4 sm:$0xff]  }
 0xade   : > { %8989 = vmatprep.subr.bf16.mxu0 %v12005_v26  ;;  %v12077_v26 = vld [vmem:[#allocation20 + $0x8ec] ss:$12 sps:$4 sm:$0xff]  }
 0xae0   : > { %8949 = vmatpush1.bf16.msra.mxu1 %v12000_v37  ;;  %v12072_v37 = vld [vmem:[#allocation20 + $0x768] ss:$12 sps:$4 sm:$0xff]  }
 0xae1   : > { %8990 = vmatpush1.bf16.msra.mxu0 %v12003_v57  ;;  %8950 = vmatprep.subr.bf16.mxu1 %v12008_v43  ;;  %v12075_v57 = vld [vmem:[#allocation20 + $0x8e8] ss:$12 sps:$4 sm:$0xff]  }
 0xae2   : > { %8991 = vmatprep.subr.bf16.mxu0 %v12011_v34  ;;  %v12078_v43 = vld [vmem:[#allocation20 + $0xc8] ss:$12 sps:$4 sm:$0xff]  }
 0xae3   : > { %v12079_v34 = vld [vmem:[#allocation20 + $0x248] ss:$12 sps:$4 sm:$0xff]  }
 0xae4   : > { %8951 = vmatpush1.bf16.msra.mxu1 %v12006_v16  ;;  %v4822_v16 = vld [vmem:[#allocation19 + $0x8] sm:$0xf] }
 0xae5   : > { %8992 = vmatpush1.bf16.msra.mxu0 %v12009_v17  ;;  %8952 = vmatprep.subr.bf16.mxu1 %v12014_v51  ;;  %v4860_v17 = vrot.slane %v4822_v16, %v13206_v25  ;;  %v4868_v51 = vrot.slane %v4822_v16, %v13239_v62 }
 0xae6   : > { %8993 = vmatprep.subr.bf16.mxu0 %v12017_v36  ;;  %v4864_v36 = vrot.slane %v4822_v16, %v13203_v24 }
 0xae8   : > { %8953 = vmatpush1.bf16.msra.mxu1 %v12012_v38  ;;  %v4872_v38 = vrot.slane %v4822_v16, %v4839_v11  ;;  %v12107_v16 = vld [vmem:[#allocation20 + $0x2f0] ss:$12 sps:$4 sm:$0xff]  }
 0xae9   : > { %8994 = vmatpush1.bf16.msra.mxu0 %v12015_v40  ;;  %8954 = vmatprep.subr.bf16.mxu1 %v12020_v33 }
 0xaea   : > { %8995 = vmatprep.subr.bf16.mxu0 %v12023_v41 }
 0xaec   : > { %8955 = vmatpush1.bf16.msra.mxu1 %v12018_v42 }
 0xaed   : > { %8996 = vmatpush1.bf16.msra.mxu0 %v12021_v45  ;;  %8956 = vmatprep.subr.bf16.mxu1 %v12026_v46 }
 0xaee   : > { %8997 = vmatprep.subr.bf16.mxu0 %v12029_v47 }
 0xaf0   : > { %8957 = vmatpush1.bf16.msra.mxu1 %v12024_v48 }
 0xaf1   : > { %8998 = vmatpush1.bf16.msra.mxu0 %v12027_v49  ;;  %8958 = vmatprep.subr.bf16.mxu1 %v12032_v50 }
 0xaf2   : > { %8999 = vmatprep.subr.bf16.mxu0 %v12035_v3 }
 0xaf4   : > { %8959 = vmatpush1.bf16.msra.mxu1 %v12030_v52 }
 0xaf5   : > { %9000 = vmatpush1.bf16.msra.mxu0 %v12033_v53  ;;  %8960 = vmatprep.subr.bf16.mxu1 %v12038_v54 }
 0xaf6   : > { %9001 = vmatprep.subr.bf16.mxu0 %v12041_v55 }
 0xaf8   : > { %8961 = vmatpush1.bf16.msra.mxu1 %v12036_v56 }
 0xaf9   : > { %9002 = vmatpush1.bf16.msra.mxu0 %v12039_v58  ;;  %8962 = vmatprep.subr.bf16.mxu1 %v12044_v59 }
 0xafa   : > { %9003 = vmatprep.subr.bf16.mxu0 %v12047_v60  ;;  %v12081_v60 = vld [vmem:[#allocation20 + $0x188] ss:$12 sps:$4 sm:$0xff]  }
 0xafc   : > { %8963 = vmatpush1.bf16.msra.mxu1 %v12042_v61 }
 0xafd   : > { %9004 = vmatpush1.bf16.msra.mxu0 %v12045_v2  ;;  %8964 = vmatprep.subr.bf16.mxu1 %v12050_v5  ;;  %v12082_v2 = vld [vmem:[#allocation20 + $0xe0] ss:$12 sps:$4 sm:$0xff]  }
 0xafe   : > { %9005 = vmatprep.subr.bf16.mxu0 %v12053_v7  ;;  %v12083_v5 = vld [vmem:[#allocation20 + $0x260] ss:$12 sps:$4 sm:$0xff]  }
 0xaff   : > { %v12084_v7 = vld [vmem:[#allocation20 + $0x20] ss:$12 sps:$4 sm:$0xff]  }
 0xb00   : > { %8965 = vmatpush1.bf16.msra.mxu1 %v12048_v8  ;;  %v12085_v8 = vld [vmem:[#allocation20 + $0x1a0] ss:$12 sps:$4 sm:$0xff]  }
 0xb01   : > { %9006 = vmatpush1.bf16.msra.mxu0 %v12051_v9  ;;  %8966 = vmatprep.subr.bf16.mxu1 %v12056_v10  ;;  %v12086_v9 = vld [vmem:[#allocation20 + $0xf8] ss:$12 sps:$4 sm:$0xff]  }
 0xb02   : > { %9007 = vmatprep.subr.bf16.mxu0 %v12059_v12  ;;  %v12087_v10 = vld [vmem:[#allocation20 + $0x278] ss:$12 sps:$4 sm:$0xff]  }
 0xb03   : > { %v12088_v12 = vld [vmem:[#allocation20 + $0x38] ss:$12 sps:$4 sm:$0xff]  }
 0xb04   : > { %8967 = vmatpush1.bf16.msra.mxu1 %v12054_v13  ;;  %v12089_v13 = vld [vmem:[#allocation20 + $0x1b8] ss:$12 sps:$4 sm:$0xff]  }
 0xb05   : > { %9008 = vmatpush1.bf16.msra.mxu0 %v12057_v14  ;;  %8968 = vmatprep.subr.bf16.mxu1 %v12062_v15  ;;  %v12090_v14 = vld [vmem:[#allocation20 + $0x110] ss:$12 sps:$4 sm:$0xff]  }
 0xb06   : > { %9009 = vmatprep.subr.bf16.mxu0 %v12065_v20  ;;  %v12091_v15 = vld [vmem:[#allocation20 + $0x290] ss:$12 sps:$4 sm:$0xff]  }
 0xb07   : > { %v12092_v20 = vld [vmem:[#allocation20 + $0x50] ss:$12 sps:$4 sm:$0xff]  }
 0xb08   : > { %8969 = vmatpush1.bf16.msra.mxu1 %v12060_v22  ;;  %v12094_v22 = vld [vmem:[#allocation20 + $0x128] ss:$12 sps:$4 sm:$0xff]  }
 0xb09   : > { %9010 = vmatpush1.bf16.msra.mxu0 %v12063_v21  ;;  %8970 = vmatprep.subr.bf16.mxu1 %v12068_v27  ;;  %v12095_v21 = vld [vmem:[#allocation20 + $0x2a8] ss:$12 sps:$4 sm:$0xff]  }
 0xb0a   : > { %9011 = vmatprep.subr.bf16.mxu0 %v12071_v18  ;;  %v12097_v27 = vld [vmem:[#allocation20 + $0x1e8] ss:$12 sps:$4 sm:$0xff]   ;;  %v12098_v18 = vld [vmem:[#allocation20 + $0x140] ss:$12 sps:$4 sm:$0xff]  }
 0xb0c   : > { %8971 = vmatpush1.bf16.msra.mxu1 %v12066_v29  ;;  %v12099_v29 = vld [vmem:[#allocation20 + $0x2c0] ss:$12 sps:$4 sm:$0xff]  }
 0xb0d   : > { %9012 = vmatpush1.bf16.msra.mxu0 %v12069_v63  ;;  %8972 = vmatprep.subr.bf16.mxu1 %v12074_v30  ;;  %v12100_v63 = vld [vmem:[#allocation20 + $0x80] ss:$12 sps:$4 sm:$0xff]  }
 0xb0e   : > { %9013 = vmatprep.subr.bf16.mxu0 %v12077_v26  ;;  %v12101_v30 = vld [vmem:[#allocation20 + $0x200] ss:$12 sps:$4 sm:$0xff]   ;;  %v12102_v26 = vld [vmem:[#allocation20 + $0x158] ss:$12 sps:$4 sm:$0xff]  }
 0xb10   : > { %8973 = vmatpush1.bf16.msra.mxu1 %v12072_v37  ;;  %v12103_v37 = vld [vmem:[#allocation20 + $0x2d8] ss:$12 sps:$4 sm:$0xff]  }
 0xb11   : > { %9014 = vmatpush1.bf16.msra.mxu0 %v12075_v57  ;;  %10471 = vmatprep.subr.bf16.mxu1 %v12078_v43  ;;  %v12104_v57 = vld [vmem:[#allocation20 + $0x98] ss:$12 sps:$4 sm:$0xff]  }
 0xb12   : > { %10493 = vmatprep.subr.bf16.mxu0 %v12079_v34  ;;  %v12105_v43 = vld [vmem:[#allocation20 + $0x218] ss:$12 sps:$4 sm:$0xff]   ;;  %v12106_v34 = vld [vmem:[#allocation20 + $0x170] ss:$12 sps:$4 sm:$0xff]  }
 0xb26   : > { %v6728_v40 = vpop.f32.mrb[60].mxu1 }
 0xb27   : > { %v10723_v33 = vadd.f32 %v6728_v40, %v4860_v17  ;;  %v6810_v41 = vpop.f32.mrb[44].mxu0  ;;  %v6730_v42 = vpop.f32.mrb[61].mxu1  ;;  %v12108_v17 = vld [vmem:[#allocation20 + $0xb0] ss:$12 sps:$4 sm:$0xff]   ;;  %v12112_v40 = vld [vmem:[#allocation20 + $0x308] ss:$12 sps:$4 sm:$0xff]  }
 0xb28   : > { %v10725_v45 = vadd.f32 %v6810_v41, %v4868_v51  ;;  %v10724_v46 = vadd.f32 %v6730_v42, %v4864_v36  ;;  %v6812_v47 = vpop.f32.mrb[45].mxu0  ;;  %v6732_v48 = vpop.f32.mrb[62].mxu1  ;;  %v12109_v51 = vld [vmem:[#allocation20 + $0x230] ss:$12 sps:$4 sm:$0xff]   ;;  %v12110_v36 = vld [vmem:[#allocation20 + $0x3c8] ss:$12 sps:$4 sm:$0xff]  }
 0xb29   : > { %v6825_v49 = vmax.f32 %v10723_v33, 0.0  ;;  %v10726_v50 = vadd.f32 %v6812_v47, %v4872_v38  ;;  %v6814_v3 = vpop.f32.mrb[46].mxu0  ;;  %v6733_v52 = vpop.f32.mrb[63].mxu1  ;;  %v12111_v38 = vld [vmem:[#allocation20 + $0x548] ss:$12 sps:$4 sm:$0xff]  }
 0xb2a   : > { %v6827_v53 = vmax.f32 %v10725_v45, 0.0  ;;  %v6826_v54 = vmax.f32 %v10724_v46, 0.0  ;;  %v6815_v55 = vpop.f32.mrb[47].mxu0  ;;  %v12113_v33 = vld [vmem:[#allocation20 + $0x488] ss:$12 sps:$4 sm:$0xff]  }
 0xb2b   : > { %v6828_v56 = vmax.f32 %v10726_v50, 0.0  ;;  %v13631_v11 = vpack.c.bf16 %v6825_v49, %v6825_v49  ;;  %v12114_v41 = vld [vmem:[#allocation20 + $0x3e0] ss:$12 sps:$4 sm:$0xff]   ;;  %v12118_v47 = vld [vmem:[#allocation20 + $0x3f8] ss:$12 sps:$4 sm:$0xff]  }
 0xb2c   : > { %v13629_v58 = vpack.c.bf16 %v6826_v54, %v6826_v54  ;;  %v13635_v61 = vpack.c.bf16 %v6827_v53, %v6827_v53  ;;  %v12115_v42 = vld [vmem:[#allocation20 + $0x560] ss:$12 sps:$4 sm:$0xff]   ;;  %v12119_v48 = vld [vmem:[#allocation20 + $0x578] ss:$12 sps:$4 sm:$0xff]   ;;  %v12122_v50 = vld [vmem:[#allocation20 + $0x410] ss:$12 sps:$4 sm:$0xff]  }
 0xb2d   : > { %v13633_v59 = vpack.c.bf16 %v6828_v56, %v6828_v56  ;;  %v12116_v45 = vld [vmem:[#allocation20 + $0x320] ss:$12 sps:$4 sm:$0xff]   ;;  %v12120_v49 = vld [vmem:[#allocation20 + $0x338] ss:$12 sps:$4 sm:$0xff]   ;;  %v12124_v3 = vld [vmem:[#allocation20 + $0x350] ss:$12 sps:$4 sm:$0xff]  }
 0xb2e   : > { %8974 = vmatprep.mubr.bf16.mxu1 %v13629_v58  ;;  %v12117_v46 = vld [vmem:[#allocation20 + $0x4a0] ss:$12 sps:$4 sm:$0xff]   ;;  %v12126_v52 = vld [vmem:[#allocation20 + $0x428] ss:$12 sps:$4 sm:$0xff]  }
 0xb2f   : > { %9015 = vmatprep.mubr.bf16.mxu0 %v13633_v59  ;;  %8975 = vmatmul.mubr.bf16.vlgmr.msra.gmra.mrb[72].mxu1 %v13631_v11  ;;  %v12127_v53 = vld [vmem:[#allocation20 + $0x5a8] ss:$12 sps:$4 sm:$0xff]   ;;  %v12130_v55 = vld [vmem:[#allocation20 + $0x440] ss:$12 sps:$4 sm:$0xff]  }
 0xb30   : > { %9016 = vmatmul.mubr.bf16.vlgmr.msra.gmra.mrb[56].mxu0 %v13635_v61  ;;  %10472 = vmatpush3.bf16.msra.mxu1 %v12080_v23  ;;  %v12129_v54 = vld [vmem:[#allocation20 + $0x4e8] ss:$12 sps:$4 sm:$0xff]   ;;  %v12131_v56 = vld [vmem:[#allocation20 + $0x5c0] ss:$12 sps:$4 sm:$0xff]  }
 0xb31   : > { %10494 = vmatpush3.bf16.msra.mxu0 %v12081_v60  ;;  %9056 = vmatprep.mubr.bf16.mxu1 %v13586_v1  ;;  %v12093_v1 = vld [vmem:[#allocation20 + $0x1d0] ss:$12 sps:$4 sm:$0xff]   ;;  %v12132_v23 = vld [vmem:[#allocation20 + $0x380] ss:$12 sps:$4 sm:$0xff]  }
 0xb32   : > { %9096 = vmatprep.mubr.bf16.mxu0 %v13588_v28  ;;  %10473 = vmatprep.subr.bf16.mxu1 %v12082_v2  ;;  %v12096_v28 = vld [vmem:[#allocation20 + $0x68] ss:$12 sps:$4 sm:$0xff]   ;;  %v13647_v60 = vld [vmem:[#allocation22] sm:$0x7] }
 0xb33   : > { %10495 = vmatprep.subr.bf16.mxu0 %v12083_v5  ;;  %v12133_v2 = vld [vmem:[#allocation20 + $0x500] ss:$12 sps:$4 sm:$0xff]   ;;  %v12134_v5 = vld [vmem:[#allocation20 + $0x458] ss:$12 sps:$4 sm:$0xff]  }
 0xb34   : > { %10474 = vmatpush3.bf16.msra.mxu1 %v12084_v7  ;;  %v12135_v7 = vld [vmem:[#allocation20 + $0x5d8] ss:$12 sps:$4 sm:$0xff]  }
 0xb35   : > { %10496 = vmatpush3.bf16.msra.mxu0 %v12085_v8  ;;  %10475 = vmatprep.subr.bf16.mxu1 %v12086_v9  ;;  %v7230_v8 = vrot.slane %v13647_v60, %v13206_v25  ;;  %v7234_v9 = vrot.slane %v13647_v60, %v13203_v24  ;;  %v12140_v25 = vld [vmem:[#allocation20 + $0x3b0] ss:$12 sps:$4 sm:$0xff]  }
 0xb36   : > { %10497 = vmatprep.subr.bf16.mxu0 %v12087_v10  ;;  %v12136_v10 = vld [vmem:[#allocation20 + $0x398] ss:$12 sps:$4 sm:$0xff]  }
 0xb38   : > { %10476 = vmatpush3.bf16.msra.mxu1 %v12088_v12  ;;  %v12137_v12 = vld [vmem:[#allocation20 + $0x518] ss:$12 sps:$4 sm:$0xff]  }
 0xb39   : > { %10498 = vmatpush3.bf16.msra.mxu0 %v12089_v13  ;;  %10477 = vmatprep.subr.bf16.mxu1 %v12090_v14  ;;  %v12138_v13 = vld [vmem:[#allocation20 + $0x470] ss:$12 sps:$4 sm:$0xff]  }
 0xb3a   : > { %10499 = vmatprep.subr.bf16.mxu0 %v12091_v15  ;;  %v12139_v15 = vld [vmem:[#allocation20 + $0x5f0] ss:$12 sps:$4 sm:$0xff]  }
 0xb3c   : > { %10478 = vmatpush3.bf16.msra.mxu1 %v12092_v20 }
 0xb3d   : > { %10500 = vmatpush3.bf16.msra.mxu0 %v12093_v1  ;;  %10479 = vmatprep.subr.bf16.mxu1 %v12094_v22 }
 0xb3e   : > { %10501 = vmatprep.subr.bf16.mxu0 %v12095_v21 }
 0xb40   : > { %10480 = vmatpush3.bf16.msra.mxu1 %v12096_v28 }
 0xb41   : > { %10502 = vmatpush3.bf16.msra.mxu0 %v12097_v27  ;;  %10481 = vmatprep.subr.bf16.mxu1 %v12098_v18 }
 0xb42   : > { %10503 = vmatprep.subr.bf16.mxu0 %v12099_v29 }
 0xb44   : > { %10482 = vmatpush3.bf16.msra.mxu1 %v12100_v63  ;;  %v12141_v63 = vld [vmem:[#allocation20 + $0x530] ss:$12 sps:$4 sm:$0xff]  }
 0xb45   : > { %10504 = vmatpush3.bf16.msra.mxu0 %v12101_v30  ;;  %10483 = vmatprep.subr.bf16.mxu1 %v12102_v26  ;;  %v12142_v30 = vld [vmem:[#allocation20 + $0x6c8] ss:$12 sps:$4 sm:$0xff]  }
 0xb46   : > { %10505 = vmatprep.subr.bf16.mxu0 %v12103_v37 }
 0xb48   : > { %10484 = vmatpush3.bf16.msra.mxu1 %v12104_v57  ;;  %v12143_v57 = vld [vmem:[#allocation20 + $0x848] ss:$12 sps:$4 sm:$0xff]  }
 0xb49   : > { %10506 = vmatpush3.bf16.msra.mxu0 %v12105_v43  ;;  %10485 = vmatprep.subr.bf16.mxu1 %v12106_v34  ;;  %v12144_v43 = vld [vmem:[#allocation20 + $0x608] ss:$12 sps:$4 sm:$0xff]  }
 0xb4a   : > { %10507 = vmatprep.subr.bf16.mxu0 %v12107_v16  ;;  %v12145_v34 = vld [vmem:[#allocation20 + $0x788] ss:$12 sps:$4 sm:$0xff]   ;;  %v12146_v16 = vld [vmem:[#allocation20 + $0x6e0] ss:$12 sps:$4 sm:$0xff]  }
 0xb4c   : > { %10486 = vmatpush3.bf16.msra.mxu1 %v12108_v17  ;;  %v12147_v17 = vld [vmem:[#allocation20 + $0x860] ss:$12 sps:$4 sm:$0xff]  }
 0xb4d   : > { %10508 = vmatpush3.bf16.msra.mxu0 %v12109_v51  ;;  %10515 = vmatprep.subr.bf16.mxu1 %v12110_v36  ;;  %v12148_v51 = vld [vmem:[#allocation20 + $0x620] ss:$12 sps:$4 sm:$0xff]  }
 0xb4e   : > { %10537 = vmatprep.subr.bf16.mxu0 %v12111_v38  ;;  %v12149_v36 = vld [vmem:[#allocation20 + $0x7a0] ss:$12 sps:$4 sm:$0xff]   ;;  %v12150_v38 = vld [vmem:[#allocation20 + $0x6f8] ss:$12 sps:$4 sm:$0xff]  }
 0xb4f   : > { %9057 = vmatmul.mubr.bf16.vlgmr.msra.gmra.mrb[76].mxu1 %v13598_v39  ;;  %v12121_v39 = vld [vmem:[#allocation20 + $0x4b8] ss:$12 sps:$4 sm:$0xff]  }
 0xb50   : > { %9097 = vmatmul.mubr.bf16.vlgmr.msra.gmra.mrb[60].mxu0 %v13600_v31  ;;  %10516 = vmatpush3.bf16.msra.mxu1 %v12112_v40  ;;  %v12123_v31 = vld [vmem:[#allocation20 + $0x590] ss:$12 sps:$4 sm:$0xff]   ;;  %v12151_v40 = vld [vmem:[#allocation20 + $0x878] ss:$12 sps:$4 sm:$0xff]  }
 0xb51   : > { %9136 = vmatprep.mubr.bf16.mxu1 %v13612_v4  ;;  %10538 = vmatpush3.bf16.msra.mxu0 %v12113_v33  ;;  %v12125_v4 = vld [vmem:[#allocation20 + $0x4d0] ss:$12 sps:$4 sm:$0xff]   ;;  %v12152_v33 = vld [vmem:[#allocation20 + $0x638] ss:$12 sps:$4 sm:$0xff]  }
 0xb52   : > { %9176 = vmatprep.mubr.bf16.mxu0 %v13614_v0  ;;  %10517 = vmatprep.subr.bf16.mxu1 %v12114_v41  ;;  %v12128_v0 = vld [vmem:[#allocation20 + $0x368] ss:$12 sps:$4 sm:$0xff]   ;;  %v12154_v41 = vld [vmem:[#allocation20 + $0x710] ss:$12 sps:$4 sm:$0xff]  }
 0xb53   : > { %10539 = vmatprep.subr.bf16.mxu0 %v12115_v42  ;;  %v12156_v42 = vld [vmem:[#allocation20 + $0x650] ss:$12 sps:$4 sm:$0xff]  }
 0xb54   : > { %10518 = vmatpush3.bf16.msra.mxu1 %v12116_v45  ;;  %v12158_v45 = vld [vmem:[#allocation20 + $0x728] ss:$12 sps:$4 sm:$0xff]  }
 0xb55   : > { %10540 = vmatpush3.bf16.msra.mxu0 %v12117_v46  ;;  %10519 = vmatprep.subr.bf16.mxu1 %v12118_v47  ;;  %v12159_v46 = vld [vmem:[#allocation20 + $0x8a8] ss:$12 sps:$4 sm:$0xff]  }
 0xb56   : > { %10541 = vmatprep.subr.bf16.mxu0 %v12119_v48  ;;  %v12161_v47 = vld [vmem:[#allocation20 + $0x7e8] ss:$12 sps:$4 sm:$0xff]   ;;  %v12162_v48 = vld [vmem:[#allocation20 + $0x740] ss:$12 sps:$4 sm:$0xff]  }
 0xb58   : > { %10520 = vmatpush3.bf16.msra.mxu1 %v12120_v49  ;;  %v12163_v49 = vld [vmem:[#allocation20 + $0x8c0] ss:$12 sps:$4 sm:$0xff]  }
 0xb59   : > { %10542 = vmatpush3.bf16.msra.mxu0 %v12121_v39  ;;  %10521 = vmatprep.subr.bf16.mxu1 %v12122_v50  ;;  %v12164_v39 = vld [vmem:[#allocation20 + $0x680] ss:$12 sps:$4 sm:$0xff]  }
 0xb5a   : > { %10543 = vmatprep.subr.bf16.mxu0 %v12123_v31  ;;  %v12165_v50 = vld [vmem:[#allocation20 + $0x800] ss:$12 sps:$4 sm:$0xff]   ;;  %v12166_v31 = vld [vmem:[#allocation20 + $0x758] ss:$12 sps:$4 sm:$0xff]  }
 0xb5c   : > { %10522 = vmatpush3.bf16.msra.mxu1 %v12124_v3  ;;  %v12167_v3 = vld [vmem:[#allocation20 + $0x8d8] ss:$12 sps:$4 sm:$0xff]  }
 0xb5d   : > { %10544 = vmatpush3.bf16.msra.mxu0 %v12125_v4  ;;  %10523 = vmatprep.subr.bf16.mxu1 %v12126_v52  ;;  %v12168_v4 = vld [vmem:[#allocation20 + $0x698] ss:$12 sps:$4 sm:$0xff]  }
 0xb5e   : > { %10545 = vmatprep.subr.bf16.mxu0 %v12127_v53  ;;  %v12169_v52 = vld [vmem:[#allocation20 + $0x818] ss:$12 sps:$4 sm:$0xff]   ;;  %v12170_v53 = vld [vmem:[#allocation20 + $0x770] ss:$12 sps:$4 sm:$0xff]  }
 0xb60   : > { %10524 = vmatpush3.bf16.msra.mxu1 %v12128_v0  ;;  %v12171_v0 = vld [vmem:[#allocation20 + $0x8f0] ss:$12 sps:$4 sm:$0xff]  }
 0xb61   : > { %10546 = vmatpush3.bf16.msra.mxu0 %v12129_v54  ;;  %10525 = vmatprep.subr.bf16.mxu1 %v12130_v55  ;;  %v12172_v54 = vld [vmem:[#allocation20 + $0x6b0] ss:$12 sps:$4 sm:$0xff]  }
 0xb62   : > { %10547 = vmatprep.subr.bf16.mxu0 %v12131_v56  ;;  %v12173_v55 = vld [vmem:[#allocation20 + $0x830] ss:$12 sps:$4 sm:$0xff]  }
 0xb64   : > { %10526 = vmatpush3.bf16.msra.mxu1 %v12132_v23 }
 0xb65   : > { %10548 = vmatpush3.bf16.msra.mxu0 %v12133_v2  ;;  %10527 = vmatprep.subr.bf16.mxu1 %v12134_v5 }
 0xb66   : > { %v8812_v14 = vpop.f32.mrb[64].mxu1  ;;  %10549 = vmatprep.subr.bf16.mxu0 %v12135_v7 }
 0xb67   : > { %v8813_v20 = vadd.f32 %v8812_v14, %v7230_v8  ;;  %v8853_v1 = vpop.f32.mrb[48].mxu0  ;;  %v8814_v22 = vpop.f32.mrb[65].mxu1 }
 0xb68   : > { %v8815_v21 = vadd.f32 %v8814_v22, %v7234_v9  ;;  %v8855_v28 = vpop.f32.mrb[49].mxu0  ;;  %10528 = vmatpush3.bf16.msra.mxu1 %v12136_v10  ;;  %v8816_v27 = vpop.f32.mrb[66].mxu1 }
 0xb69   : > { %v13653_v18 = vadd.f32 %v8853_v1, %v8813_v20  ;;  %10550 = vmatpush3.bf16.msra.mxu0 %v12137_v12  ;;  %v8857_v24 = vpop.f32.mrb[50].mxu0  ;;  %v8817_v29 = vpop.f32.mrb[67].mxu1  ;;  %10529 = vmatprep.subr.bf16.mxu1 %v12138_v13 }
 0xb6a   : > { %v13655_v26 = vadd.f32 %v8855_v28, %v8815_v21  ;;  %v8858_v37 = vpop.f32.mrb[51].mxu0  ;;  %10551 = vmatprep.subr.bf16.mxu0 %v12139_v15 }
 0xb6b   : > { %v7238_v37 = vrot.slane %v13647_v60, %v13239_v62 }
 0xb6c   : > { %10530 = vmatpush3.bf16.msra.mxu1 %v12140_v25 }
 0xb6d   : > { %10552 = vmatpush3.bf16.msra.mxu0 %v12141_v63  ;;  %10559 = vmatprep.subr.bf16.mxu1 %v12142_v30 }
 0xb6e   : > { %10581 = vmatprep.subr.bf16.mxu0 %v12143_v57 }
 0xb6f   : > { %9137 = vmatmul.mubr.bf16.vlgmr.msra.gmra.mrb[80].mxu1 %v13618_v32  ;;  %v12153_v32 = vld [vmem:[#allocation20 + $0x7b8] ss:$12 sps:$4 sm:$0xff]  }
 0xb70   : > { %9177 = vmatmul.mubr.bf16.vlgmr.msra.gmra.mrb[64].mxu0 %v13620_v19  ;;  %10560 = vmatpush3.bf16.msra.mxu1 %v12144_v43  ;;  %v12155_v19 = vld [vmem:[#allocation20 + $0x890] ss:$12 sps:$4 sm:$0xff]  }
 0xb71   : > { %9216 = vmatprep.mubr.bf16.mxu1 %v13629_v58  ;;  %10582 = vmatpush3.bf16.msra.mxu0 %v12145_v34  ;;  %v12157_v58 = vld [vmem:[#allocation20 + $0x7d0] ss:$12 sps:$4 sm:$0xff]  }
 0xb72   : > { %9256 = vmatprep.mubr.bf16.mxu0 %v13633_v59  ;;  %10561 = vmatprep.subr.bf16.mxu1 %v12146_v16  ;;  %v12160_v59 = vld [vmem:[#allocation20 + $0x668] ss:$12 sps:$4 sm:$0xff]  }
 0xb73   : > { %10583 = vmatprep.subr.bf16.mxu0 %v12147_v17 }
 0xb74   : > { %10562 = vmatpush3.bf16.msra.mxu1 %v12148_v51 }
 0xb75   : > { %10584 = vmatpush3.bf16.msra.mxu0 %v12149_v36  ;;  %10563 = vmatprep.subr.bf16.mxu1 %v12150_v38 }
 0xb76   : > { %10585 = vmatprep.subr.bf16.mxu0 %v12151_v40 }
 0xb78   : > { %10564 = vmatpush3.bf16.msra.mxu1 %v12152_v33 }
 0xb79   : > { %10586 = vmatpush3.bf16.msra.mxu0 %v12153_v32  ;;  %10565 = vmatprep.subr.bf16.mxu1 %v12154_v41 }
 0xb7a   : > { %10587 = vmatprep.subr.bf16.mxu0 %v12155_v19 }
 0xb7c   : > { %10566 = vmatpush3.bf16.msra.mxu1 %v12156_v42 }
 0xb7d   : > { %10588 = vmatpush3.bf16.msra.mxu0 %v12157_v58  ;;  %10567 = vmatprep.subr.bf16.mxu1 %v12158_v45 }
 0xb7e   : > { %10589 = vmatprep.subr.bf16.mxu0 %v12159_v46 }
 0xb80   : > { %10568 = vmatpush3.bf16.msra.mxu1 %v12160_v59 }
 0xb81   : > { %10590 = vmatpush3.bf16.msra.mxu0 %v12161_v47  ;;  %10569 = vmatprep.subr.bf16.mxu1 %v12162_v48 }
 0xb82   : > { %10591 = vmatprep.subr.bf16.mxu0 %v12163_v49 }
 0xb84   : > { %10570 = vmatpush3.bf16.msra.mxu1 %v12164_v39 }
 0xb85   : > { %10592 = vmatpush3.bf16.msra.mxu0 %v12165_v50  ;;  %10571 = vmatprep.subr.bf16.mxu1 %v12166_v31 }
 0xb86   : > { %10593 = vmatprep.subr.bf16.mxu0 %v12167_v3 }
 0xb88   : > { %10572 = vmatpush3.bf16.msra.mxu1 %v12168_v4 }
 0xb89   : > { %10594 = vmatpush3.bf16.msra.mxu0 %v12169_v52  ;;  %10573 = vmatprep.subr.bf16.mxu1 %v12170_v53 }
 0xb8a   : > { %10595 = vmatprep.subr.bf16.mxu0 %v12171_v0 }
 0xb8c   : > { %10574 = vmatpush3.bf16.msra.mxu1 %v12172_v54 }
 0xb8d   : > { %10596 = vmatpush3.bf16.msra.mxu0 %v12173_v55 }
 0xb8f   : > { %9217 = vmatmul.mubr.bf16.vlgmr.msra.gmra.mrb[84].mxu1 %v13631_v11 }
 0xb90   : > { %9257 = vmatmul.mubr.bf16.vlgmr.msra.gmra.mrb[68].mxu0 %v13635_v61 }
 0xba6   : > { %v8894_v56 = vpop.f32.mrb[68].mxu1 }
 0xba7   : > { %v8895_v23 = vadd.f32 %v8894_v56, %v13653_v18  ;;  %v8935_v2 = vpop.f32.mrb[52].mxu0  ;;  %v8896_v5 = vpop.f32.mrb[69].mxu1 }
 0xba8   : > { %v8897_v7 = vadd.f32 %v8896_v5, %v13655_v26  ;;  %v8937_v8 = vpop.f32.mrb[53].mxu0  ;;  %v8898_v9 = vpop.f32.mrb[70].mxu1 }
 0xba9   : > { %v8936_v10 = vadd.f32 %v8935_v2, %v8895_v23  ;;  %v8939_v12 = vpop.f32.mrb[54].mxu0  ;;  %v8899_v13 = vpop.f32.mrb[71].mxu1 }
 0xbaa   : > { %v8938_v14 = vadd.f32 %v8937_v8, %v8897_v7  ;;  %v8940_v15 = vpop.f32.mrb[55].mxu0 }
 0xc02   : > { %v8976_v20 = vpop.f32.mrb[72].mxu1 }
 0xc03   : > { %v8977_v1 = vadd.f32 %v8976_v20, %v8936_v10  ;;  %v9017_v11 = vpop.f32.mrb[56].mxu0  ;;  %v8978_v22 = vpop.f32.mrb[73].mxu1 }
 0xc04   : > { %v8979_v61 = vadd.f32 %v8978_v22, %v8938_v14  ;;  %v9019_v21 = vpop.f32.mrb[57].mxu0  ;;  %v8980_v28 = vpop.f32.mrb[74].mxu1 }
 0xc05   : > { %v9018_v27 = vadd.f32 %v9017_v11, %v8977_v1  ;;  %v9021_v25 = vpop.f32.mrb[58].mxu0  ;;  %v8981_v18 = vpop.f32.mrb[75].mxu1 }
 0xc06   : > { %v9020_v24 = vadd.f32 %v9019_v21, %v8979_v61  ;;  %v9022_v29 = vpop.f32.mrb[59].mxu0 }
 0xc07   : > { %v9264_v63 = vadd.f32 %v9018_v27, %v13501_v35 }
 0xc08   : > { %v9265_v30 = vadd.f32 %v9020_v24, %v13504_v44 }
 0xc09   : > { %9267 = vst [vmem:[%s13668_s17] sm:$0xff] %v9264_v63 }
 0xc0a   : > { %9268 = vst [vmem:[%s13668_s17 + $0x8] sm:$0xff] %v9265_v30 }
 0xc22   : > { %v10487_v26 = vpop.f32.mrb[76].mxu1 }
 0xc23   : > { %v10509_v57 = vpop.f32.mrb[60].mxu0  ;;  %v10488_v43 = vpop.f32.mrb[77].mxu1 }
 0xc24   : > { %v10489_v34 = vadd.f32 %v10488_v43, %v10487_v26  ;;  %v10510_v16 = vpop.f32.mrb[61].mxu0  ;;  %v10490_v17 = vpop.f32.mrb[78].mxu1 }
 0xc25   : > { %v10511_v51 = vadd.f32 %v10510_v16, %v10509_v57  ;;  %v10512_v36 = vpop.f32.mrb[62].mxu0  ;;  %v10491_v35 = vpop.f32.mrb[79].mxu1 }
 0xc26   : > { %v9059_v38 = vadd.f32 %v10489_v34, %v7238_v37  ;;  %v10513_v44 = vpop.f32.mrb[63].mxu0 }
 0xc28   : > { %v9099_v40 = vadd.f32 %v10511_v51, %v9059_v38 }
 0xc42   : > { %v10531_v33 = vpop.f32.mrb[80].mxu1 }
 0xc43   : > { %v10553_v32 = vpop.f32.mrb[64].mxu0  ;;  %v10532_v41 = vpop.f32.mrb[81].mxu1 }
 0xc44   : > { %v10533_v19 = vadd.f32 %v10532_v41, %v10531_v33  ;;  %v10554_v42 = vpop.f32.mrb[65].mxu0  ;;  %v10534_v58 = vpop.f32.mrb[82].mxu1 }
 0xc45   : > { %v10555_v45 = vadd.f32 %v10554_v42, %v10553_v32  ;;  %v10556_v46 = vpop.f32.mrb[66].mxu0  ;;  %v10535_v62 = vpop.f32.mrb[83].mxu1 }
 0xc46   : > { %v9139_v60 = vadd.f32 %v10533_v19, %v9099_v40  ;;  %v10557_v59 = vpop.f32.mrb[67].mxu0 }
 0xc48   : > { %v9179_v47 = vadd.f32 %v10555_v45, %v9139_v60 }
 0xc62   : > { %v10575_v48 = vpop.f32.mrb[84].mxu1 }
 0xc63   : > { %v10597_v49 = vpop.f32.mrb[68].mxu0  ;;  %v10576_v39 = vpop.f32.mrb[85].mxu1 }
 0xc64   : > { %v10577_v50 = vadd.f32 %v10576_v39, %v10575_v48  ;;  %v10598_v31 = vpop.f32.mrb[69].mxu0  ;;  %v10578_v3 = vpop.f32.mrb[86].mxu1 }
 0xc65   : > { %v10599_v4 = vadd.f32 %v10598_v31, %v10597_v49  ;;  %v10600_v52 = vpop.f32.mrb[70].mxu0  ;;  %v10579_v53 = vpop.f32.mrb[87].mxu1 }
 0xc66   : > { %v9219_v0 = vadd.f32 %v10577_v50, %v9179_v47  ;;  %v10601_v54 = vpop.f32.mrb[71].mxu0 }
 0xc68   : > { %v9259_v55 = vadd.f32 %v10599_v4, %v9219_v0 }
 0xc6a   : > { %v9266_v56 = vadd.f32 %v9259_v55, %v13511_v6 }
 0xc6c   : > { %9269 = vst [vmem:[%s13668_s17 + $0x10] sm:$0xff] %v9266_v56 }
 0xc6d   : > { %12585 = shalt.err (!%p12582_p4)
}
 0xc6e   : > { %s12586_s1 = scalar_lea.hbm %s13680_s3, 384  ;;  %s12590_s15 = scalar_lea.hbm %s13792_s0, 768 }
 0xc6f   : > { %p12587_p5 = scmp.ne.s32.totalorder %s13680_s3, %s12586_s1  ;;  %p12591_p3 = scmp.lt.u32.totalorder %s13680_s3, %s13792_s0 }
 0xc70   : > { %p12592_p2 = scmp.lt.u32.totalorder %s12590_s15, %s12586_s1  ;;  %p12594_p8 = scmp.lt.u32.totalorder %s12586_s1, %s13680_s3 }
 0xc71   : > { %p12588_p13 = pnand %p12587_p5, %p13793_p6 }
 0xc72   : > { %p12593_p0 = por %p12592_p2, %p12591_p3 }
 0xc73   : > { %p12589_p1 = pneg %p12588_p13 }
 0xc74   : > { %p12595_p10 = por %p12594_p8, %p12593_p0 }
 0xc76   : > { %p12596_p11 = pnand %p12595_p10, %p12589_p1 }
 0xc78   : > { %12599 = shalt.err (!%p12596_p11)
}
 0xc79   : > { %10821 = dma.vmem_to_hbm [thread:$0]  (%p13793_p6), %s13682_s22, 384, %s13680_s3, %s9271_s24  }
 0xc7a PF: > { %s13794_s21 = sld [smem:[#allocation33_spill]]  ;;  %p13795_p12 = scmp.ne.s32.totalorder %s13772_s18, 0 }
 0xc7b   : > { %p13796_p7 = scmp.ge.s32.totalorder %s12666_s28, 2 }
 0xc7d   : > { %p10865_p9 = pnand %p13796_p7, %p13795_p12 }
 0xc80   : > { %s9297_s30 = sand.u32 1, %s13794_s21  }
 0xc81   : > { %s9298_s16 = scalar_lea.sflag [#allocation4], %s9297_s30 }
 0xc82   : > { %12649 = dma.done.wait (!%p10865_p9), %s9298_s16, 384  }
 0xc83   : > { %12651 = vsyncadd (!%p10865_p9), %s9298_s16, 4294966912  ;;  %p32_p4 = scmp.ge.s32.totalorder %s13072_s2, 4   ;;  %s13797_s25 = smov %s12658_s26 }
 0xc84   : > { %s13798_s26 = smov %s12662_s27  ;;  %s13799_s27 = smov %s13083_s14 }
 0xc85   : > { %s13800_s28 = smov %s13072_s2  ;;  %34 = sbr.rel (!%p32_p4) target bundleno = 17 (0x11), region = 166 }
 0xc8c   :  { %9303 = vsyncpa [#allocation3], 1 }
 0xc8d   :  { %9305 = vsyncpa [#allocation3 + $0x1], 1 }
 0xc8e   :  { %9306 = vsyncpa [#allocation6], 1 }
 0xc8f   :  { %9308 = vsyncpa [#allocation6 + $0x1], 1 }
 0xc90   :  { %9309 = vsyncpa [#allocation9], 1 }
 0xc91   :  { %9310 = vsyncpa [#allocation12], 1 }
 0xc92   :  { %9311 = vsyncpa [#allocation15], 1 }
 0xc93   :  { %9312 = vsyncpa [#allocation18], 1 }
 0xc94   :  { %9313 = vsyncpa [#allocation21], 1 }
 0xc95   :  { %9314 = vsyncpa [#allocation4], 1 }
 0xc96   :  { %9316 = vsyncpa [#allocation4 + $0x1], 1 }

</bundles_post_ra>
